<compile_context>
chip_gen: v6e
topology: v6e:2x2x1
jax: 0.10.0
libtpu: 0.0.40
codegen_flags: <defaults>
</compile_context>

<pallas_src>
import functools

import numpy as np
import jax
import jax.numpy as jnp
from jax.experimental import pallas as pl
from jax.experimental.pallas import tpu as pltpu


H0 = W0 = 4  # spatial size after the Linear reshape (module fixes 2*16*c_hid -> (2*c_hid, 4, 4))


def _round_up(n, m):
    return ((n + m - 1) // m) * m


# ----------------------------------------------------------------------------
# One-time weight lowering: conv / conv-transpose -> flat matmul matrices
# ----------------------------------------------------------------------------
def _conv3x3_same_matrix(w_oihw, H, W):
    """nn.Conv2d(k=3, s=1, p=1) as a (Cin*H*W, Cout*H*W) matrix on NCHW-flat
    activations: out_flat = in_flat @ M (zero padding handled by zero rows)."""
    w = np.asarray(w_oihw, np.float32)              # (Cout, Cin, 3, 3)
    Cout, Cin = w.shape[0], w.shape[1]
    M = np.zeros((Cin * H * W, Cout * H * W), np.float32)
    ci = np.arange(Cin)[:, None] * (H * W)
    co = np.arange(Cout)[None, :] * (H * W)
    for ky in range(3):
        for kx in range(3):
            for y in range(H):
                iy = y + ky - 1
                if not (0 <= iy < H):
                    continue
                for x in range(W):
                    ix = x + kx - 1
                    if not (0 <= ix < W):
                        continue
                    M[ci + iy * W + ix, co + y * W + x] += w[:, :, ky, kx].T
    return M


def _convT3x3_s2_matrix(w_iohw, Hin, Win):
    """nn.ConvTranspose2d(k=3, s=2, p=1, output_padding=1) as a
    (Cin*Hin*Win, Cout*Hout*Wout) matrix on NCHW-flat activations."""
    w = np.asarray(w_iohw, np.float32)              # (Cin, Cout, 3, 3)
    Cin, Cout = w.shape[0], w.shape[1]
    Hout, Wout = 2 * Hin, 2 * Win
    M = np.zeros((Cin * Hin * Win, Cout * Hout * Wout), np.float32)
    ci = np.arange(Cin)[:, None] * (Hin * Win)
    co = np.arange(Cout)[None, :] * (Hout * Wout)
    for ky in range(3):
        for kx in range(3):
            for yi in range(Hin):
                yo = 2 * yi - 1 + ky                # yo = yi*stride - pad + ky
                if not (0 <= yo < Hout):
                    continue
                for xi in range(Win):
                    xo = 2 * xi - 1 + kx
                    if not (0 <= xo < Wout):
                        continue
                    M[ci + yi * Win + xi, co + yo * Wout + xo] += w[:, :, ky, kx]
    return M


def prepare_decoder(params, num_input_channel, c_hid):
    """One-time preprocessing of torch-layout weights into bf16 matmul matrices
    (with the latent dim zero-padded to a multiple of 128) and f32 NCHW-flat
    broadcast biases consumed by the fused Pallas kernel."""
    del num_input_channel  # implied by wt2's shape
    H1, W1 = 2 * H0, 2 * W0          # 8 x 8 after the first ConvTranspose
    H2, W2 = 2 * H1, 2 * W1          # 16 x 16 after the second ConvTranspose
    m1 = _convT3x3_s2_matrix(params["wt1"], H0, W0)   # (2*c_hid*16, c_hid*64)
    m2 = _conv3x3_same_matrix(params["wc"], H1, W1)   # (c_hid*64, c_hid*64)
    m3 = _convT3x3_s2_matrix(params["wt2"], H1, W1)   # (c_hid*64, num_in*256)

    w_lin = np.asarray(params["w_lin"], np.float32)   # (latent, 2*16*c_hid)
    latent = w_lin.shape[0]
    lat_pad = _round_up(latent, 128)                  # lane-dense / full-K first dot
    if lat_pad != latent:
        w_lin = np.concatenate(
            [w_lin, np.zeros((lat_pad - latent, w_lin.shape[1]), np.float32)], axis=0)

    b1 = np.repeat(np.asarray(params["bt1"], np.float32), H1 * W1)
    b2 = np.repeat(np.asarray(params["bc"], np.float32), H1 * W1)
    b3 = np.repeat(np.asarray(params["bt2"], np.float32), H2 * W2)

    bf16 = jnp.bfloat16
    return {
        "w_lin": jnp.asarray(w_lin, bf16),
        "b_lin": jnp.asarray(np.asarray(params["b_lin"], np.float32)[None, :]),
        "m1": jnp.asarray(m1, bf16), "b1": jnp.asarray(b1[None, :]),
        "m2": jnp.asarray(m2, bf16), "b2": jnp.asarray(b2[None, :]),
        "m3": jnp.asarray(m3, bf16), "b3": jnp.asarray(b3[None, :]),
    }


# ----------------------------------------------------------------------------
# Fused Pallas kernel: four chained bf16 matmuls (f32 accumulate) + bias +
# activation, everything resident in VMEM.
# ----------------------------------------------------------------------------
def _decoder_kernel(x_ref, wl_ref, bl_ref, m1_ref, b1_ref,
                    m2_ref, b2_ref, m3_ref, b3_ref, o_ref):
    bf16, f32 = jnp.bfloat16, jnp.float32
    h = jnp.dot(x_ref[...].astype(bf16), wl_ref[...],
                preferred_element_type=f32) + bl_ref[...]
    h = jnp.maximum(h, 0.0).astype(bf16)                               # Linear + ReLU
    h = jnp.dot(h, m1_ref[...], preferred_element_type=f32) + b1_ref[...]
    h = jnp.maximum(h, 0.0).astype(bf16)                               # ConvT1 + ReLU
    h = jnp.dot(h, m2_ref[...], preferred_element_type=f32) + b2_ref[...]
    h = jnp.maximum(h, 0.0).astype(bf16)                               # Conv + ReLU
    h = jnp.dot(h, m3_ref[...], preferred_element_type=f32) + b3_ref[...]
    o_ref[...] = jnp.tanh(h).astype(o_ref.dtype)                       # ConvT2 + Tanh


def _pick_bb(B):
    """Batch rows per grid step: multiple of 8 always; >=2 grid steps for
    mid/large B (v7x 2nd TensorCore); capped at 256 (v6e/v7x MXU rows)."""
    if B <= 16:
        return _round_up(max(B, 1), 8)
    if B <= 512:
        return min(256, _round_up(pl.cdiv(B, 2), 8))
    return 256


@functools.lru_cache(maxsize=None)
def _build_decoder_call(Bp, bb, lat_pad, hid, n1, n2, n_out, single_buffer):
    def wspec(shape):
        kw = {"pipeline_mode": pl.Buffered(1)} if single_buffer else {}
        return pl.BlockSpec(shape, lambda i: (0, 0), **kw)

    call = pl.pallas_call(
        _decoder_kernel,
        out_shape=jax.ShapeDtypeStruct((Bp, n_out), jnp.float32),
        grid_spec=pltpu.PrefetchScalarGridSpec(
            num_scalar_prefetch=0,
            grid=(Bp // bb,),
            in_specs=[pl.BlockSpec((bb, lat_pad), lambda i: (i, 0)),
                      wspec((lat_pad, hid)), wspec((1, hid)),
                      wspec((hid, n1)), wspec((1, n1)),
                      wspec((n1, n2)), wspec((1, n2)),
                      wspec((n2, n_out)), wspec((1, n_out))],
            out_specs=pl.BlockSpec((bb, n_out), lambda i: (i, 0)),
        ),
        compiler_params=pltpu.CompilerParams(
            dimension_semantics=("parallel",),
            vmem_limit_bytes=32 * 1024 * 1024),
    )
    return jax.jit(call)


_SINGLE_BUFFER_WEIGHTS = [True]  # flipped off if pipeline_mode hint is unsupported


def decoder_forward(x, mats):
    B, latent = x.shape
    lat_pad, hid = mats["w_lin"].shape
    n1 = mats["m1"].shape[1]
    n2 = mats["m2"].shape[1]
    n_out = mats["m3"].shape[1]
    num_in = n_out // ((4 * H0) * (4 * W0))        # final spatial is 16 x 16

    bb = _pick_bb(B)
    Bp = pl.cdiv(B, bb) * bb
    xp = x
    if Bp != B or lat_pad != latent:
        xp = jnp.pad(x, ((0, Bp - B), (0, lat_pad - latent)))

    args = (xp, mats["w_lin"], mats["b_lin"], mats["m1"], mats["b1"],
            mats["m2"], mats["b2"], mats["m3"], mats["b3"])

    out = None
    if _SINGLE_BUFFER_WEIGHTS[0]:
        try:
            fn = _build_decoder_call(Bp, bb, lat_pad, hid, n1, n2, n_out, True)
            out = fn(*args)
        except Exception:
            _SINGLE_BUFFER_WEIGHTS[0] = False     # hint unsupported -> default buffering
            out = None
    if out is None:
        fn = _build_decoder_call(Bp, bb, lat_pad, hid, n1, n2, n_out, False)
        out = fn(*args)

    out = out[:B]
    # (B, num_in*16*16) is already NCHW-flat -> this reshape is layout-free.
    return out.reshape(B, num_in, 4 * H0, 4 * W0)


# ----------------------------------------------------------------------------
# Pure-JAX reference (PyTorch semantics) and parameter init
# ----------------------------------------------------------------------------
def decoder_reference(x, params, c_hid):
    B = x.shape[0]
    y = jnp.maximum(x @ params["w_lin"] + params["b_lin"], 0.0)
    y = y.reshape(B, 2 * c_hid, 4, 4)
    dn = ("NCHW", "OIHW", "NCHW")
    w = jnp.transpose(params["wt1"][:, :, ::-1, ::-1], (1, 0, 2, 3))
    y = jax.lax.conv_general_dilated(y, w, (1, 1), [(1, 2), (1, 2)],
                                     lhs_dilation=(2, 2), dimension_numbers=dn)
    y = jnp.maximum(y + params["bt1"][None, :, None, None], 0.0)
    y = jax.lax.conv_general_dilated(y, params["wc"], (1, 1), [(1, 1), (1, 1)],
                                     dimension_numbers=dn)
    y = jnp.maximum(y + params["bc"][None, :, None, None], 0.0)
    w = jnp.transpose(params["wt2"][:, :, ::-1, ::-1], (1, 0, 2, 3))
    y = jax.lax.conv_general_dilated(y, w, (1, 1), [(1, 2), (1, 2)],
                                     lhs_dilation=(2, 2), dimension_numbers=dn)
    y = jnp.tanh(y + params["bt2"][None, :, None, None])
    return y


def init_params(key, num_input_channel, c_hid, latent_dim):
    ks = jax.random.split(key, 8)
    s = 0.1
    return {
        # Linear stored as (in, out) so forward is x @ W + b
        "w_lin": s * jax.random.normal(ks[0], (latent_dim, 2 * 16 * c_hid), jnp.float32),
        "b_lin": s * jax.random.normal(ks[1], (2 * 16 * c_hid,), jnp.float32),
        # ConvTranspose2d weights are (Cin, Cout, 3, 3) like torch
        "wt1": s * jax.random.normal(ks[2], (2 * c_hid, c_hid, 3, 3), jnp.float32),
        "bt1": s * jax.random.normal(ks[3], (c_hid,), jnp.float32),
        # Conv2d weight is (Cout, Cin, 3, 3) like torch
        "wc": s * jax.random.normal(ks[4], (c_hid, c_hid, 3, 3), jnp.float32),
        "bc": s * jax.random.normal(ks[5], (c_hid,), jnp.float32),
        "wt2": s * jax.random.normal(ks[6], (c_hid, num_input_channel, 3, 3), jnp.float32),
        "bt2": s * jax.random.normal(ks[7], (num_input_channel,), jnp.float32),
    }


if __name__ == "__main__":
    B, latent_dim, c_hid, num_in = 2, 32, 8, 3
    key = jax.random.PRNGKey(0)
    pk, xk = jax.random.split(key)
    params = init_params(pk, num_in, c_hid, latent_dim)
    x = jax.random.normal(xk, (B, latent_dim), jnp.float32)

    mats = prepare_decoder(params, num_in, c_hid)   # one-time weight preprocessing

    out = jax.block_until_ready(decoder_forward(x, mats))
    assert out.shape == (B, num_in, 16, 16), out.shape

    ref = jax.block_until_ready(decoder_reference(x, params, c_hid))
    err = float(np.max(np.abs(np.asarray(out) - np.asarray(ref))))
    # bf16 weights/activations (f32 accumulate) across four chained matmuls:
    # expect ~1e-2-level max error vs the f32 reference.
    assert err < 3e-2, err

    print("KERNEL_OK")
</pallas_src>

<mosaic_0001>
module attributes {stable_mosaic.version = 11 : i64} {
  func.func @_decoder_kernel(%arg0: i32, %arg1: memref<8x128xf32, #tpu.memory_space<vmem>>, %arg2: memref<128x256xbf16, #tpu.memory_space<vmem>>, %arg3: memref<1x256xf32, #tpu.memory_space<vmem>>, %arg4: memref<256x512xbf16, #tpu.memory_space<vmem>>, %arg5: memref<1x512xf32, #tpu.memory_space<vmem>>, %arg6: memref<512x512xbf16, #tpu.memory_space<vmem>>, %arg7: memref<1x512xf32, #tpu.memory_space<vmem>>, %arg8: memref<512x768xbf16, #tpu.memory_space<vmem>>, %arg9: memref<1x768xf32, #tpu.memory_space<vmem>>, %arg10: memref<8x768xf32, #tpu.memory_space<vmem>>) attributes {dimension_semantics = [#tpu.dimension_semantics<parallel>], iteration_bounds = array<i64: 1>, scalar_prefetch = 0 : i64, scratch_operands = 0 : i64, tpu.core_type = #tpu.core_type<tc>, window_params = [{transform_indices = @transform_0, window_bounds = array<i64: 8, 128>}, {pipeline_mode = #tpu.pipeline_mode<synchronous>, transform_indices = @transform_1, window_bounds = array<i64: 128, 256>}, {pipeline_mode = #tpu.pipeline_mode<synchronous>, transform_indices = @transform_2, window_bounds = array<i64: 1, 256>}, {pipeline_mode = #tpu.pipeline_mode<synchronous>, transform_indices = @transform_3, window_bounds = array<i64: 256, 512>}, {pipeline_mode = #tpu.pipeline_mode<synchronous>, transform_indices = @transform_4, window_bounds = array<i64: 1, 512>}, {pipeline_mode = #tpu.pipeline_mode<synchronous>, transform_indices = @transform_5, window_bounds = array<i64: 512, 512>}, {pipeline_mode = #tpu.pipeline_mode<synchronous>, transform_indices = @transform_6, window_bounds = array<i64: 1, 512>}, {pipeline_mode = #tpu.pipeline_mode<synchronous>, transform_indices = @transform_7, window_bounds = array<i64: 512, 768>}, {pipeline_mode = #tpu.pipeline_mode<synchronous>, transform_indices = @transform_8, window_bounds = array<i64: 1, 768>}, {transform_indices = @transform_9, window_bounds = array<i64: 8, 768>}]} {
    %c0 = arith.constant 0 : index
    %c0_0 = arith.constant 0 : index
    %0 = vector.load %arg1[%c0, %c0_0] : memref<8x128xf32, #tpu.memory_space<vmem>>, vector<8x128xf32>
    %1 = arith.truncf %0 : vector<8x128xf32> to vector<8x128xbf16>
    %c0_1 = arith.constant 0 : index
    %c0_2 = arith.constant 0 : index
    %2 = vector.load %arg2[%c0_1, %c0_2] : memref<128x256xbf16, #tpu.memory_space<vmem>>, vector<128x256xbf16>
    %cst = arith.constant dense<0.000000e+00> : vector<8x256xf32>
    %3 = tpu.matmul %1, %2, %cst {dimension_numbers = #tpu.dot_dimension_numbers<[1], [0], [0], [1], [0, 0, 1, 1], [], []>} : vector<8x128xbf16>, vector<128x256xbf16>, vector<8x256xf32> -> vector<8x256xf32>
    %c0_3 = arith.constant 0 : index
    %c0_4 = arith.constant 0 : index
    %4 = vector.load %arg3[%c0_3, %c0_4] : memref<1x256xf32, #tpu.memory_space<vmem>>, vector<1x256xf32>
    %5 = vector.broadcast %4 : vector<1x256xf32> to vector<8x256xf32>
    %6 = arith.addf %3, %5 : vector<8x256xf32>
    %cst_5 = arith.constant 0.000000e+00 : f32
    %7 = vector.broadcast %cst_5 : f32 to vector<8x256xf32>
    %8 = arith.maximumf %6, %7 : vector<8x256xf32>
    %9 = arith.truncf %8 : vector<8x256xf32> to vector<8x256xbf16>
    %c0_6 = arith.constant 0 : index
    %c0_7 = arith.constant 0 : index
    %10 = vector.load %arg4[%c0_6, %c0_7] : memref<256x512xbf16, #tpu.memory_space<vmem>>, vector<256x512xbf16>
    %cst_8 = arith.constant dense<0.000000e+00> : vector<8x512xf32>
    %11 = tpu.matmul %9, %10, %cst_8 {dimension_numbers = #tpu.dot_dimension_numbers<[1], [0], [0], [1], [0, 0, 1, 1], [], []>} : vector<8x256xbf16>, vector<256x512xbf16>, vector<8x512xf32> -> vector<8x512xf32>
    %c0_9 = arith.constant 0 : index
    %c0_10 = arith.constant 0 : index
    %12 = vector.load %arg5[%c0_9, %c0_10] : memref<1x512xf32, #tpu.memory_space<vmem>>, vector<1x512xf32>
    %13 = vector.broadcast %12 : vector<1x512xf32> to vector<8x512xf32>
    %14 = arith.addf %11, %13 : vector<8x512xf32>
    %cst_11 = arith.constant 0.000000e+00 : f32
    %15 = vector.broadcast %cst_11 : f32 to vector<8x512xf32>
    %16 = arith.maximumf %14, %15 : vector<8x512xf32>
    %17 = arith.truncf %16 : vector<8x512xf32> to vector<8x512xbf16>
    %c0_12 = arith.constant 0 : index
    %c0_13 = arith.constant 0 : index
    %18 = vector.load %arg6[%c0_12, %c0_13] : memref<512x512xbf16, #tpu.memory_space<vmem>>, vector<512x512xbf16>
    %cst_14 = arith.constant dense<0.000000e+00> : vector<8x512xf32>
    %19 = tpu.matmul %17, %18, %cst_14 {dimension_numbers = #tpu.dot_dimension_numbers<[1], [0], [0], [1], [0, 0, 1, 1], [], []>} : vector<8x512xbf16>, vector<512x512xbf16>, vector<8x512xf32> -> vector<8x512xf32>
    %c0_15 = arith.constant 0 : index
    %c0_16 = arith.constant 0 : index
    %20 = vector.load %arg7[%c0_15, %c0_16] : memref<1x512xf32, #tpu.memory_space<vmem>>, vector<1x512xf32>
    %21 = vector.broadcast %20 : vector<1x512xf32> to vector<8x512xf32>
    %22 = arith.addf %19, %21 : vector<8x512xf32>
    %cst_17 = arith.constant 0.000000e+00 : f32
    %23 = vector.broadcast %cst_17 : f32 to vector<8x512xf32>
    %24 = arith.maximumf %22, %23 : vector<8x512xf32>
    %25 = arith.truncf %24 : vector<8x512xf32> to vector<8x512xbf16>
    %c0_18 = arith.constant 0 : index
    %c0_19 = arith.constant 0 : index
    %26 = vector.load %arg8[%c0_18, %c0_19] : memref<512x768xbf16, #tpu.memory_space<vmem>>, vector<512x768xbf16>
    %cst_20 = arith.constant dense<0.000000e+00> : vector<8x768xf32>
    %27 = tpu.matmul %25, %26, %cst_20 {dimension_numbers = #tpu.dot_dimension_numbers<[1], [0], [0], [1], [0, 0, 1, 1], [], []>} : vector<8x512xbf16>, vector<512x768xbf16>, vector<8x768xf32> -> vector<8x768xf32>
    %c0_21 = arith.constant 0 : index
    %c0_22 = arith.constant 0 : index
    %28 = vector.load %arg9[%c0_21, %c0_22] : memref<1x768xf32, #tpu.memory_space<vmem>>, vector<1x768xf32>
    %29 = vector.broadcast %28 : vector<1x768xf32> to vector<8x768xf32>
    %30 = arith.addf %27, %29 : vector<8x768xf32>
    %31 = math.tanh %30 : vector<8x768xf32>
    %c0_23 = arith.constant 0 : index
    %c0_24 = arith.constant 0 : index
    %32 = vector.load %arg10[%c0_23, %c0_24] : memref<8x768xf32, #tpu.memory_space<vmem>>, vector<8x768xf32>
    tpu.vector_store %arg10[%c0_23, %c0_24], %31 {strides = array<i32>} : memref<8x768xf32, #tpu.memory_space<vmem>>, vector<8x768xf32>,
    return
  }
  func.func @transform_0(%arg0: i32) -> (i32, i32) {
    %c0_i32 = arith.constant 0 : i32
    %c0_i32_0 = arith.constant 0 : i32
    return %arg0, %c0_i32 : i32, i32
  }
  func.func @transform_1(%arg0: i32) -> (i32, i32) {
    %c0_i32 = arith.constant 0 : i32
    %c0_i32_0 = arith.constant 0 : i32
    %c0_i32_1 = arith.constant 0 : i32
    return %c0_i32, %c0_i32_0 : i32, i32
  }
  func.func @transform_2(%arg0: i32) -> (i32, i32) {
    %c0_i32 = arith.constant 0 : i32
    %c0_i32_0 = arith.constant 0 : i32
    %c0_i32_1 = arith.constant 0 : i32
    return %c0_i32, %c0_i32_0 : i32, i32
  }
  func.func @transform_3(%arg0: i32) -> (i32, i32) {
    %c0_i32 = arith.constant 0 : i32
    %c0_i32_0 = arith.constant 0 : i32
    %c0_i32_1 = arith.constant 0 : i32
    return %c0_i32, %c0_i32_0 : i32, i32
  }
  func.func @transform_4(%arg0: i32) -> (i32, i32) {
    %c0_i32 = arith.constant 0 : i32
    %c0_i32_0 = arith.constant 0 : i32
    %c0_i32_1 = arith.constant 0 : i32
    return %c0_i32, %c0_i32_0 : i32, i32
  }
  func.func @transform_5(%arg0: i32) -> (i32, i32) {
    %c0_i32 = arith.constant 0 : i32
    %c0_i32_0 = arith.constant 0 : i32
    %c0_i32_1 = arith.constant 0 : i32
    return %c0_i32, %c0_i32_0 : i32, i32
  }
  func.func @transform_6(%arg0: i32) -> (i32, i32) {
    %c0_i32 = arith.constant 0 : i32
    %c0_i32_0 = arith.constant 0 : i32
    %c0_i32_1 = arith.constant 0 : i32
    return %c0_i32, %c0_i32_0 : i32, i32
  }
  func.func @transform_7(%arg0: i32) -> (i32, i32) {
    %c0_i32 = arith.constant 0 : i32
    %c0_i32_0 = arith.constant 0 : i32
    %c0_i32_1 = arith.constant 0 : i32
    return %c0_i32, %c0_i32_0 : i32, i32
  }
  func.func @transform_8(%arg0: i32) -> (i32, i32) {
    %c0_i32 = arith.constant 0 : i32
    %c0_i32_0 = arith.constant 0 : i32
    %c0_i32_1 = arith.constant 0 : i32
    return %c0_i32, %c0_i32_0 : i32, i32
  }
  func.func @transform_9(%arg0: i32) -> (i32, i32) {
    %c0_i32 = arith.constant 0 : i32
    %c0_i32_0 = arith.constant 0 : i32
    return %arg0, %c0_i32 : i32, i32
  }
}

module attributes {stable_mosaic.version = 11 : i64} {
  func.func @_decoder_kernel(%arg0: i32, %arg1: memref<8x128xf32, #tpu.memory_space<vmem>>, %arg2: memref<128x256xbf16, #tpu.memory_space<vmem>>, %arg3: memref<1x256xf32, #tpu.memory_space<vmem>>, %arg4: memref<256x512xbf16, #tpu.memory_space<vmem>>, %arg5: memref<1x512xf32, #tpu.memory_space<vmem>>, %arg6: memref<512x512xbf16, #tpu.memory_space<vmem>>, %arg7: memref<1x512xf32, #tpu.memory_space<vmem>>, %arg8: memref<512x768xbf16, #tpu.memory_space<vmem>>, %arg9: memref<1x768xf32, #tpu.memory_space<vmem>>, %arg10: memref<8x768xf32, #tpu.memory_space<vmem>>) attributes {dimension_semantics = [#tpu.dimension_semantics<parallel>], iteration_bounds = array<i64: 1>, scalar_prefetch = 0 : i64, scratch_operands = 0 : i64, tpu.core_type = #tpu.core_type<tc>, window_params = [{transform_indices = @transform_0, window_bounds = array<i64: 8, 128>}, {pipeline_mode = #tpu.pipeline_mode<synchronous>, transform_indices = @transform_1, window_bounds = array<i64: 128, 256>}, {pipeline_mode = #tpu.pipeline_mode<synchronous>, transform_indices = @transform_2, window_bounds = array<i64: 1, 256>}, {pipeline_mode = #tpu.pipeline_mode<synchronous>, transform_indices = @transform_3, window_bounds = array<i64: 256, 512>}, {pipeline_mode = #tpu.pipeline_mode<synchronous>, transform_indices = @transform_4, window_bounds = array<i64: 1, 512>}, {pipeline_mode = #tpu.pipeline_mode<synchronous>, transform_indices = @transform_5, window_bounds = array<i64: 512, 512>}, {pipeline_mode = #tpu.pipeline_mode<synchronous>, transform_indices = @transform_6, window_bounds = array<i64: 1, 512>}, {pipeline_mode = #tpu.pipeline_mode<synchronous>, transform_indices = @transform_7, window_bounds = array<i64: 512, 768>}, {pipeline_mode = #tpu.pipeline_mode<synchronous>, transform_indices = @transform_8, window_bounds = array<i64: 1, 768>}, {transform_indices = @transform_9, window_bounds = array<i64: 8, 768>}]} {
    %c0 = arith.constant 0 : index
    %c0_0 = arith.constant 0 : index
    %0 = vector.load %arg1[%c0, %c0_0] : memref<8x128xf32, #tpu.memory_space<vmem>>, vector<8x128xf32>
    %1 = arith.truncf %0 : vector<8x128xf32> to vector<8x128xbf16>
    %c0_1 = arith.constant 0 : index
    %c0_2 = arith.constant 0 : index
    %2 = vector.load %arg2[%c0_1, %c0_2] : memref<128x256xbf16, #tpu.memory_space<vmem>>, vector<128x256xbf16>
    %cst = arith.constant dense<0.000000e+00> : vector<8x256xf32>
    %3 = tpu.matmul %1, %2, %cst {dimension_numbers = #tpu.dot_dimension_numbers<[1], [0], [0], [1], [0, 0, 1, 1], [], []>} : vector<8x128xbf16>, vector<128x256xbf16>, vector<8x256xf32> -> vector<8x256xf32>
    %c0_3 = arith.constant 0 : index
    %c0_4 = arith.constant 0 : index
    %4 = vector.load %arg3[%c0_3, %c0_4] : memref<1x256xf32, #tpu.memory_space<vmem>>, vector<1x256xf32>
    %5 = vector.broadcast %4 : vector<1x256xf32> to vector<8x256xf32>
    %6 = arith.addf %3, %5 : vector<8x256xf32>
    %cst_5 = arith.constant 0.000000e+00 : f32
    %7 = vector.broadcast %cst_5 : f32 to vector<8x256xf32>
    %8 = arith.maximumf %6, %7 : vector<8x256xf32>
    %9 = arith.truncf %8 : vector<8x256xf32> to vector<8x256xbf16>
    %c0_6 = arith.constant 0 : index
    %c0_7 = arith.constant 0 : index
    %10 = vector.load %arg4[%c0_6, %c0_7] : memref<256x512xbf16, #tpu.memory_space<vmem>>, vector<256x512xbf16>
    %cst_8 = arith.constant dense<0.000000e+00> : vector<8x512xf32>
    %11 = tpu.matmul %9, %10, %cst_8 {dimension_numbers = #tpu.dot_dimension_numbers<[1], [0], [0], [1], [0, 0, 1, 1], [], []>} : vector<8x256xbf16>, vector<256x512xbf16>, vector<8x512xf32> -> vector<8x512xf32>
    %c0_9 = arith.constant 0 : index
    %c0_10 = arith.constant 0 : index
    %12 = vector.load %arg5[%c0_9, %c0_10] : memref<1x512xf32, #tpu.memory_space<vmem>>, vector<1x512xf32>
    %13 = vector.broadcast %12 : vector<1x512xf32> to vector<8x512xf32>
    %14 = arith.addf %11, %13 : vector<8x512xf32>
    %cst_11 = arith.constant 0.000000e+00 : f32
    %15 = vector.broadcast %cst_11 : f32 to vector<8x512xf32>
    %16 = arith.maximumf %14, %15 : vector<8x512xf32>
    %17 = arith.truncf %16 : vector<8x512xf32> to vector<8x512xbf16>
    %c0_12 = arith.constant 0 : index
    %c0_13 = arith.constant 0 : index
    %18 = vector.load %arg6[%c0_12, %c0_13] : memref<512x512xbf16, #tpu.memory_space<vmem>>, vector<512x512xbf16>
    %cst_14 = arith.constant dense<0.000000e+00> : vector<8x512xf32>
    %19 = tpu.matmul %17, %18, %cst_14 {dimension_numbers = #tpu.dot_dimension_numbers<[1], [0], [0], [1], [0, 0, 1, 1], [], []>} : vector<8x512xbf16>, vector<512x512xbf16>, vector<8x512xf32> -> vector<8x512xf32>
    %c0_15 = arith.constant 0 : index
    %c0_16 = arith.constant 0 : index
    %20 = vector.load %arg7[%c0_15, %c0_16] : memref<1x512xf32, #tpu.memory_space<vmem>>, vector<1x512xf32>
    %21 = vector.broadcast %20 : vector<1x512xf32> to vector<8x512xf32>
    %22 = arith.addf %19, %21 : vector<8x512xf32>
    %cst_17 = arith.constant 0.000000e+00 : f32
    %23 = vector.broadcast %cst_17 : f32 to vector<8x512xf32>
    %24 = arith.maximumf %22, %23 : vector<8x512xf32>
    %25 = arith.truncf %24 : vector<8x512xf32> to vector<8x512xbf16>
    %c0_18 = arith.constant 0 : index
    %c0_19 = arith.constant 0 : index
    %26 = vector.load %arg8[%c0_18, %c0_19] : memref<512x768xbf16, #tpu.memory_space<vmem>>, vector<512x768xbf16>
    %cst_20 = arith.constant dense<0.000000e+00> : vector<8x768xf32>
    %27 = tpu.matmul %25, %26, %cst_20 {dimension_numbers = #tpu.dot_dimension_numbers<[1], [0], [0], [1], [0, 0, 1, 1], [], []>} : vector<8x512xbf16>, vector<512x768xbf16>, vector<8x768xf32> -> vector<8x768xf32>
    %c0_21 = arith.constant 0 : index
    %c0_22 = arith.constant 0 : index
    %28 = vector.load %arg9[%c0_21, %c0_22] : memref<1x768xf32, #tpu.memory_space<vmem>>, vector<1x768xf32>
    %29 = vector.broadcast %28 : vector<1x768xf32> to vector<8x768xf32>
    %30 = arith.addf %27, %29 : vector<8x768xf32>
    %31 = math.tanh %30 : vector<8x768xf32>
    %c0_23 = arith.constant 0 : index
    %c0_24 = arith.constant 0 : index
    %32 = vector.load %arg10[%c0_23, %c0_24] : memref<8x768xf32, #tpu.memory_space<vmem>>, vector<8x768xf32>
    tpu.vector_store %arg10[%c0_23, %c0_24], %31 {strides = array<i32>} : memref<8x768xf32, #tpu.memory_space<vmem>>, vector<8x768xf32>,
    return
  }
  func.func @transform_0(%arg0: i32) -> (i32, i32) {
    %c0_i32 = arith.constant 0 : i32
    %c0_i32_0 = arith.constant 0 : i32
    return %arg0, %c0_i32 : i32, i32
  }
  func.func @transform_1(%arg0: i32) -> (i32, i32) {
    %c0_i32 = arith.constant 0 : i32
    %c0_i32_0 = arith.constant 0 : i32
    %c0_i32_1 = arith.constant 0 : i32
    return %c0_i32, %c0_i32_0 : i32, i32
  }
  func.func @transform_2(%arg0: i32) -> (i32, i32) {
    %c0_i32 = arith.constant 0 : i32
    %c0_i32_0 = arith.constant 0 : i32
    %c0_i32_1 = arith.constant 0 : i32
    return %c0_i32, %c0_i32_0 : i32, i32
  }
  func.func @transform_3(%arg0: i32) -> (i32, i32) {
    %c0_i32 = arith.constant 0 : i32
    %c0_i32_0 = arith.constant 0 : i32
    %c0_i32_1 = arith.constant 0 : i32
    return %c0_i32, %c0_i32_0 : i32, i32
  }
  func.func @transform_4(%arg0: i32) -> (i32, i32) {
    %c0_i32 = arith.constant 0 : i32
    %c0_i32_0 = arith.constant 0 : i32
    %c0_i32_1 = arith.constant 0 : i32
    return %c0_i32, %c0_i32_0 : i32, i32
  }
  func.func @transform_5(%arg0: i32) -> (i32, i32) {
    %c0_i32 = arith.constant 0 : i32
    %c0_i32_0 = arith.constant 0 : i32
    %c0_i32_1 = arith.constant 0 : i32
    return %c0_i32, %c0_i32_0 : i32, i32
  }
  func.func @transform_6(%arg0: i32) -> (i32, i32) {
    %c0_i32 = arith.constant 0 : i32
    %c0_i32_0 = arith.constant 0 : i32
    %c0_i32_1 = arith.constant 0 : i32
    return %c0_i32, %c0_i32_0 : i32, i32
  }
  func.func @transform_7(%arg0: i32) -> (i32, i32) {
    %c0_i32 = arith.constant 0 : i32
    %c0_i32_0 = arith.constant 0 : i32
    %c0_i32_1 = arith.constant 0 : i32
    return %c0_i32, %c0_i32_0 : i32, i32
  }
  func.func @transform_8(%arg0: i32) -> (i32, i32) {
    %c0_i32 = arith.constant 0 : i32
    %c0_i32_0 = arith.constant 0 : i32
    %c0_i32_1 = arith.constant 0 : i32
    return %c0_i32, %c0_i32_0 : i32, i32
  }
  func.func @transform_9(%arg0: i32) -> (i32, i32) {
    %c0_i32 = arith.constant 0 : i32
    %c0_i32_0 = arith.constant 0 : i32
    return %arg0, %c0_i32 : i32, i32
  }
}

</mosaic_0001>

<bundles_post_ra>
// kernel: tpu_custom_call.1
= control target key start
LH: loop header
LB: loop body
LE: loop exit
PB: predicated region body
PF: predicated region fallthrough
CT: control target
= control target key end

     0   :  { %14 = vsyncpa [#allocation3], 0  ;;  %s4519_s0 = inlined_call_operand.hbm [shape: f32[8,128], index: 0, kind: input, shape index: {}]   ;;  %s4520_s1 = inlined_call_operand.hbm [shape: bf16[128,256], index: 1, kind: input, shape index: {}]   ;;  %s4521_s2 = inlined_call_operand.vmem [shape: f32[1,256], index: 2, kind: input, shape index: {}]   ;;  %s4522_s3 = inlined_call_operand.hbm [shape: bf16[256,512], index: 3, kind: input, shape index: {}]   ;;  %s4523_s4 = inlined_call_operand.vmem [shape: f32[1,512], index: 4, kind: input, shape index: {}]   ;;  %s4524_s5 = inlined_call_operand.hbm [shape: bf16[512,512], index: 5, kind: input, shape index: {}]   ;;  %s4525_s6 = inlined_call_operand.hbm [shape: f32[1,512], index: 6, kind: input, shape index: {}]   ;;  %s4526_s7 = inlined_call_operand.hbm [shape: bf16[512,768], index: 7, kind: input, shape index: {}]   ;;  %s4527_s8 = inlined_call_operand.vmem [shape: f32[1,768], index: 8, kind: input, shape index: {}]   ;;  %s4528_s9 = inlined_call_operand.hbm [shape: f32[8,768], index: 9, kind: output, shape index: {}]  }
   0x1   :  { %15 = vsyncpa [#allocation6], 0 }
   0x2   :  { %16 = vsyncpa [#allocation9], 0 }
   0x3   :  { %17 = vsyncpa [#allocation12], 0 }
   0x4   :  { %18 = vsyncpa [#allocation4], 0  ;;  %s4361_s30 = smov [#allocation5]  }
   0x5   :  { %s34_s10 = sshll.u32 %s4361_s30, 4  ;;  %s35_s10 = int_to_ptr.vmem [resolvable:$true] %s34_s10 }
   0x6   :  { %s4219_s11 = scalar_lea.vmem %s35_s10, 2048  ;;  %p4224_p1 = scmp.lt.s32.totalorder %s35_s10, %s35_s10 }
   0x7   :  { %p4220_p0 = scmp.ne.s32.totalorder %s35_s10, %s4219_s11  ;;  %p4225_p2 = scmp.lt.s32.totalorder %s4219_s11, %s4219_s11 }
   0x9   :  { %p4226_p3 = por %p4225_p2, %p4224_p1 }
   0xb   :  { %p4227_p4 = pnand %p4226_p3, %p4220_p0 }
   0xd   :  { %4230 = shalt.err (!%p4227_p4)
}
   0xe   :  { %s4362_s12 = smov 128   ;;  %s4363_s13 = smov 8  }
   0xf   :  { %40 = dma.hbm_to_vmem [thread:$0]  %s4520_s1, 2048, %s35_s10, [#allocation6], %s4362_s12, %s4362_s12, %s4363_s13  }
  0x10   :  { %s4364_s16 = smov [#allocation8]   ;;  %s4365_s18 = smov [#allocation2]  }
  0x11   :  { %s62_s17 = sshll.u32 %s4364_s16, 4  ;;  %s25_s19 = sshll.u32 %s4365_s18, 4  ;;  %s63_s17 = int_to_ptr.vmem [resolvable:$true] %s62_s17  ;;  %s26_s19 = int_to_ptr.vmem [resolvable:$true] %s25_s19 }
  0x12   :  { %s4239_s20 = scalar_lea.vmem %s63_s17, 16384  ;;  %p4244_p6 = scmp.lt.s32.totalorder %s63_s17, %s63_s17 }
  0x13   :  { %p4240_p5 = scmp.ne.s32.totalorder %s63_s17, %s4239_s20  ;;  %p4245_p7 = scmp.lt.s32.totalorder %s4239_s20, %s4239_s20 }
  0x15   :  { %p4246_p8 = por %p4245_p7, %p4244_p6 }
  0x17   :  { %p4247_p9 = pnand %p4246_p8, %p4240_p5 }
  0x19   :  { %4250 = shalt.err (!%p4247_p9)
}
  0x1a   :  { %s4366_s21 = smov 256   ;;  %s4367_s22 = smov 16  }
  0x1b   :  { %68 = dma.hbm_to_vmem [thread:$0]  %s4524_s5, 16384, %s63_s17, [#allocation9], %s4366_s21, %s4366_s21, %s4367_s22  }
  0x1c   :  { %s4259_s1 = scalar_lea.vmem %s26_s19, 128  ;;  %p4264_p11 = scmp.lt.s32.totalorder %s26_s19, %s26_s19 }
  0x1d   :  { %p4260_p10 = scmp.ne.s32.totalorder %s26_s19, %s4259_s1  ;;  %p4265_p12 = scmp.lt.s32.totalorder %s4259_s1, %s4259_s1 }
  0x1f   :  { %p4266_p13 = por %p4265_p12, %p4264_p11 }
  0x21   :  { %p4267_p0 = pnand %p4266_p13, %p4260_p10 }
  0x23   :  { %4270 = shalt.err (!%p4267_p0)
}
  0x24   :  { %28 = dma.hbm_to_vmem [thread:$0]  %s4519_s0, 128, %s26_s19, [#allocation3]  }
  0x25   :  { %s4368_s27 = smov [#allocation7]   ;;  %s4369_s29 = smov [#allocation10]  }
  0x26   :  { %s48_s28 = sshll.u32 %s4368_s27, 4  ;;  %s75_s30 = sshll.u32 %s4369_s29, 4  ;;  %s49_s28 = int_to_ptr.vmem [resolvable:$true] %s48_s28  ;;  %s76_s30 = int_to_ptr.vmem [resolvable:$true] %s75_s30 }
  0x27   :  { %s4279_s10 = scalar_lea.vmem %s49_s28, 8192  ;;  %p4284_p2 = scmp.lt.s32.totalorder %s49_s28, %s49_s28 }
  0x28   :  { %p4280_p1 = scmp.ne.s32.totalorder %s49_s28, %s4279_s10  ;;  %p4285_p3 = scmp.lt.s32.totalorder %s4279_s10, %s4279_s10 }
  0x2a   :  { %p4286_p4 = por %p4285_p3, %p4284_p2 }
  0x2c   :  { %p4287_p5 = pnand %p4286_p4, %p4280_p1 }
  0x2e   :  { %4290 = shalt.err (!%p4287_p5)
}
  0x2f   :  { %54 = dma.hbm_to_vmem [thread:$0]  %s4522_s3, 8192, %s49_s28, [#allocation6], %s4366_s21, %s4366_s21, %s4367_s22  }
  0x30   :  { %s4299_s12 = scalar_lea.vmem %s76_s30, 64  ;;  %p4304_p7 = scmp.lt.s32.totalorder %s76_s30, %s76_s30 }
  0x31   :  { %p4300_p6 = scmp.ne.s32.totalorder %s76_s30, %s4299_s12  ;;  %p4305_p8 = scmp.lt.s32.totalorder %s4299_s12, %s4299_s12 }
  0x33   :  { %p4306_p9 = por %p4305_p8, %p4304_p7 }
  0x35   :  { %p4307_p10 = pnand %p4306_p9, %p4300_p6 }
  0x37   :  { %4310 = shalt.err (!%p4307_p10)
}
  0x38   :  { %78 = dma.hbm_to_vmem [thread:$0]  %s4525_s6, 64, %s76_s30, [#allocation9]  }
  0x39   :  { %s4370_s14 = smov [#allocation11]  }
  0x3a   :  { %s84_s15 = sshll.u32 %s4370_s14, 4  ;;  %s85_s15 = int_to_ptr.vmem [resolvable:$true] %s84_s15 }
  0x3b   :  { %s4319_s16 = scalar_lea.vmem %s85_s15, 24576  ;;  %p4324_p12 = scmp.lt.s32.totalorder %s85_s15, %s85_s15 }
  0x3c   :  { %p4320_p11 = scmp.ne.s32.totalorder %s85_s15, %s4319_s16  ;;  %p4325_p13 = scmp.lt.s32.totalorder %s4319_s16, %s4319_s16 }
  0x3e   :  { %p4326_p0 = por %p4325_p13, %p4324_p12 }
  0x40   :  { %p4327_p1 = pnand %p4326_p0, %p4320_p11 }
  0x42   :  { %4330 = shalt.err (!%p4327_p1)
}
  0x43   :  { %s4371_s3 = smov 384   ;;  %s4372_s17 = smov 24  }
  0x44   :  { %90 = dma.hbm_to_vmem [thread:$0]  %s4526_s7, 24576, %s85_s15, [#allocation12], %s4371_s3, %s4371_s3, %s4372_s17  }
  0x45   :  { %4351 = dma.done.wait [#allocation3], 128  }
  0x46   :  { %4352 = vsyncadd [#allocation3], 4294967168 }
  0x47   :  { %4353 = dma.done.wait [#allocation6], 10240  }
  0x48   :  { %4354 = vsyncadd [#allocation6], 4294957056 }
  0x49   :  { %4355 = dma.done.wait [#allocation9], 16448  }
  0x4a   :  { %4356 = vsyncadd [#allocation9], 4294950848 }
  0x4b   :  { %4357 = dma.done.wait [#allocation12], 24576  }
  0x4c   :  { %4358 = vsyncadd [#allocation12], 4294942720  ;;  %v4373_v0 = vmov 0   ;;  %v3599_v1 = vld [vmem:[#allocation5 + $0x74] ss:$8 sps:$4 sm:$0xff]  }
  0x4d   :  { %254 = vmatprep.mubr.bf16.mxu0 %v4373_v0  ;;  %v3601_v2 = vld [vmem:[#allocation5 + $0x70] ss:$8 sps:$4 sm:$0xff]   ;;  %222 = vmatprep.subr.bf16.mxu0 %v3599_v1  ;;  %v3602_v3 = vld [vmem:[#allocation5 + $0x64] ss:$8 sps:$4 sm:$0xff]   ;;  %v3604_v4 = vld [vmem:[#allocation5 + $0x60] ss:$8 sps:$4 sm:$0xff]  }
  0x4e   :  { %223 = vmatpush1.bf16.msra.mxu0 %v3601_v2  ;;  %v3605_v5 = vld [vmem:[#allocation5 + $0x54] ss:$8 sps:$4 sm:$0xff]   ;;  %v3607_v6 = vld [vmem:[#allocation5 + $0x50] ss:$8 sps:$4 sm:$0xff]   ;;  %v3608_v7 = vld [vmem:[#allocation5 + $0x44] ss:$8 sps:$4 sm:$0xff]  }
  0x4f   :  { %224 = vmatprep.subr.bf16.mxu0 %v3602_v3  ;;  %v3610_v8 = vld [vmem:[#allocation5 + $0x40] ss:$8 sps:$4 sm:$0xff]   ;;  %v3623_v9 = vld [vmem:[#allocation7 + $0xe4] ss:$16 sps:$4 sm:$0xff]   ;;  %v3613_v13 = vld [vmem:[#allocation5 + $0x30] ss:$8 sps:$4 sm:$0xff]  }
  0x50   :  { %v3611_v10 = vld [vmem:[#allocation5 + $0x34] ss:$8 sps:$4 sm:$0xff]   ;;  %673 = vmatprep.subr.bf16.mxu1 %v3623_v9  ;;  %v3628_v11 = vld [vmem:[#allocation7 + $0xe0] ss:$16 sps:$4 sm:$0xff]   ;;  %v3614_v14 = vld [vmem:[#allocation5 + $0x24] ss:$8 sps:$4 sm:$0xff]  }
  0x51   :  { %v3629_v12 = vld [vmem:[#allocation7 + $0xc4] ss:$16 sps:$4 sm:$0xff]   ;;  %674 = vmatpush1.bf16.msra.mxu1 %v3628_v11  ;;  %v3634_v15 = vld [vmem:[#allocation7 + $0xc0] ss:$16 sps:$4 sm:$0xff]   ;;  %v112_v26 = vld [vmem:[#allocation2] sm:$0xff] }
  0x52   :  { %225 = vmatpush1.bf16.msra.mxu0 %v3604_v4  ;;  %675 = vmatprep.subr.bf16.mxu1 %v3629_v12  ;;  %v3635_v16 = vld [vmem:[#allocation7 + $0xa4] ss:$16 sps:$4 sm:$0xff]   ;;  %v3616_v17 = vld [vmem:[#allocation5 + $0x20] ss:$8 sps:$4 sm:$0xff]   ;;  %v3619_v21 = vld [vmem:[#allocation5 + $0x10] ss:$8 sps:$4 sm:$0xff]   ;;  %v113_v30 = vpack.c.bf16 %v112_v26, %v112_v26 }
  0x53   :  { %226 = vmatprep.subr.bf16.mxu0 %v3605_v5  ;;  %v3617_v18 = vld [vmem:[#allocation5 + $0x14] ss:$8 sps:$4 sm:$0xff]   ;;  %v3640_v19 = vld [vmem:[#allocation7 + $0xa0] ss:$16 sps:$4 sm:$0xff]   ;;  %v3620_v22 = vld [vmem:[#allocation5 + $0x4] ss:$8 sps:$4 sm:$0xff]  }
  0x54   :  { %v3641_v20 = vld [vmem:[#allocation7 + $0x84] ss:$16 sps:$4 sm:$0xff]   ;;  %v3646_v23 = vld [vmem:[#allocation7 + $0x80] ss:$16 sps:$4 sm:$0xff]   ;;  %v3627_v27 = vld [vmem:[#allocation7 + $0xec] ss:$16 sps:$4 sm:$0xff]  }
  0x55   :  { %676 = vmatpush1.bf16.msra.mxu1 %v3634_v15  ;;  %v3647_v24 = vld [vmem:[#allocation7 + $0x64] ss:$16 sps:$4 sm:$0xff]   ;;  %v3622_v25 = vld [vmem:[#allocation5] ss:$8 sps:$4 sm:$0xff]   ;;  %v3633_v32 = vld [vmem:[#allocation7 + $0xcc] ss:$16 sps:$4 sm:$0xff]  }
  0x56   :  { %227 = vmatpush1.bf16.msra.mxu0 %v3607_v6  ;;  %677 = vmatprep.subr.bf16.mxu1 %v3635_v16  ;;  %v3652_v28 = vld [vmem:[#allocation7 + $0x60] ss:$16 sps:$4 sm:$0xff]   ;;  %v3653_v29 = vld [vmem:[#allocation7 + $0x44] ss:$16 sps:$4 sm:$0xff]   ;;  %v3625_v31 = vld [vmem:[#allocation7 + $0xe8] ss:$16 sps:$4 sm:$0xff]  }
  0x57   :  { %228 = vmatprep.subr.bf16.mxu0 %v3608_v7  ;;  %v3658_v33 = vld [vmem:[#allocation7 + $0x40] ss:$16 sps:$4 sm:$0xff]   ;;  %v3659_v34 = vld [vmem:[#allocation7 + $0x24] ss:$16 sps:$4 sm:$0xff]   ;;  %v3631_v35 = vld [vmem:[#allocation7 + $0xc8] ss:$16 sps:$4 sm:$0xff]  }
  0x58   :  { %v3639_v36 = vld [vmem:[#allocation7 + $0xac] ss:$16 sps:$4 sm:$0xff]   ;;  %v3664_v37 = vld [vmem:[#allocation7 + $0x20] ss:$16 sps:$4 sm:$0xff]   ;;  %v3665_v38 = vld [vmem:[#allocation7 + $0x4] ss:$16 sps:$4 sm:$0xff]  }
  0x59   :  { %678 = vmatpush1.bf16.msra.mxu1 %v3640_v19  ;;  %v3637_v39 = vld [vmem:[#allocation7 + $0xa8] ss:$16 sps:$4 sm:$0xff]   ;;  %v3645_v40 = vld [vmem:[#allocation7 + $0x8c] ss:$16 sps:$4 sm:$0xff]   ;;  %v3670_v41 = vld [vmem:[#allocation7] ss:$16 sps:$4 sm:$0xff]  }
  0x5a   :  { %229 = vmatpush1.bf16.msra.mxu0 %v3610_v8  ;;  %679 = vmatprep.subr.bf16.mxu1 %v3641_v20  ;;  %v3671_v42 = vld [vmem:[#allocation7 + $0x1e4] ss:$16 sps:$4 sm:$0xff]   ;;  %v3643_v43 = vld [vmem:[#allocation7 + $0x88] ss:$16 sps:$4 sm:$0xff]   ;;  %v3651_v44 = vld [vmem:[#allocation7 + $0x6c] ss:$16 sps:$4 sm:$0xff]  }
  0x5b   :  { %230 = vmatprep.subr.bf16.mxu0 %v3611_v10  ;;  %v3676_v45 = vld [vmem:[#allocation7 + $0x1e0] ss:$16 sps:$4 sm:$0xff]   ;;  %v3677_v46 = vld [vmem:[#allocation7 + $0x1c4] ss:$16 sps:$4 sm:$0xff]   ;;  %v3649_v47 = vld [vmem:[#allocation7 + $0x68] ss:$16 sps:$4 sm:$0xff]  }
  0x5c   :  { %v3682_v48 = vld [vmem:[#allocation7 + $0x1c0] ss:$16 sps:$4 sm:$0xff]   ;;  %v3657_v49 = vld [vmem:[#allocation7 + $0x4c] ss:$16 sps:$4 sm:$0xff]   ;;  %v3683_v50 = vld [vmem:[#allocation7 + $0x1a4] ss:$16 sps:$4 sm:$0xff]  }
  0x5d   :  { %680 = vmatpush1.bf16.msra.mxu1 %v3646_v23  ;;  %v3655_v51 = vld [vmem:[#allocation7 + $0x48] ss:$16 sps:$4 sm:$0xff]   ;;  %v3688_v52 = vld [vmem:[#allocation7 + $0x1a0] ss:$16 sps:$4 sm:$0xff]   ;;  %v3663_v53 = vld [vmem:[#allocation7 + $0x2c] ss:$16 sps:$4 sm:$0xff]  }
  0x5e   :  { %231 = vmatpush1.bf16.msra.mxu0 %v3613_v13  ;;  %681 = vmatprep.subr.bf16.mxu1 %v3647_v24  ;;  %v3689_v54 = vld [vmem:[#allocation7 + $0x184] ss:$16 sps:$4 sm:$0xff]   ;;  %v3661_v55 = vld [vmem:[#allocation7 + $0x28] ss:$16 sps:$4 sm:$0xff]   ;;  %v3694_v56 = vld [vmem:[#allocation7 + $0x180] ss:$16 sps:$4 sm:$0xff]  }
  0x5f   :  { %232 = vmatprep.subr.bf16.mxu0 %v3614_v14  ;;  %v3669_v57 = vld [vmem:[#allocation7 + $0xc] ss:$16 sps:$4 sm:$0xff]   ;;  %v3695_v58 = vld [vmem:[#allocation7 + $0x164] ss:$16 sps:$4 sm:$0xff]   ;;  %v3667_v59 = vld [vmem:[#allocation7 + $0x8] ss:$16 sps:$4 sm:$0xff]  }
  0x60   :  { %v3700_v60 = vld [vmem:[#allocation7 + $0x160] ss:$16 sps:$4 sm:$0xff]   ;;  %v3675_v61 = vld [vmem:[#allocation7 + $0x1ec] ss:$16 sps:$4 sm:$0xff]   ;;  %v3701_v62 = vld [vmem:[#allocation7 + $0x144] ss:$16 sps:$4 sm:$0xff]  }
  0x61   :  { %682 = vmatpush1.bf16.msra.mxu1 %v3652_v28  ;;  %v3673_v63 = vld [vmem:[#allocation7 + $0x1e8] ss:$16 sps:$4 sm:$0xff]   ;;  %v3706_v0 = vld [vmem:[#allocation7 + $0x140] ss:$16 sps:$4 sm:$0xff]   ;;  %v3681_v1 = vld [vmem:[#allocation7 + $0x1cc] ss:$16 sps:$4 sm:$0xff]  }
  0x62   :  { %233 = vmatpush1.bf16.msra.mxu0 %v3616_v17  ;;  %683 = vmatprep.subr.bf16.mxu1 %v3653_v29  ;;  %v3679_v2 = vld [vmem:[#allocation7 + $0x1c8] ss:$16 sps:$4 sm:$0xff]   ;;  %v3687_v3 = vld [vmem:[#allocation7 + $0x1ac] ss:$16 sps:$4 sm:$0xff]   ;;  %v3707_v11 = vld [vmem:[#allocation7 + $0x124] ss:$16 sps:$4 sm:$0xff]  }
  0x63   :  { %234 = vmatprep.subr.bf16.mxu0 %v3617_v18  ;;  %v3685_v4 = vld [vmem:[#allocation7 + $0x1a8] ss:$16 sps:$4 sm:$0xff]   ;;  %v3693_v5 = vld [vmem:[#allocation7 + $0x18c] ss:$16 sps:$4 sm:$0xff]   ;;  %v3712_v14 = vld [vmem:[#allocation7 + $0x120] ss:$16 sps:$4 sm:$0xff]  }
  0x64   :  { %v3691_v6 = vld [vmem:[#allocation7 + $0x188] ss:$16 sps:$4 sm:$0xff]   ;;  %v3699_v7 = vld [vmem:[#allocation7 + $0x16c] ss:$16 sps:$4 sm:$0xff]   ;;  %v3713_v15 = vld [vmem:[#allocation7 + $0x104] ss:$16 sps:$4 sm:$0xff]  }
  0x65   :  { %684 = vmatpush1.bf16.msra.mxu1 %v3658_v33  ;;  %v3697_v8 = vld [vmem:[#allocation7 + $0x168] ss:$16 sps:$4 sm:$0xff]   ;;  %v3705_v9 = vld [vmem:[#allocation7 + $0x14c] ss:$16 sps:$4 sm:$0xff]   ;;  %v3718_v18 = vld [vmem:[#allocation7 + $0x100] ss:$16 sps:$4 sm:$0xff]  }
  0x66   :  { %235 = vmatpush1.bf16.msra.mxu0 %v3619_v21  ;;  %685 = vmatprep.subr.bf16.mxu1 %v3659_v34  ;;  %v3703_v10 = vld [vmem:[#allocation7 + $0x148] ss:$16 sps:$4 sm:$0xff]   ;;  %v3711_v12 = vld [vmem:[#allocation7 + $0x12c] ss:$16 sps:$4 sm:$0xff]   ;;  %v3721_v19 = vld [vmem:[#allocation8 + $0xe4] ss:$16 sps:$4 sm:$0xff]   ;;  %v132_v21 = vlaneseq }
  0x67   :  { %236 = vmatprep.subr.bf16.mxu0 %v3620_v22  ;;  %v3709_v13 = vld [vmem:[#allocation7 + $0x128] ss:$16 sps:$4 sm:$0xff]   ;;  %v3717_v16 = vld [vmem:[#allocation7 + $0x10c] ss:$16 sps:$4 sm:$0xff]   ;;  %v3724_v20 = vld [vmem:[#allocation8 + $0x2e4] ss:$16 sps:$4 sm:$0xff]  }
  0x68   :  { %v3715_v17 = vld [vmem:[#allocation7 + $0x108] ss:$16 sps:$4 sm:$0xff]   ;;  %v4443_v22 = vshrl.u32 %v132_v21, 7  ;;  %v3796_v21 = vld [vmem:[#allocation8 + $0x364] ss:$16 sps:$4 sm:$0xff]  }
  0x69   :  { %686 = vmatpush1.bf16.msra.mxu1 %v3664_v37  ;;  %v130_v24 = vld [vmem:[%s4521_s2] sm:$0x3]  ;;  %v3719_v37 = vld [vmem:[#allocation8 + $0xe0] ss:$16 sps:$4 sm:$0xff]  }
  0x6a   :  { %237 = vmatpush1.bf16.msra.mxu0 %v3622_v25  ;;  %687 = vmatprep.subr.bf16.mxu1 %v3665_v38  ;;  %v4446_v23 = vsub.s32 0, %v4443_v22  ;;  %v4452_v25 = vsub.s32 1, %v4443_v22  ;;  %v3722_v38 = vld [vmem:[#allocation8 + $0x2e0] ss:$16 sps:$4 sm:$0xff]  }
  0x6b   :  { %714 = vmatprep.subr.bf16.mxu0 %v3627_v27 }
  0x6c   :  { %v135_v26 = vrot.slane %v130_v24, %v4446_v23  ;;  %v139_v27 = vrot.slane %v130_v24, %v4452_v25  ;;  %v3791_v24 = vld [vmem:[#allocation8 + $0x160] ss:$16 sps:$4 sm:$0xff]  }
  0x6d   :  { %255 = vmatmul.mubr.bf16.vlgmr.msra.gmra.mxu0 %v113_v30  ;;  %688 = vmatpush1.bf16.msra.mxu1 %v3670_v41  ;;  %v3730_v41 = vld [vmem:[#allocation8 + $0x2c4] ss:$16 sps:$4 sm:$0xff]  }
  0x6e   :  { %715 = vmatpush1.bf16.msra.mxu0 %v3625_v31  ;;  %689 = vmatprep.subr.bf16.mxu1 %v3671_v42  ;;  %v3725_v42 = vld [vmem:[#allocation8 + $0xc0] ss:$16 sps:$4 sm:$0xff]  }
  0x6f   :  { %716 = vmatprep.subr.bf16.mxu0 %v3633_v32 }
  0x71   :  { %690 = vmatpush2.bf16.msra.mxu1 %v3676_v45  ;;  %v3736_v45 = vld [vmem:[#allocation8 + $0x2a4] ss:$16 sps:$4 sm:$0xff]  }
  0x72   :  { %717 = vmatpush1.bf16.msra.mxu0 %v3631_v35  ;;  %691 = vmatprep.subr.bf16.mxu1 %v3677_v46  ;;  %v3731_v46 = vld [vmem:[#allocation8 + $0xa0] ss:$16 sps:$4 sm:$0xff]  }
  0x73   :  { %718 = vmatprep.subr.bf16.mxu0 %v3639_v36 }
  0x75   :  { %692 = vmatpush2.bf16.msra.mxu1 %v3682_v48  ;;  %v3739_v48 = vld [vmem:[#allocation8 + $0x84] ss:$16 sps:$4 sm:$0xff]  }
  0x76   :  { %719 = vmatpush1.bf16.msra.mxu0 %v3637_v39  ;;  %693 = vmatprep.subr.bf16.mxu1 %v3683_v50  ;;  %v3737_v50 = vld [vmem:[#allocation8 + $0x80] ss:$16 sps:$4 sm:$0xff]  }
  0x77   :  { %720 = vmatprep.subr.bf16.mxu0 %v3645_v40  ;;  %v3727_v40 = vld [vmem:[#allocation8 + $0xc4] ss:$16 sps:$4 sm:$0xff]  }
  0x79   :  { %694 = vmatpush2.bf16.msra.mxu1 %v3688_v52  ;;  %v3745_v52 = vld [vmem:[#allocation8 + $0x64] ss:$16 sps:$4 sm:$0xff]  }
  0x7a   :  { %721 = vmatpush1.bf16.msra.mxu0 %v3643_v43  ;;  %695 = vmatprep.subr.bf16.mxu1 %v3689_v54  ;;  %v3728_v43 = vld [vmem:[#allocation8 + $0x2c0] ss:$16 sps:$4 sm:$0xff]  }
  0x7b   :  { %722 = vmatprep.subr.bf16.mxu0 %v3651_v44  ;;  %v3733_v44 = vld [vmem:[#allocation8 + $0xa4] ss:$16 sps:$4 sm:$0xff]   ;;  %v3743_v54 = vld [vmem:[#allocation8 + $0x60] ss:$16 sps:$4 sm:$0xff]  }
  0x7d   :  { %696 = vmatpush2.bf16.msra.mxu1 %v3694_v56  ;;  %v3751_v56 = vld [vmem:[#allocation8 + $0x44] ss:$16 sps:$4 sm:$0xff]  }
  0x7e   :  { %723 = vmatpush1.bf16.msra.mxu0 %v3649_v47  ;;  %697 = vmatprep.subr.bf16.mxu1 %v3695_v58  ;;  %v3734_v47 = vld [vmem:[#allocation8 + $0x2a0] ss:$16 sps:$4 sm:$0xff]  }
  0x7f   :  { %724 = vmatprep.subr.bf16.mxu0 %v3657_v49  ;;  %v3742_v49 = vld [vmem:[#allocation8 + $0x284] ss:$16 sps:$4 sm:$0xff]   ;;  %v3749_v58 = vld [vmem:[#allocation8 + $0x40] ss:$16 sps:$4 sm:$0xff]  }
  0x81   :  { %698 = vmatpush2.bf16.msra.mxu1 %v3700_v60  ;;  %v3757_v60 = vld [vmem:[#allocation8 + $0x24] ss:$16 sps:$4 sm:$0xff]  }
  0x82   :  { %725 = vmatpush1.bf16.msra.mxu0 %v3655_v51  ;;  %699 = vmatprep.subr.bf16.mxu1 %v3701_v62  ;;  %v3740_v51 = vld [vmem:[#allocation8 + $0x280] ss:$16 sps:$4 sm:$0xff]  }
  0x83   :  { %726 = vmatprep.subr.bf16.mxu0 %v3663_v53  ;;  %v3748_v53 = vld [vmem:[#allocation8 + $0x264] ss:$16 sps:$4 sm:$0xff]   ;;  %v3755_v62 = vld [vmem:[#allocation8 + $0x20] ss:$16 sps:$4 sm:$0xff]  }
  0x85   :  { %700 = vmatpush2.bf16.msra.mxu1 %v3706_v0  ;;  %v3763_v0 = vld [vmem:[#allocation8 + $0x4] ss:$16 sps:$4 sm:$0xff]  }
  0x86   :  { %727 = vmatpush1.bf16.msra.mxu0 %v3661_v55  ;;  %701 = vmatprep.subr.bf16.mxu1 %v3707_v11  ;;  %v3746_v55 = vld [vmem:[#allocation8 + $0x260] ss:$16 sps:$4 sm:$0xff]  }
  0x87   :  { %728 = vmatprep.subr.bf16.mxu0 %v3669_v57  ;;  %v3754_v57 = vld [vmem:[#allocation8 + $0x244] ss:$16 sps:$4 sm:$0xff]   ;;  %v3776_v11 = vld [vmem:[#allocation8 + $0x3c0] ss:$16 sps:$4 sm:$0xff]  }
  0x89   :  { %702 = vmatpush2.bf16.msra.mxu1 %v3712_v14  ;;  %v3779_v14 = vld [vmem:[#allocation8 + $0x1a0] ss:$16 sps:$4 sm:$0xff]  }
  0x8a   :  { %729 = vmatpush1.bf16.msra.mxu0 %v3667_v59  ;;  %703 = vmatprep.subr.bf16.mxu1 %v3713_v15  ;;  %v3752_v59 = vld [vmem:[#allocation8 + $0x240] ss:$16 sps:$4 sm:$0xff]  }
  0x8b   :  { %730 = vmatprep.subr.bf16.mxu0 %v3675_v61  ;;  %v3760_v61 = vld [vmem:[#allocation8 + $0x224] ss:$16 sps:$4 sm:$0xff]   ;;  %v3782_v15 = vld [vmem:[#allocation8 + $0x3a0] ss:$16 sps:$4 sm:$0xff]  }
  0x8d   :  { %704 = vmatpush2.bf16.msra.mxu1 %v3718_v18  ;;  %v3785_v18 = vld [vmem:[#allocation8 + $0x180] ss:$16 sps:$4 sm:$0xff]  }
  0x8e   :  { %731 = vmatpush2.bf16.msra.mxu0 %v3673_v63  ;;  %1553 = vmatprep.subr.bf16.mxu1 %v3721_v19  ;;  %v3758_v63 = vld [vmem:[#allocation8 + $0x220] ss:$16 sps:$4 sm:$0xff]  }
  0x8f   :  { %732 = vmatprep.subr.bf16.mxu0 %v3681_v1  ;;  %v3766_v1 = vld [vmem:[#allocation8 + $0x204] ss:$16 sps:$4 sm:$0xff]   ;;  %v3788_v19 = vld [vmem:[#allocation8 + $0x380] ss:$16 sps:$4 sm:$0xff]  }
  0x92   :  { %733 = vmatpush2.bf16.msra.mxu0 %v3679_v2  ;;  %v3761_v2 = vld [vmem:[#allocation8] ss:$16 sps:$4 sm:$0xff]  }
  0x93   :  { %734 = vmatprep.subr.bf16.mxu0 %v3687_v3  ;;  %v3764_v3 = vld [vmem:[#allocation8 + $0x200] ss:$16 sps:$4 sm:$0xff]  }
  0x96   :  { %735 = vmatpush2.bf16.msra.mxu0 %v3685_v4  ;;  %v3769_v4 = vld [vmem:[#allocation8 + $0x1e4] ss:$16 sps:$4 sm:$0xff]  }
  0x97   :  { %736 = vmatprep.subr.bf16.mxu0 %v3693_v5  ;;  %v3772_v5 = vld [vmem:[#allocation8 + $0x3e4] ss:$16 sps:$4 sm:$0xff]  }
  0x9a   :  { %737 = vmatpush2.bf16.msra.mxu0 %v3691_v6  ;;  %v3767_v6 = vld [vmem:[#allocation8 + $0x1e0] ss:$16 sps:$4 sm:$0xff]  }
  0x9b   :  { %738 = vmatprep.subr.bf16.mxu0 %v3699_v7  ;;  %v3770_v7 = vld [vmem:[#allocation8 + $0x3e0] ss:$16 sps:$4 sm:$0xff]  }
  0x9e   :  { %739 = vmatpush2.bf16.msra.mxu0 %v3697_v8  ;;  %v3775_v8 = vld [vmem:[#allocation8 + $0x1c4] ss:$16 sps:$4 sm:$0xff]  }
  0x9f   :  { %740 = vmatprep.subr.bf16.mxu0 %v3705_v9  ;;  %v3778_v9 = vld [vmem:[#allocation8 + $0x3c4] ss:$16 sps:$4 sm:$0xff]  }
  0xa2   :  { %741 = vmatpush2.bf16.msra.mxu0 %v3703_v10  ;;  %v3773_v10 = vld [vmem:[#allocation8 + $0x1c0] ss:$16 sps:$4 sm:$0xff]  }
  0xa3   :  { %742 = vmatprep.subr.bf16.mxu0 %v3711_v12  ;;  %v3781_v12 = vld [vmem:[#allocation8 + $0x1a4] ss:$16 sps:$4 sm:$0xff]  }
  0xa6   :  { %743 = vmatpush2.bf16.msra.mxu0 %v3709_v13  ;;  %v3784_v13 = vld [vmem:[#allocation8 + $0x3a4] ss:$16 sps:$4 sm:$0xff]  }
  0xa7   :  { %744 = vmatprep.subr.bf16.mxu0 %v3717_v16  ;;  %v3787_v16 = vld [vmem:[#allocation8 + $0x184] ss:$16 sps:$4 sm:$0xff]  }
  0xaa   :  { %745 = vmatpush2.bf16.msra.mxu0 %v3715_v17  ;;  %v3790_v17 = vld [vmem:[#allocation8 + $0x384] ss:$16 sps:$4 sm:$0xff]  }
  0xab   :  { %1594 = vmatprep.subr.bf16.mxu0 %v3724_v20  ;;  %v3793_v20 = vld [vmem:[#allocation8 + $0x164] ss:$16 sps:$4 sm:$0xff]  }
 0x12d   :  { %v256_v28 = vpop.f32.mrf.mxu0 }
 0x12e   :  { %v257_v29 = vadd.f32 %v256_v28, %v135_v26  ;;  %v3794_v26 = vld [vmem:[#allocation8 + $0x360] ss:$16 sps:$4 sm:$0xff]   ;;  %v3802_v28 = vld [vmem:[#allocation8 + $0x344] ss:$16 sps:$4 sm:$0xff]  }
 0x12f   :  { %v258_v30 = vpop.f32.mrf.mxu0 }
 0x130   :  { %v259_v31 = vadd.f32 %v258_v30, %v139_v27  ;;  %v263_v32 = vmax.f32 %v257_v29, 0.0  ;;  %v3799_v27 = vld [vmem:[#allocation8 + $0x144] ss:$16 sps:$4 sm:$0xff]   ;;  %v3797_v29 = vld [vmem:[#allocation8 + $0x140] ss:$16 sps:$4 sm:$0xff]  }
 0x131   :  { %v260_v33 = vpop.f32.mrf.mxu0  ;;  %v3800_v30 = vld [vmem:[#allocation8 + $0x340] ss:$16 sps:$4 sm:$0xff]  }
 0x132   :  { %v264_v34 = vmax.f32 %v259_v31, 0.0  ;;  %v265_v39 = vpack.c.bf16 %v263_v32, %v263_v32  ;;  %v3805_v31 = vld [vmem:[#allocation8 + $0x124] ss:$16 sps:$4 sm:$0xff]   ;;  %v3803_v33 = vld [vmem:[#allocation8 + $0x120] ss:$16 sps:$4 sm:$0xff]  }
 0x133   :  { %v261_v35 = vpop.f32.mrf.mxu0  ;;  %v3808_v32 = vld [vmem:[#allocation8 + $0x324] ss:$16 sps:$4 sm:$0xff]  }
 0x134   :  { %v266_v36 = vpack.c.bf16 %v264_v34, %v264_v34  ;;  %v3806_v34 = vld [vmem:[#allocation8 + $0x320] ss:$16 sps:$4 sm:$0xff]   ;;  %v3811_v35 = vld [vmem:[#allocation8 + $0x104] ss:$16 sps:$4 sm:$0xff]  }
 0x136   :  { %705 = vmatprep.mubr.bf16.mxu1 %v266_v36  ;;  %746 = vmatprep.mubr.bf16.mxu0 %v266_v36  ;;  %v3814_v36 = vld [vmem:[#allocation8 + $0x304] ss:$16 sps:$4 sm:$0xff]  }
 0x137   :  { %706 = vmatmul.mubr.bf16.vlgmr.msra.gmra.mxu1 %v265_v39  ;;  %747 = vmatmul.mubr.bf16.vlgmr.msra.gmra.mxu0 %v265_v39  ;;  %v3817_v39 = vld [vmem:[#allocation8 + $0xec] ss:$16 sps:$4 sm:$0xff]  }
 0x138   :  { %1554 = vmatpush1.bf16.msra.mxu1 %v3719_v37  ;;  %1595 = vmatpush1.bf16.msra.mxu0 %v3722_v38  ;;  %v3809_v37 = vld [vmem:[#allocation8 + $0x100] ss:$16 sps:$4 sm:$0xff]  }
 0x139   :  { %1555 = vmatprep.subr.bf16.mxu1 %v3727_v40  ;;  %1596 = vmatprep.subr.bf16.mxu0 %v3730_v41  ;;  %v3812_v38 = vld [vmem:[#allocation8 + $0x300] ss:$16 sps:$4 sm:$0xff]   ;;  %v3820_v40 = vld [vmem:[#allocation8 + $0x2ec] ss:$16 sps:$4 sm:$0xff]   ;;  %v4457_v41 = vsub.s32 2, %v4443_v22 }
 0x13c   :  { %1556 = vmatpush1.bf16.msra.mxu1 %v3725_v42  ;;  %1597 = vmatpush1.bf16.msra.mxu0 %v3728_v43  ;;  %v331_v42 = vld [vmem:[%s4523_s4] sm:$0xf]  ;;  %v4463_v43 = vsub.s32 3, %v4443_v22 }
 0x13d   :  { %1557 = vmatprep.subr.bf16.mxu1 %v3733_v44  ;;  %1598 = vmatprep.subr.bf16.mxu0 %v3736_v45  ;;  %v336_v44 = vrot.slane %v331_v42, %v4446_v23  ;;  %v344_v45 = vrot.slane %v331_v42, %v4457_v41 }
 0x140   :  { %1558 = vmatpush1.bf16.msra.mxu1 %v3731_v46  ;;  %1599 = vmatpush1.bf16.msra.mxu0 %v3734_v47  ;;  %v340_v46 = vrot.slane %v331_v42, %v4452_v25  ;;  %v348_v47 = vrot.slane %v331_v42, %v4463_v43  ;;  %v3871_v42 = vld [vmem:[#allocation8 + $0x1cc] ss:$16 sps:$4 sm:$0xff]  }
 0x141   :  { %1559 = vmatprep.subr.bf16.mxu1 %v3739_v48  ;;  %1600 = vmatprep.subr.bf16.mxu0 %v3742_v49 }
 0x144   :  { %1560 = vmatpush1.bf16.msra.mxu1 %v3737_v50  ;;  %1601 = vmatpush1.bf16.msra.mxu0 %v3740_v51 }
 0x145   :  { %1561 = vmatprep.subr.bf16.mxu1 %v3745_v52  ;;  %1602 = vmatprep.subr.bf16.mxu0 %v3748_v53 }
 0x148   :  { %1562 = vmatpush1.bf16.msra.mxu1 %v3743_v54  ;;  %1603 = vmatpush1.bf16.msra.mxu0 %v3746_v55 }
 0x149   :  { %1563 = vmatprep.subr.bf16.mxu1 %v3751_v56  ;;  %1604 = vmatprep.subr.bf16.mxu0 %v3754_v57 }
 0x14c   :  { %1564 = vmatpush1.bf16.msra.mxu1 %v3749_v58  ;;  %1605 = vmatpush1.bf16.msra.mxu0 %v3752_v59 }
 0x14d   :  { %1565 = vmatprep.subr.bf16.mxu1 %v3757_v60  ;;  %1606 = vmatprep.subr.bf16.mxu0 %v3760_v61 }
 0x150   :  { %1566 = vmatpush1.bf16.msra.mxu1 %v3755_v62  ;;  %1607 = vmatpush1.bf16.msra.mxu0 %v3758_v63 }
 0x151   :  { %1567 = vmatprep.subr.bf16.mxu1 %v3763_v0  ;;  %1608 = vmatprep.subr.bf16.mxu0 %v3766_v1 }
 0x154   :  { %1568 = vmatpush1.bf16.msra.mxu1 %v3761_v2  ;;  %1609 = vmatpush1.bf16.msra.mxu0 %v3764_v3  ;;  %v3815_v2 = vld [vmem:[#allocation8 + $0xe8] ss:$16 sps:$4 sm:$0xff]  }
 0x155   :  { %1569 = vmatprep.subr.bf16.mxu1 %v3769_v4  ;;  %1610 = vmatprep.subr.bf16.mxu0 %v3772_v5  ;;  %v3818_v3 = vld [vmem:[#allocation8 + $0x2e8] ss:$16 sps:$4 sm:$0xff]  }
 0x158   :  { %1570 = vmatpush2.bf16.msra.mxu1 %v3767_v6  ;;  %1611 = vmatpush2.bf16.msra.mxu0 %v3770_v7  ;;  %v3823_v6 = vld [vmem:[#allocation8 + $0xcc] ss:$16 sps:$4 sm:$0xff]  }
 0x159   :  { %1571 = vmatprep.subr.bf16.mxu1 %v3775_v8  ;;  %1612 = vmatprep.subr.bf16.mxu0 %v3778_v9  ;;  %v3826_v7 = vld [vmem:[#allocation8 + $0x2cc] ss:$16 sps:$4 sm:$0xff]   ;;  %v3821_v8 = vld [vmem:[#allocation8 + $0xc8] ss:$16 sps:$4 sm:$0xff]  }
 0x15a   :  { %v3824_v9 = vld [vmem:[#allocation8 + $0x2c8] ss:$16 sps:$4 sm:$0xff]  }
 0x15c   :  { %1572 = vmatpush2.bf16.msra.mxu1 %v3773_v10  ;;  %1613 = vmatpush2.bf16.msra.mxu0 %v3776_v11  ;;  %v3829_v10 = vld [vmem:[#allocation8 + $0xac] ss:$16 sps:$4 sm:$0xff]  }
 0x15d   :  { %1573 = vmatprep.subr.bf16.mxu1 %v3781_v12  ;;  %1614 = vmatprep.subr.bf16.mxu0 %v3784_v13  ;;  %v3832_v11 = vld [vmem:[#allocation8 + $0x2ac] ss:$16 sps:$4 sm:$0xff]   ;;  %v3827_v12 = vld [vmem:[#allocation8 + $0xa8] ss:$16 sps:$4 sm:$0xff]  }
 0x15e   :  { %v3830_v13 = vld [vmem:[#allocation8 + $0x2a8] ss:$16 sps:$4 sm:$0xff]  }
 0x160   :  { %1574 = vmatpush2.bf16.msra.mxu1 %v3779_v14  ;;  %1615 = vmatpush2.bf16.msra.mxu0 %v3782_v15  ;;  %v3835_v14 = vld [vmem:[#allocation8 + $0x8c] ss:$16 sps:$4 sm:$0xff]  }
 0x161   :  { %1575 = vmatprep.subr.bf16.mxu1 %v3787_v16  ;;  %1616 = vmatprep.subr.bf16.mxu0 %v3790_v17  ;;  %v3838_v15 = vld [vmem:[#allocation8 + $0x28c] ss:$16 sps:$4 sm:$0xff]   ;;  %v3833_v16 = vld [vmem:[#allocation8 + $0x88] ss:$16 sps:$4 sm:$0xff]  }
 0x162   :  { %v3836_v17 = vld [vmem:[#allocation8 + $0x288] ss:$16 sps:$4 sm:$0xff]  }
 0x164   :  { %1576 = vmatpush2.bf16.msra.mxu1 %v3785_v18  ;;  %1617 = vmatpush2.bf16.msra.mxu0 %v3788_v19  ;;  %v3841_v18 = vld [vmem:[#allocation8 + $0x6c] ss:$16 sps:$4 sm:$0xff]  }
 0x165   :  { %1577 = vmatprep.subr.bf16.mxu1 %v3793_v20  ;;  %1618 = vmatprep.subr.bf16.mxu0 %v3796_v21  ;;  %v3844_v19 = vld [vmem:[#allocation8 + $0x26c] ss:$16 sps:$4 sm:$0xff]   ;;  %v3839_v20 = vld [vmem:[#allocation8 + $0x68] ss:$16 sps:$4 sm:$0xff]  }
 0x166   :  { %v3842_v21 = vld [vmem:[#allocation8 + $0x268] ss:$16 sps:$4 sm:$0xff]  }
 0x168   :  { %1578 = vmatpush2.bf16.msra.mxu1 %v3791_v24  ;;  %1619 = vmatpush2.bf16.msra.mxu0 %v3794_v26  ;;  %v3847_v24 = vld [vmem:[#allocation8 + $0x4c] ss:$16 sps:$4 sm:$0xff]  }
 0x169   :  { %1579 = vmatprep.subr.bf16.mxu1 %v3799_v27  ;;  %1620 = vmatprep.subr.bf16.mxu0 %v3802_v28  ;;  %v3850_v26 = vld [vmem:[#allocation8 + $0x24c] ss:$16 sps:$4 sm:$0xff]   ;;  %v3845_v27 = vld [vmem:[#allocation8 + $0x48] ss:$16 sps:$4 sm:$0xff]  }
 0x16a   :  { %v3848_v28 = vld [vmem:[#allocation8 + $0x248] ss:$16 sps:$4 sm:$0xff]  }
 0x16c   :  { %1580 = vmatpush2.bf16.msra.mxu1 %v3797_v29  ;;  %1621 = vmatpush2.bf16.msra.mxu0 %v3800_v30  ;;  %v3853_v29 = vld [vmem:[#allocation8 + $0x2c] ss:$16 sps:$4 sm:$0xff]  }
 0x16d   :  { %1581 = vmatprep.subr.bf16.mxu1 %v3805_v31  ;;  %1622 = vmatprep.subr.bf16.mxu0 %v3808_v32  ;;  %v3856_v30 = vld [vmem:[#allocation8 + $0x22c] ss:$16 sps:$4 sm:$0xff]   ;;  %v3851_v31 = vld [vmem:[#allocation8 + $0x28] ss:$16 sps:$4 sm:$0xff]  }
 0x16e   :  { %v3854_v32 = vld [vmem:[#allocation8 + $0x228] ss:$16 sps:$4 sm:$0xff]  }
 0x170   :  { %1582 = vmatpush2.bf16.msra.mxu1 %v3803_v33  ;;  %1623 = vmatpush2.bf16.msra.mxu0 %v3806_v34  ;;  %v3859_v33 = vld [vmem:[#allocation8 + $0xc] ss:$16 sps:$4 sm:$0xff]  }
 0x171   :  { %1583 = vmatprep.subr.bf16.mxu1 %v3811_v35  ;;  %1624 = vmatprep.subr.bf16.mxu0 %v3814_v36  ;;  %v3862_v34 = vld [vmem:[#allocation8 + $0x20c] ss:$16 sps:$4 sm:$0xff]   ;;  %v3857_v35 = vld [vmem:[#allocation8 + $0x8] ss:$16 sps:$4 sm:$0xff]  }
 0x172   :  { %v3860_v36 = vld [vmem:[#allocation8 + $0x208] ss:$16 sps:$4 sm:$0xff]  }
 0x174   :  { %1584 = vmatpush2.bf16.msra.mxu1 %v3809_v37  ;;  %1625 = vmatpush2.bf16.msra.mxu0 %v3812_v38  ;;  %v3865_v37 = vld [vmem:[#allocation8 + $0x1ec] ss:$16 sps:$4 sm:$0xff]  }
 0x175   :  { %1635 = vmatprep.subr.bf16.mxu1 %v3817_v39  ;;  %1676 = vmatprep.subr.bf16.mxu0 %v3820_v40  ;;  %v3868_v38 = vld [vmem:[#allocation8 + $0x3ec] ss:$16 sps:$4 sm:$0xff]   ;;  %v3863_v39 = vld [vmem:[#allocation8 + $0x1e8] ss:$16 sps:$4 sm:$0xff]  }
 0x176   :  { %v3866_v40 = vld [vmem:[#allocation8 + $0x3e8] ss:$16 sps:$4 sm:$0xff]  }
 0x1f7   :  { %v707_v48 = vpop.f32.mrf.mxu1  ;;  %v748_v49 = vpop.f32.mrf.mxu0 }
 0x1f8   :  { %v708_v50 = vadd.f32 %v707_v48, %v336_v44  ;;  %v749_v51 = vadd.f32 %v748_v49, %v344_v45  ;;  %v3874_v44 = vld [vmem:[#allocation8 + $0x3cc] ss:$16 sps:$4 sm:$0xff]   ;;  %v3869_v45 = vld [vmem:[#allocation8 + $0x1c8] ss:$16 sps:$4 sm:$0xff]  }
 0x1f9   :  { %v709_v52 = vpop.f32.mrf.mxu1  ;;  %v750_v53 = vpop.f32.mrf.mxu0  ;;  %v3880_v48 = vld [vmem:[#allocation8 + $0x3ac] ss:$16 sps:$4 sm:$0xff]   ;;  %v3875_v49 = vld [vmem:[#allocation8 + $0x1a8] ss:$16 sps:$4 sm:$0xff]  }
 0x1fa   :  { %v710_v54 = vadd.f32 %v709_v52, %v340_v46  ;;  %v751_v55 = vadd.f32 %v750_v53, %v348_v47  ;;  %v755_v56 = vmax.f32 %v708_v50, 0.0  ;;  %v757_v57 = vmax.f32 %v749_v51, 0.0  ;;  %v3872_v46 = vld [vmem:[#allocation8 + $0x3c8] ss:$16 sps:$4 sm:$0xff]   ;;  %v3877_v47 = vld [vmem:[#allocation8 + $0x1ac] ss:$16 sps:$4 sm:$0xff]  }
 0x1fb   :  { %v711_v58 = vpop.f32.mrf.mxu1  ;;  %v752_v59 = vpop.f32.mrf.mxu0  ;;  %v3878_v50 = vld [vmem:[#allocation8 + $0x3a8] ss:$16 sps:$4 sm:$0xff]   ;;  %v3883_v51 = vld [vmem:[#allocation8 + $0x18c] ss:$16 sps:$4 sm:$0xff]  }
 0x1fc   :  { %v756_v60 = vmax.f32 %v710_v54, 0.0  ;;  %v758_v61 = vmax.f32 %v751_v55, 0.0  ;;  %v4469_v4 = vpack.c.bf16 %v755_v56, %v755_v56  ;;  %v4471_v5 = vpack.c.bf16 %v757_v57, %v757_v57  ;;  %v3886_v52 = vld [vmem:[#allocation8 + $0x38c] ss:$16 sps:$4 sm:$0xff]   ;;  %v3881_v53 = vld [vmem:[#allocation8 + $0x188] ss:$16 sps:$4 sm:$0xff]  }
 0x1fd   :  { %v712_v62 = vpop.f32.mrf.mxu1  ;;  %v753_v63 = vpop.f32.mrf.mxu0  ;;  %v3884_v54 = vld [vmem:[#allocation8 + $0x388] ss:$16 sps:$4 sm:$0xff]   ;;  %v3889_v55 = vld [vmem:[#allocation8 + $0x16c] ss:$16 sps:$4 sm:$0xff]  }
 0x1fe   :  { %v760_v0 = vpack.c.bf16 %v756_v60, %v756_v60  ;;  %v762_v1 = vpack.c.bf16 %v758_v61, %v758_v61  ;;  %v3892_v56 = vld [vmem:[#allocation8 + $0x36c] ss:$16 sps:$4 sm:$0xff]   ;;  %v3887_v57 = vld [vmem:[#allocation8 + $0x168] ss:$16 sps:$4 sm:$0xff]  }
 0x1ff   :  { %v3890_v58 = vld [vmem:[#allocation8 + $0x368] ss:$16 sps:$4 sm:$0xff]   ;;  %v3895_v59 = vld [vmem:[#allocation8 + $0x14c] ss:$16 sps:$4 sm:$0xff]  }
 0x200   :  { %1585 = vmatprep.mubr.bf16.mxu1 %v760_v0  ;;  %1626 = vmatprep.mubr.bf16.mxu0 %v762_v1  ;;  %v3898_v60 = vld [vmem:[#allocation8 + $0x34c] ss:$16 sps:$4 sm:$0xff]   ;;  %v3893_v61 = vld [vmem:[#allocation8 + $0x148] ss:$16 sps:$4 sm:$0xff]  }
 0x201   :  { %1586 = vmatmul.mubr.bf16.vlgmr.msra.gmra.mxu1 %v4469_v4  ;;  %1627 = vmatmul.mubr.bf16.vlgmr.msra.gmra.mxu0 %v4471_v5  ;;  %v3896_v62 = vld [vmem:[#allocation8 + $0x348] ss:$16 sps:$4 sm:$0xff]   ;;  %v3901_v63 = vld [vmem:[#allocation8 + $0x12c] ss:$16 sps:$4 sm:$0xff]  }
 0x202   :  { %1636 = vmatpush1.bf16.msra.mxu1 %v3815_v2  ;;  %1677 = vmatpush1.bf16.msra.mxu0 %v3818_v3  ;;  %v3902_v2 = vld [vmem:[#allocation8 + $0x328] ss:$16 sps:$4 sm:$0xff]   ;;  %v3907_v3 = vld [vmem:[#allocation8 + $0x10c] ss:$16 sps:$4 sm:$0xff]  }
 0x203   :  { %1667 = vmatprep.mubr.bf16.mxu1 %v760_v0  ;;  %1708 = vmatprep.mubr.bf16.mxu0 %v762_v1  ;;  %v3904_v0 = vld [vmem:[#allocation8 + $0x32c] ss:$16 sps:$4 sm:$0xff]   ;;  %v3899_v1 = vld [vmem:[#allocation8 + $0x128] ss:$16 sps:$4 sm:$0xff]  }
 0x204   :  { %1637 = vmatprep.subr.bf16.mxu1 %v3823_v6  ;;  %1678 = vmatprep.subr.bf16.mxu0 %v3826_v7  ;;  %v3910_v6 = vld [vmem:[#allocation8 + $0x30c] ss:$16 sps:$4 sm:$0xff]   ;;  %v3905_v7 = vld [vmem:[#allocation8 + $0x108] ss:$16 sps:$4 sm:$0xff]  }
 0x206   :  { %1638 = vmatpush1.bf16.msra.mxu1 %v3821_v8  ;;  %1679 = vmatpush1.bf16.msra.mxu0 %v3824_v9  ;;  %v3908_v8 = vld [vmem:[#allocation8 + $0x308] ss:$16 sps:$4 sm:$0xff]  }
 0x207   :  { %1639 = vmatprep.subr.bf16.mxu1 %v3829_v10  ;;  %1680 = vmatprep.subr.bf16.mxu0 %v3832_v11  ;;  %v3913_v9 = vld [vmem:[#allocation11 + $0x154] ss:$24 sps:$4 sm:$0xff]   ;;  %v3911_v10 = vld [vmem:[#allocation11 + $0x150] ss:$24 sps:$4 sm:$0xff]   ;;  %v3916_v11 = vld [vmem:[#allocation11 + $0x124] ss:$24 sps:$4 sm:$0xff]  }
 0x20a   :  { %1640 = vmatpush1.bf16.msra.mxu1 %v3827_v12  ;;  %1681 = vmatpush1.bf16.msra.mxu0 %v3830_v13  ;;  %v3914_v12 = vld [vmem:[#allocation11 + $0x120] ss:$24 sps:$4 sm:$0xff]   ;;  %v3919_v13 = vld [vmem:[#allocation11 + $0xf4] ss:$24 sps:$4 sm:$0xff]  }
 0x20b   :  { %1641 = vmatprep.subr.bf16.mxu1 %v3835_v14  ;;  %1682 = vmatprep.subr.bf16.mxu0 %v3838_v15  ;;  %v3917_v14 = vld [vmem:[#allocation11 + $0xf0] ss:$24 sps:$4 sm:$0xff]   ;;  %v3922_v15 = vld [vmem:[#allocation11 + $0xc4] ss:$24 sps:$4 sm:$0xff]  }
 0x20e   :  { %1642 = vmatpush1.bf16.msra.mxu1 %v3833_v16  ;;  %1683 = vmatpush1.bf16.msra.mxu0 %v3836_v17  ;;  %v3920_v16 = vld [vmem:[#allocation11 + $0xc0] ss:$24 sps:$4 sm:$0xff]   ;;  %v3959_v17 = vld [vmem:[#allocation11 + $0x450] ss:$24 sps:$4 sm:$0xff]  }
 0x20f   :  { %1643 = vmatprep.subr.bf16.mxu1 %v3841_v18  ;;  %1684 = vmatprep.subr.bf16.mxu0 %v3844_v19  ;;  %v3961_v18 = vld [vmem:[#allocation11 + $0x454] ss:$24 sps:$4 sm:$0xff]  }
 0x210   :  { %v3925_v19 = vld [vmem:[#allocation11 + $0x94] ss:$24 sps:$4 sm:$0xff]  }
 0x212   :  { %1644 = vmatpush1.bf16.msra.mxu1 %v3839_v20  ;;  %1685 = vmatpush1.bf16.msra.mxu0 %v3842_v21  ;;  %v3965_v20 = vld [vmem:[#allocation11 + $0x420] ss:$24 sps:$4 sm:$0xff]   ;;  %v3928_v21 = vld [vmem:[#allocation11 + $0x64] ss:$24 sps:$4 sm:$0xff]  }
 0x213   :  { %1645 = vmatprep.subr.bf16.mxu1 %v3847_v24  ;;  %1686 = vmatprep.subr.bf16.mxu0 %v3850_v26  ;;  %v3926_v24 = vld [vmem:[#allocation11 + $0x60] ss:$24 sps:$4 sm:$0xff]   ;;  %v3971_v26 = vld [vmem:[#allocation11 + $0x3f0] ss:$24 sps:$4 sm:$0xff]  }
 0x216   :  { %1646 = vmatpush1.bf16.msra.mxu1 %v3845_v27  ;;  %1687 = vmatpush1.bf16.msra.mxu0 %v3848_v28  ;;  %v3973_v27 = vld [vmem:[#allocation11 + $0x3f4] ss:$24 sps:$4 sm:$0xff]  }
 0x217   :  { %1647 = vmatprep.subr.bf16.mxu1 %v3853_v29  ;;  %1688 = vmatprep.subr.bf16.mxu0 %v3856_v30  ;;  %v3931_v28 = vld [vmem:[#allocation11 + $0x34] ss:$24 sps:$4 sm:$0xff]   ;;  %v3929_v29 = vld [vmem:[#allocation11 + $0x30] ss:$24 sps:$4 sm:$0xff]   ;;  %v3977_v30 = vld [vmem:[#allocation11 + $0x3c0] ss:$24 sps:$4 sm:$0xff]  }
 0x21a   :  { %1648 = vmatpush1.bf16.msra.mxu1 %v3851_v31  ;;  %1689 = vmatpush1.bf16.msra.mxu0 %v3854_v32  ;;  %v3979_v31 = vld [vmem:[#allocation11 + $0x3c4] ss:$24 sps:$4 sm:$0xff]  }
 0x21b   :  { %1649 = vmatprep.subr.bf16.mxu1 %v3859_v33  ;;  %1690 = vmatprep.subr.bf16.mxu0 %v3862_v34  ;;  %v3934_v32 = vld [vmem:[#allocation11 + $0x4] ss:$24 sps:$4 sm:$0xff]   ;;  %v3932_v33 = vld [vmem:[#allocation11] ss:$24 sps:$4 sm:$0xff]   ;;  %v3983_v34 = vld [vmem:[#allocation11 + $0x390] ss:$24 sps:$4 sm:$0xff]  }
 0x21e   :  { %1650 = vmatpush1.bf16.msra.mxu1 %v3857_v35  ;;  %1691 = vmatpush1.bf16.msra.mxu0 %v3860_v36  ;;  %v3985_v35 = vld [vmem:[#allocation11 + $0x394] ss:$24 sps:$4 sm:$0xff]  }
 0x21f   :  { %1651 = vmatprep.subr.bf16.mxu1 %v3865_v37  ;;  %1692 = vmatprep.subr.bf16.mxu0 %v3868_v38  ;;  %v3937_v36 = vld [vmem:[#allocation11 + $0x2d4] ss:$24 sps:$4 sm:$0xff]   ;;  %v3935_v37 = vld [vmem:[#allocation11 + $0x2d0] ss:$24 sps:$4 sm:$0xff]   ;;  %v3989_v38 = vld [vmem:[#allocation11 + $0x360] ss:$24 sps:$4 sm:$0xff]  }
 0x222   :  { %1652 = vmatpush2.bf16.msra.mxu1 %v3863_v39  ;;  %1693 = vmatpush2.bf16.msra.mxu0 %v3866_v40  ;;  %v3991_v39 = vld [vmem:[#allocation11 + $0x364] ss:$24 sps:$4 sm:$0xff]  }
 0x223   :  { %1653 = vmatprep.subr.bf16.mxu1 %v3871_v42  ;;  %1694 = vmatprep.subr.bf16.mxu0 %v3874_v44  ;;  %v3940_v40 = vld [vmem:[#allocation11 + $0x2a4] ss:$24 sps:$4 sm:$0xff]   ;;  %v3938_v42 = vld [vmem:[#allocation11 + $0x2a0] ss:$24 sps:$4 sm:$0xff]   ;;  %v3995_v44 = vld [vmem:[#allocation11 + $0x330] ss:$24 sps:$4 sm:$0xff]  }
 0x226   :  { %1654 = vmatpush2.bf16.msra.mxu1 %v3869_v45  ;;  %1695 = vmatpush2.bf16.msra.mxu0 %v3872_v46  ;;  %v3997_v45 = vld [vmem:[#allocation11 + $0x334] ss:$24 sps:$4 sm:$0xff]  }
 0x227   :  { %1655 = vmatprep.subr.bf16.mxu1 %v3877_v47  ;;  %1696 = vmatprep.subr.bf16.mxu0 %v3880_v48  ;;  %v3943_v46 = vld [vmem:[#allocation11 + $0x274] ss:$24 sps:$4 sm:$0xff]   ;;  %v3941_v47 = vld [vmem:[#allocation11 + $0x270] ss:$24 sps:$4 sm:$0xff]   ;;  %v4001_v48 = vld [vmem:[#allocation11 + $0x300] ss:$24 sps:$4 sm:$0xff]  }
 0x22a   :  { %1656 = vmatpush2.bf16.msra.mxu1 %v3875_v49  ;;  %1697 = vmatpush2.bf16.msra.mxu0 %v3878_v50  ;;  %v4003_v49 = vld [vmem:[#allocation11 + $0x304] ss:$24 sps:$4 sm:$0xff]  }
 0x22b   :  { %1657 = vmatprep.subr.bf16.mxu1 %v3883_v51  ;;  %1698 = vmatprep.subr.bf16.mxu0 %v3886_v52  ;;  %v3946_v50 = vld [vmem:[#allocation11 + $0x244] ss:$24 sps:$4 sm:$0xff]   ;;  %v3944_v51 = vld [vmem:[#allocation11 + $0x240] ss:$24 sps:$4 sm:$0xff]   ;;  %v4007_v52 = vld [vmem:[#allocation11 + $0x5d0] ss:$24 sps:$4 sm:$0xff]  }
 0x22e   :  { %1658 = vmatpush2.bf16.msra.mxu1 %v3881_v53  ;;  %1699 = vmatpush2.bf16.msra.mxu0 %v3884_v54  ;;  %v4009_v53 = vld [vmem:[#allocation11 + $0x5d4] ss:$24 sps:$4 sm:$0xff]  }
 0x22f   :  { %1659 = vmatprep.subr.bf16.mxu1 %v3889_v55  ;;  %1700 = vmatprep.subr.bf16.mxu0 %v3892_v56  ;;  %v3949_v54 = vld [vmem:[#allocation11 + $0x214] ss:$24 sps:$4 sm:$0xff]   ;;  %v3947_v55 = vld [vmem:[#allocation11 + $0x210] ss:$24 sps:$4 sm:$0xff]   ;;  %v4013_v56 = vld [vmem:[#allocation11 + $0x5a0] ss:$24 sps:$4 sm:$0xff]  }
 0x232   :  { %1660 = vmatpush2.bf16.msra.mxu1 %v3887_v57  ;;  %1701 = vmatpush2.bf16.msra.mxu0 %v3890_v58  ;;  %v4015_v57 = vld [vmem:[#allocation11 + $0x5a4] ss:$24 sps:$4 sm:$0xff]  }
 0x233   :  { %1661 = vmatprep.subr.bf16.mxu1 %v3895_v59  ;;  %1702 = vmatprep.subr.bf16.mxu0 %v3898_v60  ;;  %v3952_v58 = vld [vmem:[#allocation11 + $0x1e4] ss:$24 sps:$4 sm:$0xff]   ;;  %v3950_v59 = vld [vmem:[#allocation11 + $0x1e0] ss:$24 sps:$4 sm:$0xff]   ;;  %v4019_v60 = vld [vmem:[#allocation11 + $0x570] ss:$24 sps:$4 sm:$0xff]  }
 0x236   :  { %1662 = vmatpush2.bf16.msra.mxu1 %v3893_v61  ;;  %1703 = vmatpush2.bf16.msra.mxu0 %v3896_v62  ;;  %v4021_v61 = vld [vmem:[#allocation11 + $0x574] ss:$24 sps:$4 sm:$0xff]  }
 0x237   :  { %1663 = vmatprep.subr.bf16.mxu1 %v3901_v63  ;;  %1704 = vmatprep.subr.bf16.mxu0 %v3904_v0  ;;  %v3955_v62 = vld [vmem:[#allocation11 + $0x1b4] ss:$24 sps:$4 sm:$0xff]   ;;  %v3953_v63 = vld [vmem:[#allocation11 + $0x1b0] ss:$24 sps:$4 sm:$0xff]   ;;  %v4025_v0 = vld [vmem:[#allocation11 + $0x540] ss:$24 sps:$4 sm:$0xff]  }
 0x23a   :  { %1664 = vmatpush2.bf16.msra.mxu1 %v3899_v1  ;;  %1705 = vmatpush2.bf16.msra.mxu0 %v3902_v2  ;;  %v4027_v1 = vld [vmem:[#allocation11 + $0x544] ss:$24 sps:$4 sm:$0xff]  }
 0x23b   :  { %1665 = vmatprep.subr.bf16.mxu1 %v3907_v3  ;;  %1706 = vmatprep.subr.bf16.mxu0 %v3910_v6  ;;  %v3958_v2 = vld [vmem:[#allocation11 + $0x184] ss:$24 sps:$4 sm:$0xff]   ;;  %v3956_v3 = vld [vmem:[#allocation11 + $0x180] ss:$24 sps:$4 sm:$0xff]   ;;  %v4031_v6 = vld [vmem:[#allocation11 + $0x510] ss:$24 sps:$4 sm:$0xff]  }
 0x23e   :  { %1666 = vmatpush2.bf16.msra.mxu1 %v3905_v7  ;;  %1707 = vmatpush2.bf16.msra.mxu0 %v3908_v8  ;;  %v4033_v7 = vld [vmem:[#allocation11 + $0x514] ss:$24 sps:$4 sm:$0xff]  }
 0x23f   :  { %2909 = vmatprep.subr.bf16.mxu1 %v3913_v9  ;;  %2950 = vmatprep.subr.bf16.mxu0 %v3961_v18  ;;  %v3964_v8 = vld [vmem:[#allocation11 + $0x15c] ss:$24 sps:$4 sm:$0xff]   ;;  %v4037_v9 = vld [vmem:[#allocation11 + $0x4e0] ss:$24 sps:$4 sm:$0xff]  }
 0x241   :  { %1668 = vmatmul.mubr.bf16.vlgmr.msra.gmra.mxu1 %v4469_v4  ;;  %1709 = vmatmul.mubr.bf16.vlgmr.msra.gmra.mxu0 %v4471_v5  ;;  %v3923_v4 = vld [vmem:[#allocation11 + $0x90] ss:$24 sps:$4 sm:$0xff]   ;;  %v3967_v5 = vld [vmem:[#allocation11 + $0x424] ss:$24 sps:$4 sm:$0xff]  }
 0x242   :  { %2910 = vmatpush1.bf16.msra.mxu1 %v3911_v10  ;;  %2951 = vmatpush1.bf16.msra.mxu0 %v3959_v17  ;;  %v4039_v10 = vld [vmem:[#allocation11 + $0x4e4] ss:$24 sps:$4 sm:$0xff]  }
 0x243   :  { %2911 = vmatprep.subr.bf16.mxu1 %v3916_v11  ;;  %2952 = vmatprep.subr.bf16.mxu0 %v3967_v5  ;;  %v4045_v11 = vld [vmem:[#allocation11 + $0x4b4] ss:$24 sps:$4 sm:$0xff]  }
 0x246   :  { %2912 = vmatpush1.bf16.msra.mxu1 %v3914_v12  ;;  %2953 = vmatpush1.bf16.msra.mxu0 %v3965_v20  ;;  %v4043_v12 = vld [vmem:[#allocation11 + $0x4b0] ss:$24 sps:$4 sm:$0xff]  }
 0x247   :  { %2913 = vmatprep.subr.bf16.mxu1 %v3919_v13  ;;  %2954 = vmatprep.subr.bf16.mxu0 %v3973_v27  ;;  %v4051_v13 = vld [vmem:[#allocation11 + $0x484] ss:$24 sps:$4 sm:$0xff]  }
 0x24a   :  { %2914 = vmatpush1.bf16.msra.mxu1 %v3917_v14  ;;  %2955 = vmatpush1.bf16.msra.mxu0 %v3971_v26  ;;  %v4049_v14 = vld [vmem:[#allocation11 + $0x480] ss:$24 sps:$4 sm:$0xff]  }
 0x24b   :  { %2915 = vmatprep.subr.bf16.mxu1 %v3922_v15  ;;  %2956 = vmatprep.subr.bf16.mxu0 %v3979_v31  ;;  %v4057_v15 = vld [vmem:[#allocation11 + $0x45c] ss:$24 sps:$4 sm:$0xff]  }
 0x24e   :  { %2916 = vmatpush1.bf16.msra.mxu1 %v3920_v16  ;;  %2957 = vmatpush1.bf16.msra.mxu0 %v3977_v30  ;;  %v4477_v16 = vld [vmem:[#allocation10] sm:$0xf] }
 0x24f   :  { %2917 = vmatprep.subr.bf16.mxu1 %v3925_v19  ;;  %2958 = vmatprep.subr.bf16.mxu0 %v3985_v35  ;;  %v896_v17 = vrot.slane %v4477_v16, %v4446_v23  ;;  %v900_v18 = vrot.slane %v4477_v16, %v4452_v25  ;;  %v3962_v35 = vld [vmem:[#allocation11 + $0x158] ss:$24 sps:$4 sm:$0xff]  }
 0x252   :  { %2918 = vmatpush1.bf16.msra.mxu1 %v3923_v4  ;;  %2959 = vmatpush1.bf16.msra.mxu0 %v3983_v34 }
 0x253   :  { %2919 = vmatprep.subr.bf16.mxu1 %v3928_v21  ;;  %2960 = vmatprep.subr.bf16.mxu0 %v3991_v39  ;;  %v3976_v39 = vld [vmem:[#allocation11 + $0xfc] ss:$24 sps:$4 sm:$0xff]  }
 0x256   :  { %2920 = vmatpush1.bf16.msra.mxu1 %v3926_v24  ;;  %2961 = vmatpush1.bf16.msra.mxu0 %v3989_v38  ;;  %v3968_v38 = vld [vmem:[#allocation11 + $0x128] ss:$24 sps:$4 sm:$0xff]  }
 0x257   :  { %2921 = vmatprep.subr.bf16.mxu1 %v3931_v28  ;;  %2962 = vmatprep.subr.bf16.mxu0 %v3997_v45  ;;  %v3988_v45 = vld [vmem:[#allocation11 + $0x9c] ss:$24 sps:$4 sm:$0xff]  }
 0x25a   :  { %2922 = vmatpush1.bf16.msra.mxu1 %v3929_v29  ;;  %2963 = vmatpush1.bf16.msra.mxu0 %v3995_v44  ;;  %v3980_v44 = vld [vmem:[#allocation11 + $0xc8] ss:$24 sps:$4 sm:$0xff]  }
 0x25b   :  { %2923 = vmatprep.subr.bf16.mxu1 %v3934_v32  ;;  %2964 = vmatprep.subr.bf16.mxu0 %v4003_v49  ;;  %v4000_v49 = vld [vmem:[#allocation11 + $0x3c] ss:$24 sps:$4 sm:$0xff]  }
 0x25e   :  { %2924 = vmatpush1.bf16.msra.mxu1 %v3932_v33  ;;  %2965 = vmatpush1.bf16.msra.mxu0 %v4001_v48  ;;  %v3992_v48 = vld [vmem:[#allocation11 + $0x68] ss:$24 sps:$4 sm:$0xff]  }
 0x25f   :  { %2925 = vmatprep.subr.bf16.mxu1 %v3937_v36  ;;  %2966 = vmatprep.subr.bf16.mxu0 %v4009_v53  ;;  %v4012_v53 = vld [vmem:[#allocation11 + $0x2dc] ss:$24 sps:$4 sm:$0xff]  }
 0x262   :  { %2926 = vmatpush2.bf16.msra.mxu1 %v3935_v37  ;;  %2967 = vmatpush2.bf16.msra.mxu0 %v4007_v52  ;;  %v3970_v37 = vld [vmem:[#allocation11 + $0x12c] ss:$24 sps:$4 sm:$0xff]   ;;  %v4004_v52 = vld [vmem:[#allocation11 + $0x8] ss:$24 sps:$4 sm:$0xff]  }
 0x263   :  { %2927 = vmatprep.subr.bf16.mxu1 %v3940_v40  ;;  %2968 = vmatprep.subr.bf16.mxu0 %v4015_v57  ;;  %v3974_v40 = vld [vmem:[#allocation11 + $0xf8] ss:$24 sps:$4 sm:$0xff]   ;;  %v4024_v57 = vld [vmem:[#allocation11 + $0x27c] ss:$24 sps:$4 sm:$0xff]  }
 0x266   :  { %2928 = vmatpush2.bf16.msra.mxu1 %v3938_v42  ;;  %2969 = vmatpush2.bf16.msra.mxu0 %v4013_v56  ;;  %v3982_v42 = vld [vmem:[#allocation11 + $0xcc] ss:$24 sps:$4 sm:$0xff]   ;;  %v4016_v56 = vld [vmem:[#allocation11 + $0x2a8] ss:$24 sps:$4 sm:$0xff]  }
 0x267   :  { %2929 = vmatprep.subr.bf16.mxu1 %v3943_v46  ;;  %2970 = vmatprep.subr.bf16.mxu0 %v4021_v61  ;;  %v3986_v46 = vld [vmem:[#allocation11 + $0x98] ss:$24 sps:$4 sm:$0xff]   ;;  %v4036_v61 = vld [vmem:[#allocation11 + $0x21c] ss:$24 sps:$4 sm:$0xff]  }
 0x26a   :  { %2930 = vmatpush2.bf16.msra.mxu1 %v3941_v47  ;;  %2971 = vmatpush2.bf16.msra.mxu0 %v4019_v60  ;;  %v3994_v47 = vld [vmem:[#allocation11 + $0x6c] ss:$24 sps:$4 sm:$0xff]   ;;  %v4028_v60 = vld [vmem:[#allocation11 + $0x248] ss:$24 sps:$4 sm:$0xff]  }
 0x26b   :  { %2931 = vmatprep.subr.bf16.mxu1 %v3946_v50  ;;  %2972 = vmatprep.subr.bf16.mxu0 %v4027_v1  ;;  %v3998_v50 = vld [vmem:[#allocation11 + $0x38] ss:$24 sps:$4 sm:$0xff]   ;;  %v4040_v1 = vld [vmem:[#allocation11 + $0x1e8] ss:$24 sps:$4 sm:$0xff]  }
 0x26e   :  { %2932 = vmatpush2.bf16.msra.mxu1 %v3944_v51  ;;  %2973 = vmatpush2.bf16.msra.mxu0 %v4025_v0  ;;  %v4006_v51 = vld [vmem:[#allocation11 + $0xc] ss:$24 sps:$4 sm:$0xff]   ;;  %v904_v0 = vrot.slane %v4477_v16, %v4457_v41 }
 0x26f   :  { %2933 = vmatprep.subr.bf16.mxu1 %v3949_v54  ;;  %2974 = vmatprep.subr.bf16.mxu0 %v4033_v7  ;;  %v4010_v54 = vld [vmem:[#allocation11 + $0x2d8] ss:$24 sps:$4 sm:$0xff]  }
 0x272   :  { %2934 = vmatpush2.bf16.msra.mxu1 %v3947_v55  ;;  %2975 = vmatpush2.bf16.msra.mxu0 %v4031_v6  ;;  %v4018_v55 = vld [vmem:[#allocation11 + $0x2ac] ss:$24 sps:$4 sm:$0xff]  }
 0x273   :  { %2935 = vmatprep.subr.bf16.mxu1 %v3952_v58  ;;  %2976 = vmatprep.subr.bf16.mxu0 %v4039_v10  ;;  %v4022_v58 = vld [vmem:[#allocation11 + $0x278] ss:$24 sps:$4 sm:$0xff]  }
 0x276   :  { %2936 = vmatpush2.bf16.msra.mxu1 %v3950_v59  ;;  %2977 = vmatpush2.bf16.msra.mxu0 %v4037_v9  ;;  %v4030_v59 = vld [vmem:[#allocation11 + $0x24c] ss:$24 sps:$4 sm:$0xff]   ;;  %v4046_v9 = vld [vmem:[#allocation11 + $0x1b8] ss:$24 sps:$4 sm:$0xff]  }
 0x277   :  { %2937 = vmatprep.subr.bf16.mxu1 %v3955_v62  ;;  %2978 = vmatprep.subr.bf16.mxu0 %v4045_v11  ;;  %v4034_v62 = vld [vmem:[#allocation11 + $0x218] ss:$24 sps:$4 sm:$0xff]  }
 0x27a   :  { %2938 = vmatpush2.bf16.msra.mxu1 %v3953_v63  ;;  %2979 = vmatpush2.bf16.msra.mxu0 %v4043_v12  ;;  %v4042_v63 = vld [vmem:[#allocation11 + $0x1ec] ss:$24 sps:$4 sm:$0xff]  }
 0x27b   :  { %2939 = vmatprep.subr.bf16.mxu1 %v3958_v2  ;;  %2980 = vmatprep.subr.bf16.mxu0 %v4051_v13  ;;  %v4048_v2 = vld [vmem:[#allocation11 + $0x1bc] ss:$24 sps:$4 sm:$0xff]   ;;  %v4054_v12 = vld [vmem:[#allocation11 + $0x18c] ss:$24 sps:$4 sm:$0xff]  }
 0x27e   :  { %2940 = vmatpush2.bf16.msra.mxu1 %v3956_v3  ;;  %2981 = vmatpush2.bf16.msra.mxu0 %v4049_v14  ;;  %v908_v3 = vrot.slane %v4477_v16, %v4463_v43  ;;  %v4060_v16 = vld [vmem:[#allocation11 + $0x164] ss:$24 sps:$4 sm:$0xff]  }
 0x27f   :  { %2991 = vmatprep.subr.bf16.mxu1 %v3964_v8  ;;  %3032 = vmatprep.subr.bf16.mxu0 %v4057_v15 }
 0x2c1   :  { %v1587_v19 = vpop.f32.mrf.mxu1  ;;  %v1628_v4 = vpop.f32.mrf.mxu0 }
 0x2c2   :  { %v1588_v20 = vadd.f32 %v1587_v19, %v896_v17  ;;  %v4052_v19 = vld [vmem:[#allocation11 + $0x188] ss:$24 sps:$4 sm:$0xff]  }
 0x2c3   :  { %v1589_v5 = vpop.f32.mrf.mxu1  ;;  %v1630_v21 = vpop.f32.mrf.mxu0 }
 0x2c4   :  { %v1629_v24 = vadd.f32 %v1628_v4, %v1588_v20  ;;  %v1590_v26 = vadd.f32 %v1589_v5, %v900_v18 }
 0x2c5   :  { %v1591_v27 = vpop.f32.mrf.mxu1  ;;  %v1632_v28 = vpop.f32.mrf.mxu0 }
 0x2c6   :  { %v1631_v29 = vadd.f32 %v1630_v21, %v1590_v26  ;;  %v1717_v30 = vmax.f32 %v1629_v24, 0.0  ;;  %v4055_v26 = vld [vmem:[#allocation11 + $0x458] ss:$24 sps:$4 sm:$0xff]  }
 0x2c7   :  { %v1592_v31 = vpop.f32.mrf.mxu1  ;;  %v1633_v32 = vpop.f32.mrf.mxu0  ;;  %v4058_v28 = vld [vmem:[#allocation11 + $0x160] ss:$24 sps:$4 sm:$0xff]  }
 0x2c8   :  { %v1718_v33 = vmax.f32 %v1631_v29, 0.0  ;;  %v4485_v36 = vpack.c.bf16 %v1717_v30, %v1717_v30  ;;  %v4063_v29 = vld [vmem:[#allocation11 + $0x42c] ss:$24 sps:$4 sm:$0xff]   ;;  %v4061_v31 = vld [vmem:[#allocation11 + $0x428] ss:$24 sps:$4 sm:$0xff]  }
 0x2c9   :  { %v4066_v30 = vld [vmem:[#allocation11 + $0x134] ss:$24 sps:$4 sm:$0xff]   ;;  %v4064_v32 = vld [vmem:[#allocation11 + $0x130] ss:$24 sps:$4 sm:$0xff]  }
 0x2ca   :  { %v4483_v34 = vpack.c.bf16 %v1718_v33, %v1718_v33  ;;  %v4069_v33 = vld [vmem:[#allocation11 + $0x3fc] ss:$24 sps:$4 sm:$0xff]  }
 0x2cc   :  { %2941 = vmatprep.mubr.bf16.mxu1 %v4483_v34 }
 0x2cd   :  { %2942 = vmatmul.mubr.bf16.vlgmr.msra.gmra.mxu1 %v4485_v36 }
 0x2ce   :  { %2992 = vmatpush1.bf16.msra.mxu1 %v3962_v35  ;;  %3023 = vmatprep.mubr.bf16.mxu1 %v4483_v34  ;;  %v4072_v35 = vld [vmem:[#allocation11 + $0x104] ss:$24 sps:$4 sm:$0xff]  }
 0x2cf   :  { %2993 = vmatprep.subr.bf16.mxu1 %v3970_v37  ;;  %v4067_v37 = vld [vmem:[#allocation11 + $0x3f8] ss:$24 sps:$4 sm:$0xff]  }
 0x2d2   :  { %2994 = vmatpush1.bf16.msra.mxu1 %v3968_v38  ;;  %v4070_v38 = vld [vmem:[#allocation11 + $0x100] ss:$24 sps:$4 sm:$0xff]  }
 0x2d3   :  { %2995 = vmatprep.subr.bf16.mxu1 %v3976_v39  ;;  %v4075_v39 = vld [vmem:[#allocation11 + $0x3cc] ss:$24 sps:$4 sm:$0xff]  }
 0x2d6   :  { %2996 = vmatpush1.bf16.msra.mxu1 %v3974_v40  ;;  %v4078_v40 = vld [vmem:[#allocation11 + $0xd4] ss:$24 sps:$4 sm:$0xff]  }
 0x2d7   :  { %2997 = vmatprep.subr.bf16.mxu1 %v3982_v42  ;;  %v4073_v42 = vld [vmem:[#allocation11 + $0x3c8] ss:$24 sps:$4 sm:$0xff]  }
 0x2da   :  { %2998 = vmatpush1.bf16.msra.mxu1 %v3980_v44  ;;  %v4076_v44 = vld [vmem:[#allocation11 + $0xd0] ss:$24 sps:$4 sm:$0xff]  }
 0x2db   :  { %2999 = vmatprep.subr.bf16.mxu1 %v3988_v45  ;;  %v4081_v45 = vld [vmem:[#allocation11 + $0x39c] ss:$24 sps:$4 sm:$0xff]  }
 0x2de   :  { %3000 = vmatpush1.bf16.msra.mxu1 %v3986_v46  ;;  %v4079_v46 = vld [vmem:[#allocation11 + $0x398] ss:$24 sps:$4 sm:$0xff]  }
 0x2df   :  { %3001 = vmatprep.subr.bf16.mxu1 %v3994_v47  ;;  %v4082_v47 = vld [vmem:[#allocation11 + $0xa0] ss:$24 sps:$4 sm:$0xff]  }
 0x2e2   :  { %3002 = vmatpush1.bf16.msra.mxu1 %v3992_v48  ;;  %v4087_v48 = vld [vmem:[#allocation11 + $0x36c] ss:$24 sps:$4 sm:$0xff]  }
 0x2e3   :  { %3003 = vmatprep.subr.bf16.mxu1 %v4000_v49  ;;  %v4090_v49 = vld [vmem:[#allocation11 + $0x74] ss:$24 sps:$4 sm:$0xff]  }
 0x2e6   :  { %3004 = vmatpush1.bf16.msra.mxu1 %v3998_v50  ;;  %v4085_v50 = vld [vmem:[#allocation11 + $0x368] ss:$24 sps:$4 sm:$0xff]  }
 0x2e7   :  { %3005 = vmatprep.subr.bf16.mxu1 %v4006_v51  ;;  %v4088_v51 = vld [vmem:[#allocation11 + $0x70] ss:$24 sps:$4 sm:$0xff]  }
 0x2ea   :  { %3006 = vmatpush1.bf16.msra.mxu1 %v4004_v52  ;;  %v4093_v52 = vld [vmem:[#allocation11 + $0x33c] ss:$24 sps:$4 sm:$0xff]  }
 0x2eb   :  { %3007 = vmatprep.subr.bf16.mxu1 %v4012_v53  ;;  %v4096_v53 = vld [vmem:[#allocation11 + $0x44] ss:$24 sps:$4 sm:$0xff]  }
 0x2ee   :  { %3008 = vmatpush2.bf16.msra.mxu1 %v4010_v54  ;;  %v4091_v54 = vld [vmem:[#allocation11 + $0x338] ss:$24 sps:$4 sm:$0xff]  }
 0x2ef   :  { %3009 = vmatprep.subr.bf16.mxu1 %v4018_v55  ;;  %v4094_v55 = vld [vmem:[#allocation11 + $0x40] ss:$24 sps:$4 sm:$0xff]  }
 0x2f2   :  { %3010 = vmatpush2.bf16.msra.mxu1 %v4016_v56  ;;  %v4099_v56 = vld [vmem:[#allocation11 + $0x30c] ss:$24 sps:$4 sm:$0xff]  }
 0x2f3   :  { %3011 = vmatprep.subr.bf16.mxu1 %v4024_v57  ;;  %v4102_v57 = vld [vmem:[#allocation11 + $0x14] ss:$24 sps:$4 sm:$0xff]  }
 0x2f6   :  { %3012 = vmatpush2.bf16.msra.mxu1 %v4022_v58  ;;  %v4097_v58 = vld [vmem:[#allocation11 + $0x308] ss:$24 sps:$4 sm:$0xff]  }
 0x2f7   :  { %3013 = vmatprep.subr.bf16.mxu1 %v4030_v59  ;;  %v4100_v59 = vld [vmem:[#allocation11 + $0x10] ss:$24 sps:$4 sm:$0xff]  }
 0x2fa   :  { %3014 = vmatpush2.bf16.msra.mxu1 %v4028_v60  ;;  %v4105_v60 = vld [vmem:[#allocation11 + $0x5dc] ss:$24 sps:$4 sm:$0xff]  }
 0x2fb   :  { %3015 = vmatprep.subr.bf16.mxu1 %v4036_v61  ;;  %v4108_v61 = vld [vmem:[#allocation11 + $0x2e4] ss:$24 sps:$4 sm:$0xff]  }
 0x2fe   :  { %3016 = vmatpush2.bf16.msra.mxu1 %v4034_v62  ;;  %v4103_v62 = vld [vmem:[#allocation11 + $0x5d8] ss:$24 sps:$4 sm:$0xff]  }
 0x2ff   :  { %3017 = vmatprep.subr.bf16.mxu1 %v4042_v63  ;;  %v4106_v63 = vld [vmem:[#allocation11 + $0x2e0] ss:$24 sps:$4 sm:$0xff]  }
 0x301   :  { %v1669_v6 = vpop.f32.mrf.mxu1  ;;  %v1710_v7 = vpop.f32.mrf.mxu0 }
 0x302   :  { %v1670_v8 = vadd.f32 %v1669_v6, %v904_v0  ;;  %3018 = vmatpush2.bf16.msra.mxu1 %v4040_v1  ;;  %v4111_v0 = vld [vmem:[#allocation11 + $0x5ac] ss:$24 sps:$4 sm:$0xff]   ;;  %v4117_v6 = vld [vmem:[#allocation11 + $0x57c] ss:$24 sps:$4 sm:$0xff]  }
 0x303   :  { %v1671_v10 = vpop.f32.mrf.mxu1  ;;  %v1712_v11 = vpop.f32.mrf.mxu0  ;;  %3019 = vmatprep.subr.bf16.mxu1 %v4048_v2  ;;  %v4114_v1 = vld [vmem:[#allocation11 + $0x2b4] ss:$24 sps:$4 sm:$0xff]   ;;  %v4109_v2 = vld [vmem:[#allocation11 + $0x5a8] ss:$24 sps:$4 sm:$0xff]  }
 0x304   :  { %v1711_v13 = vadd.f32 %v1710_v7, %v1670_v8  ;;  %v1672_v14 = vadd.f32 %v1671_v10, %v908_v3  ;;  %v4112_v3 = vld [vmem:[#allocation11 + $0x2b0] ss:$24 sps:$4 sm:$0xff]   ;;  %v4120_v7 = vld [vmem:[#allocation11 + $0x284] ss:$24 sps:$4 sm:$0xff]  }
 0x305   :  { %v1673_v15 = vpop.f32.mrf.mxu1  ;;  %v1714_v17 = vpop.f32.mrf.mxu0  ;;  %v4115_v8 = vld [vmem:[#allocation11 + $0x578] ss:$24 sps:$4 sm:$0xff]   ;;  %v4123_v10 = vld [vmem:[#allocation11 + $0x54c] ss:$24 sps:$4 sm:$0xff]  }
 0x306   :  { %v1713_v18 = vadd.f32 %v1712_v11, %v1672_v14  ;;  %3020 = vmatpush2.bf16.msra.mxu1 %v4046_v9  ;;  %v1719_v4 = vmax.f32 %v1711_v13, 0.0  ;;  %v4118_v9 = vld [vmem:[#allocation11 + $0x280] ss:$24 sps:$4 sm:$0xff]   ;;  %v4126_v11 = vld [vmem:[#allocation11 + $0x254] ss:$24 sps:$4 sm:$0xff]  }
 0x307   :  { %v1674_v20 = vpop.f32.mrf.mxu1  ;;  %v1715_v5 = vpop.f32.mrf.mxu0  ;;  %3021 = vmatprep.subr.bf16.mxu1 %v4054_v12  ;;  %v4121_v12 = vld [vmem:[#allocation11 + $0x548] ss:$24 sps:$4 sm:$0xff]   ;;  %v4129_v14 = vld [vmem:[#allocation11 + $0x51c] ss:$24 sps:$4 sm:$0xff]   ;;  %v4127_v17 = vld [vmem:[#allocation11 + $0x518] ss:$24 sps:$4 sm:$0xff]  }
 0x308   :  { %v1720_v21 = vmax.f32 %v1713_v18, 0.0  ;;  %v4496_v27 = vpack.c.bf16 %v1719_v4, %v1719_v4  ;;  %v4124_v13 = vld [vmem:[#allocation11 + $0x250] ss:$24 sps:$4 sm:$0xff]   ;;  %v4132_v15 = vld [vmem:[#allocation11 + $0x224] ss:$24 sps:$4 sm:$0xff]  }
 0x309   :  { %v4130_v18 = vld [vmem:[#allocation11 + $0x220] ss:$24 sps:$4 sm:$0xff]   ;;  %v4138_v4 = vld [vmem:[#allocation11 + $0x1f4] ss:$24 sps:$4 sm:$0xff]   ;;  %v4136_v5 = vld [vmem:[#allocation11 + $0x1f0] ss:$24 sps:$4 sm:$0xff]  }
 0x30a   :  { %v4494_v24 = vpack.c.bf16 %v1720_v21, %v1720_v21  ;;  %3022 = vmatpush2.bf16.msra.mxu1 %v4052_v19  ;;  %v4135_v19 = vld [vmem:[#allocation11 + $0x4ec] ss:$24 sps:$4 sm:$0xff]   ;;  %v4133_v20 = vld [vmem:[#allocation11 + $0x4e8] ss:$24 sps:$4 sm:$0xff]  }
 0x30b   :  { %3073 = vmatprep.subr.bf16.mxu1 %v4060_v16  ;;  %v4141_v16 = vld [vmem:[#allocation11 + $0x4bc] ss:$24 sps:$4 sm:$0xff]  }
 0x30c   :  { %2982 = vmatprep.mubr.bf16.mxu0 %v4494_v24  ;;  %v4144_v21 = vld [vmem:[#allocation11 + $0x1c4] ss:$24 sps:$4 sm:$0xff]  }
 0x30d   :  { %2983 = vmatmul.mubr.bf16.vlgmr.msra.gmra.mxu0 %v4496_v27  ;;  %3024 = vmatmul.mubr.bf16.vlgmr.msra.gmra.mxu1 %v4485_v36 }
 0x30e   :  { %3033 = vmatpush1.bf16.msra.mxu0 %v4055_v26  ;;  %3064 = vmatprep.mubr.bf16.mxu0 %v4494_v24  ;;  %v4139_v26 = vld [vmem:[#allocation11 + $0x4b8] ss:$24 sps:$4 sm:$0xff]  }
 0x30f   :  { %3074 = vmatpush1.bf16.msra.mxu1 %v4058_v28  ;;  %3105 = vmatprep.mubr.bf16.mxu1 %v4483_v34  ;;  %v4084_v34 = vld [vmem:[#allocation11 + $0xa4] ss:$24 sps:$4 sm:$0xff]   ;;  %v4142_v28 = vld [vmem:[#allocation11 + $0x1c0] ss:$24 sps:$4 sm:$0xff]  }
 0x310   :  { %3034 = vmatprep.subr.bf16.mxu0 %v4063_v29  ;;  %3075 = vmatprep.subr.bf16.mxu1 %v4066_v30  ;;  %v4147_v29 = vld [vmem:[#allocation11 + $0x48c] ss:$24 sps:$4 sm:$0xff]  }
 0x311   :  { %v4150_v30 = vld [vmem:[#allocation11 + $0x194] ss:$24 sps:$4 sm:$0xff]  }
 0x312   :  { %3035 = vmatpush1.bf16.msra.mxu0 %v4061_v31  ;;  %v4145_v31 = vld [vmem:[#allocation11 + $0x488] ss:$24 sps:$4 sm:$0xff]  }
 0x313   :  { %3076 = vmatpush1.bf16.msra.mxu1 %v4064_v32  ;;  %3036 = vmatprep.subr.bf16.mxu0 %v4069_v33  ;;  %v4148_v32 = vld [vmem:[#allocation11 + $0x190] ss:$24 sps:$4 sm:$0xff]   ;;  %v4153_v33 = vld [vmem:[#allocation11 + $0x464] ss:$24 sps:$4 sm:$0xff]  }
 0x314   :  { %3077 = vmatprep.subr.bf16.mxu1 %v4072_v35  ;;  %v4151_v35 = vld [vmem:[#allocation11 + $0x460] ss:$24 sps:$4 sm:$0xff]  }
 0x316   :  { %3037 = vmatpush1.bf16.msra.mxu0 %v4067_v37  ;;  %v4156_v37 = vld [vmem:[#allocation11 + $0x434] ss:$24 sps:$4 sm:$0xff]  }
 0x317   :  { %3078 = vmatpush1.bf16.msra.mxu1 %v4070_v38  ;;  %3038 = vmatprep.subr.bf16.mxu0 %v4075_v39  ;;  %v4154_v38 = vld [vmem:[#allocation11 + $0x430] ss:$24 sps:$4 sm:$0xff]   ;;  %v4159_v39 = vld [vmem:[#allocation11 + $0x404] ss:$24 sps:$4 sm:$0xff]  }
 0x318   :  { %3079 = vmatprep.subr.bf16.mxu1 %v4078_v40  ;;  %v4157_v40 = vld [vmem:[#allocation11 + $0x400] ss:$24 sps:$4 sm:$0xff]  }
 0x31a   :  { %3039 = vmatpush1.bf16.msra.mxu0 %v4073_v42  ;;  %v4162_v42 = vld [vmem:[#allocation11 + $0x3d4] ss:$24 sps:$4 sm:$0xff]  }
 0x31b   :  { %3080 = vmatpush1.bf16.msra.mxu1 %v4076_v44  ;;  %3040 = vmatprep.subr.bf16.mxu0 %v4081_v45  ;;  %v4160_v44 = vld [vmem:[#allocation11 + $0x3d0] ss:$24 sps:$4 sm:$0xff]   ;;  %v4165_v45 = vld [vmem:[#allocation11 + $0x3a4] ss:$24 sps:$4 sm:$0xff]  }
 0x31c   :  { %3081 = vmatprep.subr.bf16.mxu1 %v4084_v34  ;;  %v4163_v34 = vld [vmem:[#allocation11 + $0x3a0] ss:$24 sps:$4 sm:$0xff]  }
 0x31e   :  { %3041 = vmatpush1.bf16.msra.mxu0 %v4079_v46  ;;  %v4168_v46 = vld [vmem:[#allocation11 + $0x374] ss:$24 sps:$4 sm:$0xff]  }
 0x31f   :  { %3082 = vmatpush1.bf16.msra.mxu1 %v4082_v47  ;;  %3042 = vmatprep.subr.bf16.mxu0 %v4087_v48  ;;  %v4171_v47 = vld [vmem:[#allocation11 + $0x344] ss:$24 sps:$4 sm:$0xff]   ;;  %v4174_v48 = vld [vmem:[#allocation11 + $0x314] ss:$24 sps:$4 sm:$0xff]  }
 0x320   :  { %3083 = vmatprep.subr.bf16.mxu1 %v4090_v49  ;;  %v4172_v49 = vld [vmem:[#allocation11 + $0x310] ss:$24 sps:$4 sm:$0xff]  }
 0x322   :  { %3043 = vmatpush1.bf16.msra.mxu0 %v4085_v50  ;;  %v4177_v50 = vld [vmem:[#allocation11 + $0x5e4] ss:$24 sps:$4 sm:$0xff]  }
 0x323   :  { %3084 = vmatpush1.bf16.msra.mxu1 %v4088_v51  ;;  %3044 = vmatprep.subr.bf16.mxu0 %v4093_v52  ;;  %v4175_v51 = vld [vmem:[#allocation11 + $0x5e0] ss:$24 sps:$4 sm:$0xff]   ;;  %v4180_v52 = vld [vmem:[#allocation11 + $0x5b4] ss:$24 sps:$4 sm:$0xff]  }
 0x324   :  { %3085 = vmatprep.subr.bf16.mxu1 %v4096_v53  ;;  %v4178_v53 = vld [vmem:[#allocation11 + $0x5b0] ss:$24 sps:$4 sm:$0xff]  }
 0x326   :  { %3045 = vmatpush1.bf16.msra.mxu0 %v4091_v54  ;;  %v4183_v54 = vld [vmem:[#allocation11 + $0x584] ss:$24 sps:$4 sm:$0xff]  }
 0x327   :  { %3086 = vmatpush1.bf16.msra.mxu1 %v4094_v55  ;;  %3046 = vmatprep.subr.bf16.mxu0 %v4099_v56  ;;  %v4181_v55 = vld [vmem:[#allocation11 + $0x580] ss:$24 sps:$4 sm:$0xff]   ;;  %v4186_v56 = vld [vmem:[#allocation11 + $0x554] ss:$24 sps:$4 sm:$0xff]  }
 0x328   :  { %3087 = vmatprep.subr.bf16.mxu1 %v4102_v57  ;;  %v4184_v57 = vld [vmem:[#allocation11 + $0x550] ss:$24 sps:$4 sm:$0xff]  }
 0x32a   :  { %3047 = vmatpush1.bf16.msra.mxu0 %v4097_v58  ;;  %v4189_v58 = vld [vmem:[#allocation11 + $0x524] ss:$24 sps:$4 sm:$0xff]  }
 0x32b   :  { %3088 = vmatpush1.bf16.msra.mxu1 %v4100_v59  ;;  %3048 = vmatprep.subr.bf16.mxu0 %v4105_v60  ;;  %v4187_v59 = vld [vmem:[#allocation11 + $0x520] ss:$24 sps:$4 sm:$0xff]   ;;  %v4192_v60 = vld [vmem:[#allocation11 + $0x4f4] ss:$24 sps:$4 sm:$0xff]  }
 0x32c   :  { %3089 = vmatprep.subr.bf16.mxu1 %v4108_v61  ;;  %v4190_v61 = vld [vmem:[#allocation11 + $0x4f0] ss:$24 sps:$4 sm:$0xff]  }
 0x32e   :  { %3049 = vmatpush2.bf16.msra.mxu0 %v4103_v62  ;;  %v4195_v62 = vld [vmem:[#allocation11 + $0x4c4] ss:$24 sps:$4 sm:$0xff]  }
 0x32f   :  { %3090 = vmatpush2.bf16.msra.mxu1 %v4106_v63  ;;  %3050 = vmatprep.subr.bf16.mxu0 %v4111_v0  ;;  %v4193_v63 = vld [vmem:[#allocation11 + $0x4c0] ss:$24 sps:$4 sm:$0xff]   ;;  %v4198_v0 = vld [vmem:[#allocation11 + $0x494] ss:$24 sps:$4 sm:$0xff]  }
 0x330   :  { %3091 = vmatprep.subr.bf16.mxu1 %v4114_v1  ;;  %v4196_v1 = vld [vmem:[#allocation11 + $0x490] ss:$24 sps:$4 sm:$0xff]  }
 0x332   :  { %3051 = vmatpush2.bf16.msra.mxu0 %v4109_v2 }
 0x333   :  { %3092 = vmatpush2.bf16.msra.mxu1 %v4112_v3  ;;  %3052 = vmatprep.subr.bf16.mxu0 %v4117_v6 }
 0x334   :  { %3093 = vmatprep.subr.bf16.mxu1 %v4120_v7 }
 0x336   :  { %3053 = vmatpush2.bf16.msra.mxu0 %v4115_v8  ;;  %v1917_v8 = vld [vmem:[%s4527_s8] sm:$0x3f]  ;;  %s4374_s8 = smov [#allocation13]  }
 0x337   :  { %3094 = vmatpush2.bf16.msra.mxu1 %v4118_v9  ;;  %3054 = vmatprep.subr.bf16.mxu0 %v4123_v10  ;;  %v1922_v9 = vrot.slane %v1917_v8, %v4446_v23  ;;  %v1926_v10 = vrot.slane %v1917_v8, %v4452_v25  ;;  %v1930_v23 = vrot.slane %v1917_v8, %v4457_v41  ;;  %v1937_v41 = vsub.s32 4, %v4443_v22  ;;  %s3173_s22 = sshll.u32 %s4374_s8, 4  ;;  %s3174_s22 = int_to_ptr.vmem [resolvable:$true] %s3173_s22 }
 0x338   :  { %3095 = vmatprep.subr.bf16.mxu1 %v4126_v11  ;;  %v1934_v25 = vrot.slane %v1917_v8, %v4463_v43  ;;  %v1941_v43 = vsub.s32 5, %v4443_v22  ;;  %s4331_s23 = scalar_lea.vmem %s3174_s22, 768  ;;  %p4336_p3 = scmp.lt.s32.totalorder %s3174_s22, %s3174_s22 }
 0x339   :  { %p4332_p2 = scmp.ne.s32.totalorder %s3174_s22, %s4331_s23  ;;  %p4337_p4 = scmp.lt.s32.totalorder %s4331_s23, %s4331_s23 }
 0x33a   :  { %3055 = vmatpush2.bf16.msra.mxu0 %v4121_v12 }
 0x33b   :  { %3096 = vmatpush2.bf16.msra.mxu1 %v4124_v13  ;;  %3056 = vmatprep.subr.bf16.mxu0 %v4129_v14  ;;  %p4338_p5 = por %p4337_p4, %p4336_p3 }
 0x33c   :  { %3097 = vmatprep.subr.bf16.mxu1 %v4132_v15 }
 0x33d   :  { %p4339_p6 = pnand %p4338_p5, %p4332_p2 }
 0x33e   :  { %3057 = vmatpush2.bf16.msra.mxu0 %v4127_v17 }
 0x33f   :  { %3098 = vmatpush2.bf16.msra.mxu1 %v4130_v18  ;;  %3058 = vmatprep.subr.bf16.mxu0 %v4135_v19 }
 0x340   :  { %3099 = vmatprep.subr.bf16.mxu1 %v4138_v4 }
 0x342   :  { %3059 = vmatpush2.bf16.msra.mxu0 %v4133_v20 }
 0x343   :  { %3100 = vmatpush2.bf16.msra.mxu1 %v4136_v5  ;;  %3060 = vmatprep.subr.bf16.mxu0 %v4141_v16 }
 0x344   :  { %3101 = vmatprep.subr.bf16.mxu1 %v4144_v21 }
 0x346   :  { %3061 = vmatpush2.bf16.msra.mxu0 %v4139_v26 }
 0x347   :  { %3102 = vmatpush2.bf16.msra.mxu1 %v4142_v28  ;;  %3062 = vmatprep.subr.bf16.mxu0 %v4147_v29 }
 0x348   :  { %3103 = vmatprep.subr.bf16.mxu1 %v4150_v30 }
 0x34a   :  { %3063 = vmatpush2.bf16.msra.mxu0 %v4145_v31 }
 0x34b   :  { %3104 = vmatpush2.bf16.msra.mxu1 %v4148_v32  ;;  %3114 = vmatprep.subr.bf16.mxu0 %v4153_v33 }
 0x34d   :  { %3065 = vmatmul.mubr.bf16.vlgmr.msra.gmra.mxu0 %v4496_v27 }
 0x34e   :  { %3106 = vmatmul.mubr.bf16.vlgmr.msra.gmra.mxu1 %v4485_v36  ;;  %3115 = vmatpush1.bf16.msra.mxu0 %v4151_v35  ;;  %v4166_v36 = vld [vmem:[#allocation11 + $0x370] ss:$24 sps:$4 sm:$0xff]  }
 0x34f   :  { %3146 = vmatprep.mubr.bf16.mxu0 %v4494_v24  ;;  %3116 = vmatprep.subr.bf16.mxu0 %v4156_v37  ;;  %v4169_v24 = vld [vmem:[#allocation11 + $0x340] ss:$24 sps:$4 sm:$0xff]  }
 0x352   :  { %3117 = vmatpush1.bf16.msra.mxu0 %v4154_v38 }
 0x353   :  { %3118 = vmatprep.subr.bf16.mxu0 %v4159_v39 }
 0x356   :  { %3119 = vmatpush1.bf16.msra.mxu0 %v4157_v40 }
 0x357   :  { %3120 = vmatprep.subr.bf16.mxu0 %v4162_v42 }
 0x35a   :  { %3121 = vmatpush1.bf16.msra.mxu0 %v4160_v44 }
 0x35b   :  { %3122 = vmatprep.subr.bf16.mxu0 %v4165_v45  ;;  %v1938_v45 = vrot.slane %v1917_v8, %v1937_v41 }
 0x35e   :  { %3123 = vmatpush1.bf16.msra.mxu0 %v4163_v34  ;;  %v1942_v34 = vrot.slane %v1917_v8, %v1941_v43 }
 0x35f   :  { %3124 = vmatprep.subr.bf16.mxu0 %v4168_v46 }
 0x362   :  { %3125 = vmatpush1.bf16.msra.mxu0 %v4166_v36 }
 0x363   :  { %3126 = vmatprep.subr.bf16.mxu0 %v4171_v47 }
 0x366   :  { %3127 = vmatpush1.bf16.msra.mxu0 %v4169_v24 }
 0x367   :  { %3128 = vmatprep.subr.bf16.mxu0 %v4174_v48 }
 0x36a   :  { %3129 = vmatpush1.bf16.msra.mxu0 %v4172_v49 }
 0x36b   :  { %3130 = vmatprep.subr.bf16.mxu0 %v4177_v50 }
 0x36e   :  { %3131 = vmatpush2.bf16.msra.mxu0 %v4175_v51 }
 0x36f   :  { %3132 = vmatprep.subr.bf16.mxu0 %v4180_v52 }
 0x372   :  { %3133 = vmatpush2.bf16.msra.mxu0 %v4178_v53 }
 0x373   :  { %3134 = vmatprep.subr.bf16.mxu0 %v4183_v54 }
 0x376   :  { %3135 = vmatpush2.bf16.msra.mxu0 %v4181_v55 }
 0x377   :  { %3136 = vmatprep.subr.bf16.mxu0 %v4186_v56 }
 0x37a   :  { %3137 = vmatpush2.bf16.msra.mxu0 %v4184_v57 }
 0x37b   :  { %3138 = vmatprep.subr.bf16.mxu0 %v4189_v58 }
 0x37e   :  { %3139 = vmatpush2.bf16.msra.mxu0 %v4187_v59 }
 0x37f   :  { %3140 = vmatprep.subr.bf16.mxu0 %v4192_v60 }
 0x382   :  { %3141 = vmatpush2.bf16.msra.mxu0 %v4190_v61 }
 0x383   :  { %3142 = vmatprep.subr.bf16.mxu0 %v4195_v62 }
 0x386   :  { %3143 = vmatpush2.bf16.msra.mxu0 %v4193_v63 }
 0x387   :  { %3144 = vmatprep.subr.bf16.mxu0 %v4198_v0 }
 0x38a   :  { %3145 = vmatpush2.bf16.msra.mxu0 %v4196_v1 }
 0x38d   :  { %3147 = vmatmul.mubr.bf16.vlgmr.msra.gmra.mxu0 %v4496_v27  ;;  %v2943_v2 = vpop.f32.mrf.mxu1 }
 0x38e   :  { %v2944_v11 = vadd.f32 %v2943_v2, %v1922_v9 }
 0x38f   :  { %v2945_v3 = vpop.f32.mrf.mxu1 }
 0x390   :  { %v2946_v14 = vadd.f32 %v2945_v3, %v1926_v10 }
 0x391   :  { %v2947_v6 = vpop.f32.mrf.mxu1 }
 0x393   :  { %v2948_v7 = vpop.f32.mrf.mxu1 }
 0x3cd   :  { %v2984_v12 = vpop.f32.mrf.mxu0  ;;  %v3025_v13 = vpop.f32.mrf.mxu1 }
 0x3ce   :  { %v2985_v15 = vadd.f32 %v2984_v12, %v2944_v11  ;;  %v3026_v26 = vadd.f32 %v3025_v13, %v1930_v23 }
 0x3cf   :  { %v2986_v17 = vpop.f32.mrf.mxu0  ;;  %v3027_v18 = vpop.f32.mrf.mxu1 }
 0x3d0   :  { %4199 = vtanh.f32 %v2985_v15  ;;  %v2987_v27 = vadd.f32 %v2986_v17, %v2946_v14  ;;  %v3028_v29 = vadd.f32 %v3027_v18, %v1934_v25 }
 0x3d1   :  { %v2988_v19 = vpop.f32.mrf.mxu0  ;;  %v3029_v4 = vpop.f32.mrf.mxu1 }
 0x3d2   :  { %4201 = vtanh.f32 %v2987_v27 }
 0x3d3   :  { %v2989_v20 = vpop.f32.mrf.mxu0  ;;  %v3030_v5 = vpop.f32.mrf.mxu1 }
 0x3dd   :  { %v4200_v16 = vpop.eup %4199 }
 0x3de   :  { %3161 = vst [vmem:[#allocation13] sm:$0xff] %v4200_v16 }
 0x3df   :  { %v4202_v21 = vpop.eup %4201 }
 0x3e0   :  { %3162 = vst [vmem:[#allocation13 + $0x8] sm:$0xff] %v4202_v21 }
 0x40d   :  { %v3066_v28 = vpop.f32.mrf.mxu0 }
 0x40e   :  { %v3067_v30 = vadd.f32 %v3066_v28, %v3026_v26  ;;  %v3107_v31 = vpop.f32.mrf.mxu1 }
 0x40f   :  { %v3068_v32 = vpop.f32.mrf.mxu0  ;;  %v3108_v46 = vadd.f32 %v3107_v31, %v1938_v45 }
 0x410   :  { %4203 = vtanh.f32 %v3067_v30  ;;  %v3069_v33 = vadd.f32 %v3068_v32, %v3028_v29  ;;  %v3109_v35 = vpop.f32.mrf.mxu1 }
 0x411   :  { %v3070_v37 = vpop.f32.mrf.mxu0  ;;  %v3110_v47 = vadd.f32 %v3109_v35, %v1942_v34 }
 0x412   :  { %4205 = vtanh.f32 %v3069_v33  ;;  %v3111_v38 = vpop.f32.mrf.mxu1 }
 0x413   :  { %v3071_v39 = vpop.f32.mrf.mxu0 }
 0x414   :  { %v3112_v40 = vpop.f32.mrf.mxu1 }
 0x41d   :  { %v4204_v42 = vpop.eup %4203 }
 0x41e   :  { %3163 = vst [vmem:[#allocation13 + $0x10] sm:$0xff] %v4204_v42 }
 0x41f   :  { %v4206_v44 = vpop.eup %4205 }
 0x420   :  { %3164 = vst [vmem:[#allocation13 + $0x18] sm:$0xff] %v4206_v44 }
 0x44d   :  { %v3148_v36 = vpop.f32.mrf.mxu0 }
 0x44e   :  { %v3149_v24 = vadd.f32 %v3148_v36, %v3108_v46 }
 0x44f   :  { %v3150_v48 = vpop.f32.mrf.mxu0 }
 0x450   :  { %4207 = vtanh.f32 %v3149_v24  ;;  %v3151_v49 = vadd.f32 %v3150_v48, %v3110_v47 }
 0x451   :  { %v3152_v50 = vpop.f32.mrf.mxu0 }
 0x452   :  { %4209 = vtanh.f32 %v3151_v49 }
 0x453   :  { %v3153_v51 = vpop.f32.mrf.mxu0 }
 0x45d   :  { %v4208_v52 = vpop.eup %4207 }
 0x45e   :  { %3165 = vst [vmem:[#allocation13 + $0x20] sm:$0xff] %v4208_v52 }
 0x45f   :  { %v4210_v53 = vpop.eup %4209 }
 0x460   :  { %3166 = vst [vmem:[#allocation13 + $0x28] sm:$0xff] %v4210_v53 }
 0x461   :  { %4342 = shalt.err (!%p4339_p6)
}
 0x462   :  { %3176 = dma.vmem_to_hbm [thread:$0]  %s3174_s22, 768, %s4528_s9, [#allocation4]  }
 0x463   :  { %4359 = dma.done.wait [#allocation4], 768  }
 0x464   :  { %4360 = vsyncadd [#allocation4], 4294966528 }
 0x465   :  { %3180 = vsyncpa [#allocation3], 1 }
 0x466   :  { %3181 = vsyncpa [#allocation6], 1 }
 0x467   :  { %3182 = vsyncpa [#allocation9], 1 }
 0x468   :  { %3183 = vsyncpa [#allocation12], 1 }
 0x469   :  { %3184 = vsyncpa [#allocation4], 1 }

// kernel: tpu_custom_call.1
= control target key start
LH: loop header
LB: loop body
LE: loop exit
PB: predicated region body
PF: predicated region fallthrough
CT: control target
= control target key end

     0   :  { %14 = vsyncpa [#allocation3], 0  ;;  %s4519_s0 = inlined_call_operand.hbm [shape: f32[8,128], index: 0, kind: input, shape index: {}]   ;;  %s4520_s1 = inlined_call_operand.hbm [shape: bf16[128,256], index: 1, kind: input, shape index: {}]   ;;  %s4521_s2 = inlined_call_operand.vmem [shape: f32[1,256], index: 2, kind: input, shape index: {}]   ;;  %s4522_s3 = inlined_call_operand.hbm [shape: bf16[256,512], index: 3, kind: input, shape index: {}]   ;;  %s4523_s4 = inlined_call_operand.vmem [shape: f32[1,512], index: 4, kind: input, shape index: {}]   ;;  %s4524_s5 = inlined_call_operand.hbm [shape: bf16[512,512], index: 5, kind: input, shape index: {}]   ;;  %s4525_s6 = inlined_call_operand.hbm [shape: f32[1,512], index: 6, kind: input, shape index: {}]   ;;  %s4526_s7 = inlined_call_operand.hbm [shape: bf16[512,768], index: 7, kind: input, shape index: {}]   ;;  %s4527_s8 = inlined_call_operand.vmem [shape: f32[1,768], index: 8, kind: input, shape index: {}]   ;;  %s4528_s9 = inlined_call_operand.hbm [shape: f32[8,768], index: 9, kind: output, shape index: {}]  }
   0x1   :  { %15 = vsyncpa [#allocation6], 0 }
   0x2   :  { %16 = vsyncpa [#allocation9], 0 }
   0x3   :  { %17 = vsyncpa [#allocation12], 0 }
   0x4   :  { %18 = vsyncpa [#allocation4], 0  ;;  %s4361_s30 = smov [#allocation5]  }
   0x5   :  { %s34_s10 = sshll.u32 %s4361_s30, 4  ;;  %s35_s10 = int_to_ptr.vmem [resolvable:$true] %s34_s10 }
   0x6   :  { %s4219_s11 = scalar_lea.vmem %s35_s10, 2048  ;;  %p4224_p1 = scmp.lt.s32.totalorder %s35_s10, %s35_s10 }
   0x7   :  { %p4220_p0 = scmp.ne.s32.totalorder %s35_s10, %s4219_s11  ;;  %p4225_p2 = scmp.lt.s32.totalorder %s4219_s11, %s4219_s11 }
   0x9   :  { %p4226_p3 = por %p4225_p2, %p4224_p1 }
   0xb   :  { %p4227_p4 = pnand %p4226_p3, %p4220_p0 }
   0xd   :  { %4230 = shalt.err (!%p4227_p4)
}
   0xe   :  { %s4362_s12 = smov 128   ;;  %s4363_s13 = smov 8  }
   0xf   :  { %40 = dma.hbm_to_vmem [thread:$0]  %s4520_s1, 2048, %s35_s10, [#allocation6], %s4362_s12, %s4362_s12, %s4363_s13  }
  0x10   :  { %s4364_s16 = smov [#allocation8]   ;;  %s4365_s18 = smov [#allocation2]  }
  0x11   :  { %s62_s17 = sshll.u32 %s4364_s16, 4  ;;  %s25_s19 = sshll.u32 %s4365_s18, 4  ;;  %s63_s17 = int_to_ptr.vmem [resolvable:$true] %s62_s17  ;;  %s26_s19 = int_to_ptr.vmem [resolvable:$true] %s25_s19 }
  0x12   :  { %s4239_s20 = scalar_lea.vmem %s63_s17, 16384  ;;  %p4244_p6 = scmp.lt.s32.totalorder %s63_s17, %s63_s17 }
  0x13   :  { %p4240_p5 = scmp.ne.s32.totalorder %s63_s17, %s4239_s20  ;;  %p4245_p7 = scmp.lt.s32.totalorder %s4239_s20, %s4239_s20 }
  0x15   :  { %p4246_p8 = por %p4245_p7, %p4244_p6 }
  0x17   :  { %p4247_p9 = pnand %p4246_p8, %p4240_p5 }
  0x19   :  { %4250 = shalt.err (!%p4247_p9)
}
  0x1a   :  { %s4366_s21 = smov 256   ;;  %s4367_s22 = smov 16  }
  0x1b   :  { %68 = dma.hbm_to_vmem [thread:$0]  %s4524_s5, 16384, %s63_s17, [#allocation9], %s4366_s21, %s4366_s21, %s4367_s22  }
  0x1c   :  { %s4259_s1 = scalar_lea.vmem %s26_s19, 128  ;;  %p4264_p11 = scmp.lt.s32.totalorder %s26_s19, %s26_s19 }
  0x1d   :  { %p4260_p10 = scmp.ne.s32.totalorder %s26_s19, %s4259_s1  ;;  %p4265_p12 = scmp.lt.s32.totalorder %s4259_s1, %s4259_s1 }
  0x1f   :  { %p4266_p13 = por %p4265_p12, %p4264_p11 }
  0x21   :  { %p4267_p0 = pnand %p4266_p13, %p4260_p10 }
  0x23   :  { %4270 = shalt.err (!%p4267_p0)
}
  0x24   :  { %28 = dma.hbm_to_vmem [thread:$0]  %s4519_s0, 128, %s26_s19, [#allocation3]  }
  0x25   :  { %s4368_s27 = smov [#allocation7]   ;;  %s4369_s29 = smov [#allocation10]  }
  0x26   :  { %s48_s28 = sshll.u32 %s4368_s27, 4  ;;  %s75_s30 = sshll.u32 %s4369_s29, 4  ;;  %s49_s28 = int_to_ptr.vmem [resolvable:$true] %s48_s28  ;;  %s76_s30 = int_to_ptr.vmem [resolvable:$true] %s75_s30 }
  0x27   :  { %s4279_s10 = scalar_lea.vmem %s49_s28, 8192  ;;  %p4284_p2 = scmp.lt.s32.totalorder %s49_s28, %s49_s28 }
  0x28   :  { %p4280_p1 = scmp.ne.s32.totalorder %s49_s28, %s4279_s10  ;;  %p4285_p3 = scmp.lt.s32.totalorder %s4279_s10, %s4279_s10 }
  0x2a   :  { %p4286_p4 = por %p4285_p3, %p4284_p2 }
  0x2c   :  { %p4287_p5 = pnand %p4286_p4, %p4280_p1 }
  0x2e   :  { %4290 = shalt.err (!%p4287_p5)
}
  0x2f   :  { %54 = dma.hbm_to_vmem [thread:$0]  %s4522_s3, 8192, %s49_s28, [#allocation6], %s4366_s21, %s4366_s21, %s4367_s22  }
  0x30   :  { %s4299_s12 = scalar_lea.vmem %s76_s30, 64  ;;  %p4304_p7 = scmp.lt.s32.totalorder %s76_s30, %s76_s30 }
  0x31   :  { %p4300_p6 = scmp.ne.s32.totalorder %s76_s30, %s4299_s12  ;;  %p4305_p8 = scmp.lt.s32.totalorder %s4299_s12, %s4299_s12 }
  0x33   :  { %p4306_p9 = por %p4305_p8, %p4304_p7 }
  0x35   :  { %p4307_p10 = pnand %p4306_p9, %p4300_p6 }
  0x37   :  { %4310 = shalt.err (!%p4307_p10)
}
  0x38   :  { %78 = dma.hbm_to_vmem [thread:$0]  %s4525_s6, 64, %s76_s30, [#allocation9]  }
  0x39   :  { %s4370_s14 = smov [#allocation11]  }
  0x3a   :  { %s84_s15 = sshll.u32 %s4370_s14, 4  ;;  %s85_s15 = int_to_ptr.vmem [resolvable:$true] %s84_s15 }
  0x3b   :  { %s4319_s16 = scalar_lea.vmem %s85_s15, 24576  ;;  %p4324_p12 = scmp.lt.s32.totalorder %s85_s15, %s85_s15 }
  0x3c   :  { %p4320_p11 = scmp.ne.s32.totalorder %s85_s15, %s4319_s16  ;;  %p4325_p13 = scmp.lt.s32.totalorder %s4319_s16, %s4319_s16 }
  0x3e   :  { %p4326_p0 = por %p4325_p13, %p4324_p12 }
  0x40   :  { %p4327_p1 = pnand %p4326_p0, %p4320_p11 }
  0x42   :  { %4330 = shalt.err (!%p4327_p1)
}
  0x43   :  { %s4371_s3 = smov 384   ;;  %s4372_s17 = smov 24  }
  0x44   :  { %90 = dma.hbm_to_vmem [thread:$0]  %s4526_s7, 24576, %s85_s15, [#allocation12], %s4371_s3, %s4371_s3, %s4372_s17  }
  0x45   :  { %4351 = dma.done.wait [#allocation3], 128  }
  0x46   :  { %4352 = vsyncadd [#allocation3], 4294967168 }
  0x47   :  { %4353 = dma.done.wait [#allocation6], 10240  }
  0x48   :  { %4354 = vsyncadd [#allocation6], 4294957056 }
  0x49   :  { %4355 = dma.done.wait [#allocation9], 16448  }
  0x4a   :  { %4356 = vsyncadd [#allocation9], 4294950848 }
  0x4b   :  { %4357 = dma.done.wait [#allocation12], 24576  }
  0x4c   :  { %4358 = vsyncadd [#allocation12], 4294942720  ;;  %v4373_v0 = vmov 0   ;;  %v3599_v1 = vld [vmem:[#allocation5 + $0x74] ss:$8 sps:$4 sm:$0xff]  }
  0x4d   :  { %254 = vmatprep.mubr.bf16.mxu0 %v4373_v0  ;;  %v3601_v2 = vld [vmem:[#allocation5 + $0x70] ss:$8 sps:$4 sm:$0xff]   ;;  %222 = vmatprep.subr.bf16.mxu0 %v3599_v1  ;;  %v3602_v3 = vld [vmem:[#allocation5 + $0x64] ss:$8 sps:$4 sm:$0xff]   ;;  %v3604_v4 = vld [vmem:[#allocation5 + $0x60] ss:$8 sps:$4 sm:$0xff]  }
  0x4e   :  { %223 = vmatpush1.bf16.msra.mxu0 %v3601_v2  ;;  %v3605_v5 = vld [vmem:[#allocation5 + $0x54] ss:$8 sps:$4 sm:$0xff]   ;;  %v3607_v6 = vld [vmem:[#allocation5 + $0x50] ss:$8 sps:$4 sm:$0xff]   ;;  %v3608_v7 = vld [vmem:[#allocation5 + $0x44] ss:$8 sps:$4 sm:$0xff]  }
  0x4f   :  { %224 = vmatprep.subr.bf16.mxu0 %v3602_v3  ;;  %v3610_v8 = vld [vmem:[#allocation5 + $0x40] ss:$8 sps:$4 sm:$0xff]   ;;  %v3623_v9 = vld [vmem:[#allocation7 + $0xe4] ss:$16 sps:$4 sm:$0xff]   ;;  %v3613_v13 = vld [vmem:[#allocation5 + $0x30] ss:$8 sps:$4 sm:$0xff]  }
  0x50   :  { %v3611_v10 = vld [vmem:[#allocation5 + $0x34] ss:$8 sps:$4 sm:$0xff]   ;;  %673 = vmatprep.subr.bf16.mxu1 %v3623_v9  ;;  %v3628_v11 = vld [vmem:[#allocation7 + $0xe0] ss:$16 sps:$4 sm:$0xff]   ;;  %v3614_v14 = vld [vmem:[#allocation5 + $0x24] ss:$8 sps:$4 sm:$0xff]  }
  0x51   :  { %v3629_v12 = vld [vmem:[#allocation7 + $0xc4] ss:$16 sps:$4 sm:$0xff]   ;;  %674 = vmatpush1.bf16.msra.mxu1 %v3628_v11  ;;  %v3634_v15 = vld [vmem:[#allocation7 + $0xc0] ss:$16 sps:$4 sm:$0xff]   ;;  %v112_v26 = vld [vmem:[#allocation2] sm:$0xff] }
  0x52   :  { %225 = vmatpush1.bf16.msra.mxu0 %v3604_v4  ;;  %675 = vmatprep.subr.bf16.mxu1 %v3629_v12  ;;  %v3635_v16 = vld [vmem:[#allocation7 + $0xa4] ss:$16 sps:$4 sm:$0xff]   ;;  %v3616_v17 = vld [vmem:[#allocation5 + $0x20] ss:$8 sps:$4 sm:$0xff]   ;;  %v3619_v21 = vld [vmem:[#allocation5 + $0x10] ss:$8 sps:$4 sm:$0xff]   ;;  %v113_v30 = vpack.c.bf16 %v112_v26, %v112_v26 }
  0x53   :  { %226 = vmatprep.subr.bf16.mxu0 %v3605_v5  ;;  %v3617_v18 = vld [vmem:[#allocation5 + $0x14] ss:$8 sps:$4 sm:$0xff]   ;;  %v3640_v19 = vld [vmem:[#allocation7 + $0xa0] ss:$16 sps:$4 sm:$0xff]   ;;  %v3620_v22 = vld [vmem:[#allocation5 + $0x4] ss:$8 sps:$4 sm:$0xff]  }
  0x54   :  { %v3641_v20 = vld [vmem:[#allocation7 + $0x84] ss:$16 sps:$4 sm:$0xff]   ;;  %v3646_v23 = vld [vmem:[#allocation7 + $0x80] ss:$16 sps:$4 sm:$0xff]   ;;  %v3627_v27 = vld [vmem:[#allocation7 + $0xec] ss:$16 sps:$4 sm:$0xff]  }
  0x55   :  { %676 = vmatpush1.bf16.msra.mxu1 %v3634_v15  ;;  %v3647_v24 = vld [vmem:[#allocation7 + $0x64] ss:$16 sps:$4 sm:$0xff]   ;;  %v3622_v25 = vld [vmem:[#allocation5] ss:$8 sps:$4 sm:$0xff]   ;;  %v3633_v32 = vld [vmem:[#allocation7 + $0xcc] ss:$16 sps:$4 sm:$0xff]  }
  0x56   :  { %227 = vmatpush1.bf16.msra.mxu0 %v3607_v6  ;;  %677 = vmatprep.subr.bf16.mxu1 %v3635_v16  ;;  %v3652_v28 = vld [vmem:[#allocation7 + $0x60] ss:$16 sps:$4 sm:$0xff]   ;;  %v3653_v29 = vld [vmem:[#allocation7 + $0x44] ss:$16 sps:$4 sm:$0xff]   ;;  %v3625_v31 = vld [vmem:[#allocation7 + $0xe8] ss:$16 sps:$4 sm:$0xff]  }
  0x57   :  { %228 = vmatprep.subr.bf16.mxu0 %v3608_v7  ;;  %v3658_v33 = vld [vmem:[#allocation7 + $0x40] ss:$16 sps:$4 sm:$0xff]   ;;  %v3659_v34 = vld [vmem:[#allocation7 + $0x24] ss:$16 sps:$4 sm:$0xff]   ;;  %v3631_v35 = vld [vmem:[#allocation7 + $0xc8] ss:$16 sps:$4 sm:$0xff]  }
  0x58   :  { %v3639_v36 = vld [vmem:[#allocation7 + $0xac] ss:$16 sps:$4 sm:$0xff]   ;;  %v3664_v37 = vld [vmem:[#allocation7 + $0x20] ss:$16 sps:$4 sm:$0xff]   ;;  %v3665_v38 = vld [vmem:[#allocation7 + $0x4] ss:$16 sps:$4 sm:$0xff]  }
  0x59   :  { %678 = vmatpush1.bf16.msra.mxu1 %v3640_v19  ;;  %v3637_v39 = vld [vmem:[#allocation7 + $0xa8] ss:$16 sps:$4 sm:$0xff]   ;;  %v3645_v40 = vld [vmem:[#allocation7 + $0x8c] ss:$16 sps:$4 sm:$0xff]   ;;  %v3670_v41 = vld [vmem:[#allocation7] ss:$16 sps:$4 sm:$0xff]  }
  0x5a   :  { %229 = vmatpush1.bf16.msra.mxu0 %v3610_v8  ;;  %679 = vmatprep.subr.bf16.mxu1 %v3641_v20  ;;  %v3671_v42 = vld [vmem:[#allocation7 + $0x1e4] ss:$16 sps:$4 sm:$0xff]   ;;  %v3643_v43 = vld [vmem:[#allocation7 + $0x88] ss:$16 sps:$4 sm:$0xff]   ;;  %v3651_v44 = vld [vmem:[#allocation7 + $0x6c] ss:$16 sps:$4 sm:$0xff]  }
  0x5b   :  { %230 = vmatprep.subr.bf16.mxu0 %v3611_v10  ;;  %v3676_v45 = vld [vmem:[#allocation7 + $0x1e0] ss:$16 sps:$4 sm:$0xff]   ;;  %v3677_v46 = vld [vmem:[#allocation7 + $0x1c4] ss:$16 sps:$4 sm:$0xff]   ;;  %v3649_v47 = vld [vmem:[#allocation7 + $0x68] ss:$16 sps:$4 sm:$0xff]  }
  0x5c   :  { %v3682_v48 = vld [vmem:[#allocation7 + $0x1c0] ss:$16 sps:$4 sm:$0xff]   ;;  %v3657_v49 = vld [vmem:[#allocation7 + $0x4c] ss:$16 sps:$4 sm:$0xff]   ;;  %v3683_v50 = vld [vmem:[#allocation7 + $0x1a4] ss:$16 sps:$4 sm:$0xff]  }
  0x5d   :  { %680 = vmatpush1.bf16.msra.mxu1 %v3646_v23  ;;  %v3655_v51 = vld [vmem:[#allocation7 + $0x48] ss:$16 sps:$4 sm:$0xff]   ;;  %v3688_v52 = vld [vmem:[#allocation7 + $0x1a0] ss:$16 sps:$4 sm:$0xff]   ;;  %v3663_v53 = vld [vmem:[#allocation7 + $0x2c] ss:$16 sps:$4 sm:$0xff]  }
  0x5e   :  { %231 = vmatpush1.bf16.msra.mxu0 %v3613_v13  ;;  %681 = vmatprep.subr.bf16.mxu1 %v3647_v24  ;;  %v3689_v54 = vld [vmem:[#allocation7 + $0x184] ss:$16 sps:$4 sm:$0xff]   ;;  %v3661_v55 = vld [vmem:[#allocation7 + $0x28] ss:$16 sps:$4 sm:$0xff]   ;;  %v3694_v56 = vld [vmem:[#allocation7 + $0x180] ss:$16 sps:$4 sm:$0xff]  }
  0x5f   :  { %232 = vmatprep.subr.bf16.mxu0 %v3614_v14  ;;  %v3669_v57 = vld [vmem:[#allocation7 + $0xc] ss:$16 sps:$4 sm:$0xff]   ;;  %v3695_v58 = vld [vmem:[#allocation7 + $0x164] ss:$16 sps:$4 sm:$0xff]   ;;  %v3667_v59 = vld [vmem:[#allocation7 + $0x8] ss:$16 sps:$4 sm:$0xff]  }
  0x60   :  { %v3700_v60 = vld [vmem:[#allocation7 + $0x160] ss:$16 sps:$4 sm:$0xff]   ;;  %v3675_v61 = vld [vmem:[#allocation7 + $0x1ec] ss:$16 sps:$4 sm:$0xff]   ;;  %v3701_v62 = vld [vmem:[#allocation7 + $0x144] ss:$16 sps:$4 sm:$0xff]  }
  0x61   :  { %682 = vmatpush1.bf16.msra.mxu1 %v3652_v28  ;;  %v3673_v63 = vld [vmem:[#allocation7 + $0x1e8] ss:$16 sps:$4 sm:$0xff]   ;;  %v3706_v0 = vld [vmem:[#allocation7 + $0x140] ss:$16 sps:$4 sm:$0xff]   ;;  %v3681_v1 = vld [vmem:[#allocation7 + $0x1cc] ss:$16 sps:$4 sm:$0xff]  }
  0x62   :  { %233 = vmatpush1.bf16.msra.mxu0 %v3616_v17  ;;  %683 = vmatprep.subr.bf16.mxu1 %v3653_v29  ;;  %v3679_v2 = vld [vmem:[#allocation7 + $0x1c8] ss:$16 sps:$4 sm:$0xff]   ;;  %v3687_v3 = vld [vmem:[#allocation7 + $0x1ac] ss:$16 sps:$4 sm:$0xff]   ;;  %v3707_v11 = vld [vmem:[#allocation7 + $0x124] ss:$16 sps:$4 sm:$0xff]  }
  0x63   :  { %234 = vmatprep.subr.bf16.mxu0 %v3617_v18  ;;  %v3685_v4 = vld [vmem:[#allocation7 + $0x1a8] ss:$16 sps:$4 sm:$0xff]   ;;  %v3693_v5 = vld [vmem:[#allocation7 + $0x18c] ss:$16 sps:$4 sm:$0xff]   ;;  %v3712_v14 = vld [vmem:[#allocation7 + $0x120] ss:$16 sps:$4 sm:$0xff]  }
  0x64   :  { %v3691_v6 = vld [vmem:[#allocation7 + $0x188] ss:$16 sps:$4 sm:$0xff]   ;;  %v3699_v7 = vld [vmem:[#allocation7 + $0x16c] ss:$16 sps:$4 sm:$0xff]   ;;  %v3713_v15 = vld [vmem:[#allocation7 + $0x104] ss:$16 sps:$4 sm:$0xff]  }
  0x65   :  { %684 = vmatpush1.bf16.msra.mxu1 %v3658_v33  ;;  %v3697_v8 = vld [vmem:[#allocation7 + $0x168] ss:$16 sps:$4 sm:$0xff]   ;;  %v3705_v9 = vld [vmem:[#allocation7 + $0x14c] ss:$16 sps:$4 sm:$0xff]   ;;  %v3718_v18 = vld [vmem:[#allocation7 + $0x100] ss:$16 sps:$4 sm:$0xff]  }
  0x66   :  { %235 = vmatpush1.bf16.msra.mxu0 %v3619_v21  ;;  %685 = vmatprep.subr.bf16.mxu1 %v3659_v34  ;;  %v3703_v10 = vld [vmem:[#allocation7 + $0x148] ss:$16 sps:$4 sm:$0xff]   ;;  %v3711_v12 = vld [vmem:[#allocation7 + $0x12c] ss:$16 sps:$4 sm:$0xff]   ;;  %v3721_v19 = vld [vmem:[#allocation8 + $0xe4] ss:$16 sps:$4 sm:$0xff]   ;;  %v132_v21 = vlaneseq }
  0x67   :  { %236 = vmatprep.subr.bf16.mxu0 %v3620_v22  ;;  %v3709_v13 = vld [vmem:[#allocation7 + $0x128] ss:$16 sps:$4 sm:$0xff]   ;;  %v3717_v16 = vld [vmem:[#allocation7 + $0x10c] ss:$16 sps:$4 sm:$0xff]   ;;  %v3724_v20 = vld [vmem:[#allocation8 + $0x2e4] ss:$16 sps:$4 sm:$0xff]  }
  0x68   :  { %v3715_v17 = vld [vmem:[#allocation7 + $0x108] ss:$16 sps:$4 sm:$0xff]   ;;  %v4443_v22 = vshrl.u32 %v132_v21, 7  ;;  %v3796_v21 = vld [vmem:[#allocation8 + $0x364] ss:$16 sps:$4 sm:$0xff]  }
  0x69   :  { %686 = vmatpush1.bf16.msra.mxu1 %v3664_v37  ;;  %v130_v24 = vld [vmem:[%s4521_s2] sm:$0x3]  ;;  %v3719_v37 = vld [vmem:[#allocation8 + $0xe0] ss:$16 sps:$4 sm:$0xff]  }
  0x6a   :  { %237 = vmatpush1.bf16.msra.mxu0 %v3622_v25  ;;  %687 = vmatprep.subr.bf16.mxu1 %v3665_v38  ;;  %v4446_v23 = vsub.s32 0, %v4443_v22  ;;  %v4452_v25 = vsub.s32 1, %v4443_v22  ;;  %v3722_v38 = vld [vmem:[#allocation8 + $0x2e0] ss:$16 sps:$4 sm:$0xff]  }
  0x6b   :  { %714 = vmatprep.subr.bf16.mxu0 %v3627_v27 }
  0x6c   :  { %v135_v26 = vrot.slane %v130_v24, %v4446_v23  ;;  %v139_v27 = vrot.slane %v130_v24, %v4452_v25  ;;  %v3791_v24 = vld [vmem:[#allocation8 + $0x160] ss:$16 sps:$4 sm:$0xff]  }
  0x6d   :  { %255 = vmatmul.mubr.bf16.vlgmr.msra.gmra.mxu0 %v113_v30  ;;  %688 = vmatpush1.bf16.msra.mxu1 %v3670_v41  ;;  %v3730_v41 = vld [vmem:[#allocation8 + $0x2c4] ss:$16 sps:$4 sm:$0xff]  }
  0x6e   :  { %715 = vmatpush1.bf16.msra.mxu0 %v3625_v31  ;;  %689 = vmatprep.subr.bf16.mxu1 %v3671_v42  ;;  %v3725_v42 = vld [vmem:[#allocation8 + $0xc0] ss:$16 sps:$4 sm:$0xff]  }
  0x6f   :  { %716 = vmatprep.subr.bf16.mxu0 %v3633_v32 }
  0x71   :  { %690 = vmatpush2.bf16.msra.mxu1 %v3676_v45  ;;  %v3736_v45 = vld [vmem:[#allocation8 + $0x2a4] ss:$16 sps:$4 sm:$0xff]  }
  0x72   :  { %717 = vmatpush1.bf16.msra.mxu0 %v3631_v35  ;;  %691 = vmatprep.subr.bf16.mxu1 %v3677_v46  ;;  %v3731_v46 = vld [vmem:[#allocation8 + $0xa0] ss:$16 sps:$4 sm:$0xff]  }
  0x73   :  { %718 = vmatprep.subr.bf16.mxu0 %v3639_v36 }
  0x75   :  { %692 = vmatpush2.bf16.msra.mxu1 %v3682_v48  ;;  %v3739_v48 = vld [vmem:[#allocation8 + $0x84] ss:$16 sps:$4 sm:$0xff]  }
  0x76   :  { %719 = vmatpush1.bf16.msra.mxu0 %v3637_v39  ;;  %693 = vmatprep.subr.bf16.mxu1 %v3683_v50  ;;  %v3737_v50 = vld [vmem:[#allocation8 + $0x80] ss:$16 sps:$4 sm:$0xff]  }
  0x77   :  { %720 = vmatprep.subr.bf16.mxu0 %v3645_v40  ;;  %v3727_v40 = vld [vmem:[#allocation8 + $0xc4] ss:$16 sps:$4 sm:$0xff]  }
  0x79   :  { %694 = vmatpush2.bf16.msra.mxu1 %v3688_v52  ;;  %v3745_v52 = vld [vmem:[#allocation8 + $0x64] ss:$16 sps:$4 sm:$0xff]  }
  0x7a   :  { %721 = vmatpush1.bf16.msra.mxu0 %v3643_v43  ;;  %695 = vmatprep.subr.bf16.mxu1 %v3689_v54  ;;  %v3728_v43 = vld [vmem:[#allocation8 + $0x2c0] ss:$16 sps:$4 sm:$0xff]  }
  0x7b   :  { %722 = vmatprep.subr.bf16.mxu0 %v3651_v44  ;;  %v3733_v44 = vld [vmem:[#allocation8 + $0xa4] ss:$16 sps:$4 sm:$0xff]   ;;  %v3743_v54 = vld [vmem:[#allocation8 + $0x60] ss:$16 sps:$4 sm:$0xff]  }
  0x7d   :  { %696 = vmatpush2.bf16.msra.mxu1 %v3694_v56  ;;  %v3751_v56 = vld [vmem:[#allocation8 + $0x44] ss:$16 sps:$4 sm:$0xff]  }
  0x7e   :  { %723 = vmatpush1.bf16.msra.mxu0 %v3649_v47  ;;  %697 = vmatprep.subr.bf16.mxu1 %v3695_v58  ;;  %v3734_v47 = vld [vmem:[#allocation8 + $0x2a0] ss:$16 sps:$4 sm:$0xff]  }
  0x7f   :  { %724 = vmatprep.subr.bf16.mxu0 %v3657_v49  ;;  %v3742_v49 = vld [vmem:[#allocation8 + $0x284] ss:$16 sps:$4 sm:$0xff]   ;;  %v3749_v58 = vld [vmem:[#allocation8 + $0x40] ss:$16 sps:$4 sm:$0xff]  }
  0x81   :  { %698 = vmatpush2.bf16.msra.mxu1 %v3700_v60  ;;  %v3757_v60 = vld [vmem:[#allocation8 + $0x24] ss:$16 sps:$4 sm:$0xff]  }
  0x82   :  { %725 = vmatpush1.bf16.msra.mxu0 %v3655_v51  ;;  %699 = vmatprep.subr.bf16.mxu1 %v3701_v62  ;;  %v3740_v51 = vld [vmem:[#allocation8 + $0x280] ss:$16 sps:$4 sm:$0xff]  }
  0x83   :  { %726 = vmatprep.subr.bf16.mxu0 %v3663_v53  ;;  %v3748_v53 = vld [vmem:[#allocation8 + $0x264] ss:$16 sps:$4 sm:$0xff]   ;;  %v3755_v62 = vld [vmem:[#allocation8 + $0x20] ss:$16 sps:$4 sm:$0xff]  }
  0x85   :  { %700 = vmatpush2.bf16.msra.mxu1 %v3706_v0  ;;  %v3763_v0 = vld [vmem:[#allocation8 + $0x4] ss:$16 sps:$4 sm:$0xff]  }
  0x86   :  { %727 = vmatpush1.bf16.msra.mxu0 %v3661_v55  ;;  %701 = vmatprep.subr.bf16.mxu1 %v3707_v11  ;;  %v3746_v55 = vld [vmem:[#allocation8 + $0x260] ss:$16 sps:$4 sm:$0xff]  }
  0x87   :  { %728 = vmatprep.subr.bf16.mxu0 %v3669_v57  ;;  %v3754_v57 = vld [vmem:[#allocation8 + $0x244] ss:$16 sps:$4 sm:$0xff]   ;;  %v3776_v11 = vld [vmem:[#allocation8 + $0x3c0] ss:$16 sps:$4 sm:$0xff]  }
  0x89   :  { %702 = vmatpush2.bf16.msra.mxu1 %v3712_v14  ;;  %v3779_v14 = vld [vmem:[#allocation8 + $0x1a0] ss:$16 sps:$4 sm:$0xff]  }
  0x8a   :  { %729 = vmatpush1.bf16.msra.mxu0 %v3667_v59  ;;  %703 = vmatprep.subr.bf16.mxu1 %v3713_v15  ;;  %v3752_v59 = vld [vmem:[#allocation8 + $0x240] ss:$16 sps:$4 sm:$0xff]  }
  0x8b   :  { %730 = vmatprep.subr.bf16.mxu0 %v3675_v61  ;;  %v3760_v61 = vld [vmem:[#allocation8 + $0x224] ss:$16 sps:$4 sm:$0xff]   ;;  %v3782_v15 = vld [vmem:[#allocation8 + $0x3a0] ss:$16 sps:$4 sm:$0xff]  }
  0x8d   :  { %704 = vmatpush2.bf16.msra.mxu1 %v3718_v18  ;;  %v3785_v18 = vld [vmem:[#allocation8 + $0x180] ss:$16 sps:$4 sm:$0xff]  }
  0x8e   :  { %731 = vmatpush2.bf16.msra.mxu0 %v3673_v63  ;;  %1553 = vmatprep.subr.bf16.mxu1 %v3721_v19  ;;  %v3758_v63 = vld [vmem:[#allocation8 + $0x220] ss:$16 sps:$4 sm:$0xff]  }
  0x8f   :  { %732 = vmatprep.subr.bf16.mxu0 %v3681_v1  ;;  %v3766_v1 = vld [vmem:[#allocation8 + $0x204] ss:$16 sps:$4 sm:$0xff]   ;;  %v3788_v19 = vld [vmem:[#allocation8 + $0x380] ss:$16 sps:$4 sm:$0xff]  }
  0x92   :  { %733 = vmatpush2.bf16.msra.mxu0 %v3679_v2  ;;  %v3761_v2 = vld [vmem:[#allocation8] ss:$16 sps:$4 sm:$0xff]  }
  0x93   :  { %734 = vmatprep.subr.bf16.mxu0 %v3687_v3  ;;  %v3764_v3 = vld [vmem:[#allocation8 + $0x200] ss:$16 sps:$4 sm:$0xff]  }
  0x96   :  { %735 = vmatpush2.bf16.msra.mxu0 %v3685_v4  ;;  %v3769_v4 = vld [vmem:[#allocation8 + $0x1e4] ss:$16 sps:$4 sm:$0xff]  }
  0x97   :  { %736 = vmatprep.subr.bf16.mxu0 %v3693_v5  ;;  %v3772_v5 = vld [vmem:[#allocation8 + $0x3e4] ss:$16 sps:$4 sm:$0xff]  }
  0x9a   :  { %737 = vmatpush2.bf16.msra.mxu0 %v3691_v6  ;;  %v3767_v6 = vld [vmem:[#allocation8 + $0x1e0] ss:$16 sps:$4 sm:$0xff]  }
  0x9b   :  { %738 = vmatprep.subr.bf16.mxu0 %v3699_v7  ;;  %v3770_v7 = vld [vmem:[#allocation8 + $0x3e0] ss:$16 sps:$4 sm:$0xff]  }
  0x9e   :  { %739 = vmatpush2.bf16.msra.mxu0 %v3697_v8  ;;  %v3775_v8 = vld [vmem:[#allocation8 + $0x1c4] ss:$16 sps:$4 sm:$0xff]  }
  0x9f   :  { %740 = vmatprep.subr.bf16.mxu0 %v3705_v9  ;;  %v3778_v9 = vld [vmem:[#allocation8 + $0x3c4] ss:$16 sps:$4 sm:$0xff]  }
  0xa2   :  { %741 = vmatpush2.bf16.msra.mxu0 %v3703_v10  ;;  %v3773_v10 = vld [vmem:[#allocation8 + $0x1c0] ss:$16 sps:$4 sm:$0xff]  }
  0xa3   :  { %742 = vmatprep.subr.bf16.mxu0 %v3711_v12  ;;  %v3781_v12 = vld [vmem:[#allocation8 + $0x1a4] ss:$16 sps:$4 sm:$0xff]  }
  0xa6   :  { %743 = vmatpush2.bf16.msra.mxu0 %v3709_v13  ;;  %v3784_v13 = vld [vmem:[#allocation8 + $0x3a4] ss:$16 sps:$4 sm:$0xff]  }
  0xa7   :  { %744 = vmatprep.subr.bf16.mxu0 %v3717_v16  ;;  %v3787_v16 = vld [vmem:[#allocation8 + $0x184] ss:$16 sps:$4 sm:$0xff]  }
  0xaa   :  { %745 = vmatpush2.bf16.msra.mxu0 %v3715_v17  ;;  %v3790_v17 = vld [vmem:[#allocation8 + $0x384] ss:$16 sps:$4 sm:$0xff]  }
  0xab   :  { %1594 = vmatprep.subr.bf16.mxu0 %v3724_v20  ;;  %v3793_v20 = vld [vmem:[#allocation8 + $0x164] ss:$16 sps:$4 sm:$0xff]  }
 0x12d   :  { %v256_v28 = vpop.f32.mrf.mxu0 }
 0x12e   :  { %v257_v29 = vadd.f32 %v256_v28, %v135_v26  ;;  %v3794_v26 = vld [vmem:[#allocation8 + $0x360] ss:$16 sps:$4 sm:$0xff]   ;;  %v3802_v28 = vld [vmem:[#allocation8 + $0x344] ss:$16 sps:$4 sm:$0xff]  }
 0x12f   :  { %v258_v30 = vpop.f32.mrf.mxu0 }
 0x130   :  { %v259_v31 = vadd.f32 %v258_v30, %v139_v27  ;;  %v263_v32 = vmax.f32 %v257_v29, 0.0  ;;  %v3799_v27 = vld [vmem:[#allocation8 + $0x144] ss:$16 sps:$4 sm:$0xff]   ;;  %v3797_v29 = vld [vmem:[#allocation8 + $0x140] ss:$16 sps:$4 sm:$0xff]  }
 0x131   :  { %v260_v33 = vpop.f32.mrf.mxu0  ;;  %v3800_v30 = vld [vmem:[#allocation8 + $0x340] ss:$16 sps:$4 sm:$0xff]  }
 0x132   :  { %v264_v34 = vmax.f32 %v259_v31, 0.0  ;;  %v265_v39 = vpack.c.bf16 %v263_v32, %v263_v32  ;;  %v3805_v31 = vld [vmem:[#allocation8 + $0x124] ss:$16 sps:$4 sm:$0xff]   ;;  %v3803_v33 = vld [vmem:[#allocation8 + $0x120] ss:$16 sps:$4 sm:$0xff]  }
 0x133   :  { %v261_v35 = vpop.f32.mrf.mxu0  ;;  %v3808_v32 = vld [vmem:[#allocation8 + $0x324] ss:$16 sps:$4 sm:$0xff]  }
 0x134   :  { %v266_v36 = vpack.c.bf16 %v264_v34, %v264_v34  ;;  %v3806_v34 = vld [vmem:[#allocation8 + $0x320] ss:$16 sps:$4 sm:$0xff]   ;;  %v3811_v35 = vld [vmem:[#allocation8 + $0x104] ss:$16 sps:$4 sm:$0xff]  }
 0x136   :  { %705 = vmatprep.mubr.bf16.mxu1 %v266_v36  ;;  %746 = vmatprep.mubr.bf16.mxu0 %v266_v36  ;;  %v3814_v36 = vld [vmem:[#allocation8 + $0x304] ss:$16 sps:$4 sm:$0xff]  }
 0x137   :  { %706 = vmatmul.mubr.bf16.vlgmr.msra.gmra.mxu1 %v265_v39  ;;  %747 = vmatmul.mubr.bf16.vlgmr.msra.gmra.mxu0 %v265_v39  ;;  %v3817_v39 = vld [vmem:[#allocation8 + $0xec] ss:$16 sps:$4 sm:$0xff]  }
 0x138   :  { %1554 = vmatpush1.bf16.msra.mxu1 %v3719_v37  ;;  %1595 = vmatpush1.bf16.msra.mxu0 %v3722_v38  ;;  %v3809_v37 = vld [vmem:[#allocation8 + $0x100] ss:$16 sps:$4 sm:$0xff]  }
 0x139   :  { %1555 = vmatprep.subr.bf16.mxu1 %v3727_v40  ;;  %1596 = vmatprep.subr.bf16.mxu0 %v3730_v41  ;;  %v3812_v38 = vld [vmem:[#allocation8 + $0x300] ss:$16 sps:$4 sm:$0xff]   ;;  %v3820_v40 = vld [vmem:[#allocation8 + $0x2ec] ss:$16 sps:$4 sm:$0xff]   ;;  %v4457_v41 = vsub.s32 2, %v4443_v22 }
 0x13c   :  { %1556 = vmatpush1.bf16.msra.mxu1 %v3725_v42  ;;  %1597 = vmatpush1.bf16.msra.mxu0 %v3728_v43  ;;  %v331_v42 = vld [vmem:[%s4523_s4] sm:$0xf]  ;;  %v4463_v43 = vsub.s32 3, %v4443_v22 }
 0x13d   :  { %1557 = vmatprep.subr.bf16.mxu1 %v3733_v44  ;;  %1598 = vmatprep.subr.bf16.mxu0 %v3736_v45  ;;  %v336_v44 = vrot.slane %v331_v42, %v4446_v23  ;;  %v344_v45 = vrot.slane %v331_v42, %v4457_v41 }
 0x140   :  { %1558 = vmatpush1.bf16.msra.mxu1 %v3731_v46  ;;  %1599 = vmatpush1.bf16.msra.mxu0 %v3734_v47  ;;  %v340_v46 = vrot.slane %v331_v42, %v4452_v25  ;;  %v348_v47 = vrot.slane %v331_v42, %v4463_v43  ;;  %v3871_v42 = vld [vmem:[#allocation8 + $0x1cc] ss:$16 sps:$4 sm:$0xff]  }
 0x141   :  { %1559 = vmatprep.subr.bf16.mxu1 %v3739_v48  ;;  %1600 = vmatprep.subr.bf16.mxu0 %v3742_v49 }
 0x144   :  { %1560 = vmatpush1.bf16.msra.mxu1 %v3737_v50  ;;  %1601 = vmatpush1.bf16.msra.mxu0 %v3740_v51 }
 0x145   :  { %1561 = vmatprep.subr.bf16.mxu1 %v3745_v52  ;;  %1602 = vmatprep.subr.bf16.mxu0 %v3748_v53 }
 0x148   :  { %1562 = vmatpush1.bf16.msra.mxu1 %v3743_v54  ;;  %1603 = vmatpush1.bf16.msra.mxu0 %v3746_v55 }
 0x149   :  { %1563 = vmatprep.subr.bf16.mxu1 %v3751_v56  ;;  %1604 = vmatprep.subr.bf16.mxu0 %v3754_v57 }
 0x14c   :  { %1564 = vmatpush1.bf16.msra.mxu1 %v3749_v58  ;;  %1605 = vmatpush1.bf16.msra.mxu0 %v3752_v59 }
 0x14d   :  { %1565 = vmatprep.subr.bf16.mxu1 %v3757_v60  ;;  %1606 = vmatprep.subr.bf16.mxu0 %v3760_v61 }
 0x150   :  { %1566 = vmatpush1.bf16.msra.mxu1 %v3755_v62  ;;  %1607 = vmatpush1.bf16.msra.mxu0 %v3758_v63 }
 0x151   :  { %1567 = vmatprep.subr.bf16.mxu1 %v3763_v0  ;;  %1608 = vmatprep.subr.bf16.mxu0 %v3766_v1 }
 0x154   :  { %1568 = vmatpush1.bf16.msra.mxu1 %v3761_v2  ;;  %1609 = vmatpush1.bf16.msra.mxu0 %v3764_v3  ;;  %v3815_v2 = vld [vmem:[#allocation8 + $0xe8] ss:$16 sps:$4 sm:$0xff]  }
 0x155   :  { %1569 = vmatprep.subr.bf16.mxu1 %v3769_v4  ;;  %1610 = vmatprep.subr.bf16.mxu0 %v3772_v5  ;;  %v3818_v3 = vld [vmem:[#allocation8 + $0x2e8] ss:$16 sps:$4 sm:$0xff]  }
 0x158   :  { %1570 = vmatpush2.bf16.msra.mxu1 %v3767_v6  ;;  %1611 = vmatpush2.bf16.msra.mxu0 %v3770_v7  ;;  %v3823_v6 = vld [vmem:[#allocation8 + $0xcc] ss:$16 sps:$4 sm:$0xff]  }
 0x159   :  { %1571 = vmatprep.subr.bf16.mxu1 %v3775_v8  ;;  %1612 = vmatprep.subr.bf16.mxu0 %v3778_v9  ;;  %v3826_v7 = vld [vmem:[#allocation8 + $0x2cc] ss:$16 sps:$4 sm:$0xff]   ;;  %v3821_v8 = vld [vmem:[#allocation8 + $0xc8] ss:$16 sps:$4 sm:$0xff]  }
 0x15a   :  { %v3824_v9 = vld [vmem:[#allocation8 + $0x2c8] ss:$16 sps:$4 sm:$0xff]  }
 0x15c   :  { %1572 = vmatpush2.bf16.msra.mxu1 %v3773_v10  ;;  %1613 = vmatpush2.bf16.msra.mxu0 %v3776_v11  ;;  %v3829_v10 = vld [vmem:[#allocation8 + $0xac] ss:$16 sps:$4 sm:$0xff]  }
 0x15d   :  { %1573 = vmatprep.subr.bf16.mxu1 %v3781_v12  ;;  %1614 = vmatprep.subr.bf16.mxu0 %v3784_v13  ;;  %v3832_v11 = vld [vmem:[#allocation8 + $0x2ac] ss:$16 sps:$4 sm:$0xff]   ;;  %v3827_v12 = vld [vmem:[#allocation8 + $0xa8] ss:$16 sps:$4 sm:$0xff]  }
 0x15e   :  { %v3830_v13 = vld [vmem:[#allocation8 + $0x2a8] ss:$16 sps:$4 sm:$0xff]  }
 0x160   :  { %1574 = vmatpush2.bf16.msra.mxu1 %v3779_v14  ;;  %1615 = vmatpush2.bf16.msra.mxu0 %v3782_v15  ;;  %v3835_v14 = vld [vmem:[#allocation8 + $0x8c] ss:$16 sps:$4 sm:$0xff]  }
 0x161   :  { %1575 = vmatprep.subr.bf16.mxu1 %v3787_v16  ;;  %1616 = vmatprep.subr.bf16.mxu0 %v3790_v17  ;;  %v3838_v15 = vld [vmem:[#allocation8 + $0x28c] ss:$16 sps:$4 sm:$0xff]   ;;  %v3833_v16 = vld [vmem:[#allocation8 + $0x88] ss:$16 sps:$4 sm:$0xff]  }
 0x162   :  { %v3836_v17 = vld [vmem:[#allocation8 + $0x288] ss:$16 sps:$4 sm:$0xff]  }
 0x164   :  { %1576 = vmatpush2.bf16.msra.mxu1 %v3785_v18  ;;  %1617 = vmatpush2.bf16.msra.mxu0 %v3788_v19  ;;  %v3841_v18 = vld [vmem:[#allocation8 + $0x6c] ss:$16 sps:$4 sm:$0xff]  }
 0x165   :  { %1577 = vmatprep.subr.bf16.mxu1 %v3793_v20  ;;  %1618 = vmatprep.subr.bf16.mxu0 %v3796_v21  ;;  %v3844_v19 = vld [vmem:[#allocation8 + $0x26c] ss:$16 sps:$4 sm:$0xff]   ;;  %v3839_v20 = vld [vmem:[#allocation8 + $0x68] ss:$16 sps:$4 sm:$0xff]  }
 0x166   :  { %v3842_v21 = vld [vmem:[#allocation8 + $0x268] ss:$16 sps:$4 sm:$0xff]  }
 0x168   :  { %1578 = vmatpush2.bf16.msra.mxu1 %v3791_v24  ;;  %1619 = vmatpush2.bf16.msra.mxu0 %v3794_v26  ;;  %v3847_v24 = vld [vmem:[#allocation8 + $0x4c] ss:$16 sps:$4 sm:$0xff]  }
 0x169   :  { %1579 = vmatprep.subr.bf16.mxu1 %v3799_v27  ;;  %1620 = vmatprep.subr.bf16.mxu0 %v3802_v28  ;;  %v3850_v26 = vld [vmem:[#allocation8 + $0x24c] ss:$16 sps:$4 sm:$0xff]   ;;  %v3845_v27 = vld [vmem:[#allocation8 + $0x48] ss:$16 sps:$4 sm:$0xff]  }
 0x16a   :  { %v3848_v28 = vld [vmem:[#allocation8 + $0x248] ss:$16 sps:$4 sm:$0xff]  }
 0x16c   :  { %1580 = vmatpush2.bf16.msra.mxu1 %v3797_v29  ;;  %1621 = vmatpush2.bf16.msra.mxu0 %v3800_v30  ;;  %v3853_v29 = vld [vmem:[#allocation8 + $0x2c] ss:$16 sps:$4 sm:$0xff]  }
 0x16d   :  { %1581 = vmatprep.subr.bf16.mxu1 %v3805_v31  ;;  %1622 = vmatprep.subr.bf16.mxu0 %v3808_v32  ;;  %v3856_v30 = vld [vmem:[#allocation8 + $0x22c] ss:$16 sps:$4 sm:$0xff]   ;;  %v3851_v31 = vld [vmem:[#allocation8 + $0x28] ss:$16 sps:$4 sm:$0xff]  }
 0x16e   :  { %v3854_v32 = vld [vmem:[#allocation8 + $0x228] ss:$16 sps:$4 sm:$0xff]  }
 0x170   :  { %1582 = vmatpush2.bf16.msra.mxu1 %v3803_v33  ;;  %1623 = vmatpush2.bf16.msra.mxu0 %v3806_v34  ;;  %v3859_v33 = vld [vmem:[#allocation8 + $0xc] ss:$16 sps:$4 sm:$0xff]  }
 0x171   :  { %1583 = vmatprep.subr.bf16.mxu1 %v3811_v35  ;;  %1624 = vmatprep.subr.bf16.mxu0 %v3814_v36  ;;  %v3862_v34 = vld [vmem:[#allocation8 + $0x20c] ss:$16 sps:$4 sm:$0xff]   ;;  %v3857_v35 = vld [vmem:[#allocation8 + $0x8] ss:$16 sps:$4 sm:$0xff]  }
 0x172   :  { %v3860_v36 = vld [vmem:[#allocation8 + $0x208] ss:$16 sps:$4 sm:$0xff]  }
 0x174   :  { %1584 = vmatpush2.bf16.msra.mxu1 %v3809_v37  ;;  %1625 = vmatpush2.bf16.msra.mxu0 %v3812_v38  ;;  %v3865_v37 = vld [vmem:[#allocation8 + $0x1ec] ss:$16 sps:$4 sm:$0xff]  }
 0x175   :  { %1635 = vmatprep.subr.bf16.mxu1 %v3817_v39  ;;  %1676 = vmatprep.subr.bf16.mxu0 %v3820_v40  ;;  %v3868_v38 = vld [vmem:[#allocation8 + $0x3ec] ss:$16 sps:$4 sm:$0xff]   ;;  %v3863_v39 = vld [vmem:[#allocation8 + $0x1e8] ss:$16 sps:$4 sm:$0xff]  }
 0x176   :  { %v3866_v40 = vld [vmem:[#allocation8 + $0x3e8] ss:$16 sps:$4 sm:$0xff]  }
 0x1f7   :  { %v707_v48 = vpop.f32.mrf.mxu1  ;;  %v748_v49 = vpop.f32.mrf.mxu0 }
 0x1f8   :  { %v708_v50 = vadd.f32 %v707_v48, %v336_v44  ;;  %v749_v51 = vadd.f32 %v748_v49, %v344_v45  ;;  %v3874_v44 = vld [vmem:[#allocation8 + $0x3cc] ss:$16 sps:$4 sm:$0xff]   ;;  %v3869_v45 = vld [vmem:[#allocation8 + $0x1c8] ss:$16 sps:$4 sm:$0xff]  }
 0x1f9   :  { %v709_v52 = vpop.f32.mrf.mxu1  ;;  %v750_v53 = vpop.f32.mrf.mxu0  ;;  %v3880_v48 = vld [vmem:[#allocation8 + $0x3ac] ss:$16 sps:$4 sm:$0xff]   ;;  %v3875_v49 = vld [vmem:[#allocation8 + $0x1a8] ss:$16 sps:$4 sm:$0xff]  }
 0x1fa   :  { %v710_v54 = vadd.f32 %v709_v52, %v340_v46  ;;  %v751_v55 = vadd.f32 %v750_v53, %v348_v47  ;;  %v755_v56 = vmax.f32 %v708_v50, 0.0  ;;  %v757_v57 = vmax.f32 %v749_v51, 0.0  ;;  %v3872_v46 = vld [vmem:[#allocation8 + $0x3c8] ss:$16 sps:$4 sm:$0xff]   ;;  %v3877_v47 = vld [vmem:[#allocation8 + $0x1ac] ss:$16 sps:$4 sm:$0xff]  }
 0x1fb   :  { %v711_v58 = vpop.f32.mrf.mxu1  ;;  %v752_v59 = vpop.f32.mrf.mxu0  ;;  %v3878_v50 = vld [vmem:[#allocation8 + $0x3a8] ss:$16 sps:$4 sm:$0xff]   ;;  %v3883_v51 = vld [vmem:[#allocation8 + $0x18c] ss:$16 sps:$4 sm:$0xff]  }
 0x1fc   :  { %v756_v60 = vmax.f32 %v710_v54, 0.0  ;;  %v758_v61 = vmax.f32 %v751_v55, 0.0  ;;  %v4469_v4 = vpack.c.bf16 %v755_v56, %v755_v56  ;;  %v4471_v5 = vpack.c.bf16 %v757_v57, %v757_v57  ;;  %v3886_v52 = vld [vmem:[#allocation8 + $0x38c] ss:$16 sps:$4 sm:$0xff]   ;;  %v3881_v53 = vld [vmem:[#allocation8 + $0x188] ss:$16 sps:$4 sm:$0xff]  }
 0x1fd   :  { %v712_v62 = vpop.f32.mrf.mxu1  ;;  %v753_v63 = vpop.f32.mrf.mxu0  ;;  %v3884_v54 = vld [vmem:[#allocation8 + $0x388] ss:$16 sps:$4 sm:$0xff]   ;;  %v3889_v55 = vld [vmem:[#allocation8 + $0x16c] ss:$16 sps:$4 sm:$0xff]  }
 0x1fe   :  { %v760_v0 = vpack.c.bf16 %v756_v60, %v756_v60  ;;  %v762_v1 = vpack.c.bf16 %v758_v61, %v758_v61  ;;  %v3892_v56 = vld [vmem:[#allocation8 + $0x36c] ss:$16 sps:$4 sm:$0xff]   ;;  %v3887_v57 = vld [vmem:[#allocation8 + $0x168] ss:$16 sps:$4 sm:$0xff]  }
 0x1ff   :  { %v3890_v58 = vld [vmem:[#allocation8 + $0x368] ss:$16 sps:$4 sm:$0xff]   ;;  %v3895_v59 = vld [vmem:[#allocation8 + $0x14c] ss:$16 sps:$4 sm:$0xff]  }
 0x200   :  { %1585 = vmatprep.mubr.bf16.mxu1 %v760_v0  ;;  %1626 = vmatprep.mubr.bf16.mxu0 %v762_v1  ;;  %v3898_v60 = vld [vmem:[#allocation8 + $0x34c] ss:$16 sps:$4 sm:$0xff]   ;;  %v3893_v61 = vld [vmem:[#allocation8 + $0x148] ss:$16 sps:$4 sm:$0xff]  }
 0x201   :  { %1586 = vmatmul.mubr.bf16.vlgmr.msra.gmra.mxu1 %v4469_v4  ;;  %1627 = vmatmul.mubr.bf16.vlgmr.msra.gmra.mxu0 %v4471_v5  ;;  %v3896_v62 = vld [vmem:[#allocation8 + $0x348] ss:$16 sps:$4 sm:$0xff]   ;;  %v3901_v63 = vld [vmem:[#allocation8 + $0x12c] ss:$16 sps:$4 sm:$0xff]  }
 0x202   :  { %1636 = vmatpush1.bf16.msra.mxu1 %v3815_v2  ;;  %1677 = vmatpush1.bf16.msra.mxu0 %v3818_v3  ;;  %v3902_v2 = vld [vmem:[#allocation8 + $0x328] ss:$16 sps:$4 sm:$0xff]   ;;  %v3907_v3 = vld [vmem:[#allocation8 + $0x10c] ss:$16 sps:$4 sm:$0xff]  }
 0x203   :  { %1667 = vmatprep.mubr.bf16.mxu1 %v760_v0  ;;  %1708 = vmatprep.mubr.bf16.mxu0 %v762_v1  ;;  %v3904_v0 = vld [vmem:[#allocation8 + $0x32c] ss:$16 sps:$4 sm:$0xff]   ;;  %v3899_v1 = vld [vmem:[#allocation8 + $0x128] ss:$16 sps:$4 sm:$0xff]  }
 0x204   :  { %1637 = vmatprep.subr.bf16.mxu1 %v3823_v6  ;;  %1678 = vmatprep.subr.bf16.mxu0 %v3826_v7  ;;  %v3910_v6 = vld [vmem:[#allocation8 + $0x30c] ss:$16 sps:$4 sm:$0xff]   ;;  %v3905_v7 = vld [vmem:[#allocation8 + $0x108] ss:$16 sps:$4 sm:$0xff]  }
 0x206   :  { %1638 = vmatpush1.bf16.msra.mxu1 %v3821_v8  ;;  %1679 = vmatpush1.bf16.msra.mxu0 %v3824_v9  ;;  %v3908_v8 = vld [vmem:[#allocation8 + $0x308] ss:$16 sps:$4 sm:$0xff]  }
 0x207   :  { %1639 = vmatprep.subr.bf16.mxu1 %v3829_v10  ;;  %1680 = vmatprep.subr.bf16.mxu0 %v3832_v11  ;;  %v3913_v9 = vld [vmem:[#allocation11 + $0x154] ss:$24 sps:$4 sm:$0xff]   ;;  %v3911_v10 = vld [vmem:[#allocation11 + $0x150] ss:$24 sps:$4 sm:$0xff]   ;;  %v3916_v11 = vld [vmem:[#allocation11 + $0x124] ss:$24 sps:$4 sm:$0xff]  }
 0x20a   :  { %1640 = vmatpush1.bf16.msra.mxu1 %v3827_v12  ;;  %1681 = vmatpush1.bf16.msra.mxu0 %v3830_v13  ;;  %v3914_v12 = vld [vmem:[#allocation11 + $0x120] ss:$24 sps:$4 sm:$0xff]   ;;  %v3919_v13 = vld [vmem:[#allocation11 + $0xf4] ss:$24 sps:$4 sm:$0xff]  }
 0x20b   :  { %1641 = vmatprep.subr.bf16.mxu1 %v3835_v14  ;;  %1682 = vmatprep.subr.bf16.mxu0 %v3838_v15  ;;  %v3917_v14 = vld [vmem:[#allocation11 + $0xf0] ss:$24 sps:$4 sm:$0xff]   ;;  %v3922_v15 = vld [vmem:[#allocation11 + $0xc4] ss:$24 sps:$4 sm:$0xff]  }
 0x20e   :  { %1642 = vmatpush1.bf16.msra.mxu1 %v3833_v16  ;;  %1683 = vmatpush1.bf16.msra.mxu0 %v3836_v17  ;;  %v3920_v16 = vld [vmem:[#allocation11 + $0xc0] ss:$24 sps:$4 sm:$0xff]   ;;  %v3959_v17 = vld [vmem:[#allocation11 + $0x450] ss:$24 sps:$4 sm:$0xff]  }
 0x20f   :  { %1643 = vmatprep.subr.bf16.mxu1 %v3841_v18  ;;  %1684 = vmatprep.subr.bf16.mxu0 %v3844_v19  ;;  %v3961_v18 = vld [vmem:[#allocation11 + $0x454] ss:$24 sps:$4 sm:$0xff]  }
 0x210   :  { %v3925_v19 = vld [vmem:[#allocation11 + $0x94] ss:$24 sps:$4 sm:$0xff]  }
 0x212   :  { %1644 = vmatpush1.bf16.msra.mxu1 %v3839_v20  ;;  %1685 = vmatpush1.bf16.msra.mxu0 %v3842_v21  ;;  %v3965_v20 = vld [vmem:[#allocation11 + $0x420] ss:$24 sps:$4 sm:$0xff]   ;;  %v3928_v21 = vld [vmem:[#allocation11 + $0x64] ss:$24 sps:$4 sm:$0xff]  }
 0x213   :  { %1645 = vmatprep.subr.bf16.mxu1 %v3847_v24  ;;  %1686 = vmatprep.subr.bf16.mxu0 %v3850_v26  ;;  %v3926_v24 = vld [vmem:[#allocation11 + $0x60] ss:$24 sps:$4 sm:$0xff]   ;;  %v3971_v26 = vld [vmem:[#allocation11 + $0x3f0] ss:$24 sps:$4 sm:$0xff]  }
 0x216   :  { %1646 = vmatpush1.bf16.msra.mxu1 %v3845_v27  ;;  %1687 = vmatpush1.bf16.msra.mxu0 %v3848_v28  ;;  %v3973_v27 = vld [vmem:[#allocation11 + $0x3f4] ss:$24 sps:$4 sm:$0xff]  }
 0x217   :  { %1647 = vmatprep.subr.bf16.mxu1 %v3853_v29  ;;  %1688 = vmatprep.subr.bf16.mxu0 %v3856_v30  ;;  %v3931_v28 = vld [vmem:[#allocation11 + $0x34] ss:$24 sps:$4 sm:$0xff]   ;;  %v3929_v29 = vld [vmem:[#allocation11 + $0x30] ss:$24 sps:$4 sm:$0xff]   ;;  %v3977_v30 = vld [vmem:[#allocation11 + $0x3c0] ss:$24 sps:$4 sm:$0xff]  }
 0x21a   :  { %1648 = vmatpush1.bf16.msra.mxu1 %v3851_v31  ;;  %1689 = vmatpush1.bf16.msra.mxu0 %v3854_v32  ;;  %v3979_v31 = vld [vmem:[#allocation11 + $0x3c4] ss:$24 sps:$4 sm:$0xff]  }
 0x21b   :  { %1649 = vmatprep.subr.bf16.mxu1 %v3859_v33  ;;  %1690 = vmatprep.subr.bf16.mxu0 %v3862_v34  ;;  %v3934_v32 = vld [vmem:[#allocation11 + $0x4] ss:$24 sps:$4 sm:$0xff]   ;;  %v3932_v33 = vld [vmem:[#allocation11] ss:$24 sps:$4 sm:$0xff]   ;;  %v3983_v34 = vld [vmem:[#allocation11 + $0x390] ss:$24 sps:$4 sm:$0xff]  }
 0x21e   :  { %1650 = vmatpush1.bf16.msra.mxu1 %v3857_v35  ;;  %1691 = vmatpush1.bf16.msra.mxu0 %v3860_v36  ;;  %v3985_v35 = vld [vmem:[#allocation11 + $0x394] ss:$24 sps:$4 sm:$0xff]  }
 0x21f   :  { %1651 = vmatprep.subr.bf16.mxu1 %v3865_v37  ;;  %1692 = vmatprep.subr.bf16.mxu0 %v3868_v38  ;;  %v3937_v36 = vld [vmem:[#allocation11 + $0x2d4] ss:$24 sps:$4 sm:$0xff]   ;;  %v3935_v37 = vld [vmem:[#allocation11 + $0x2d0] ss:$24 sps:$4 sm:$0xff]   ;;  %v3989_v38 = vld [vmem:[#allocation11 + $0x360] ss:$24 sps:$4 sm:$0xff]  }
 0x222   :  { %1652 = vmatpush2.bf16.msra.mxu1 %v3863_v39  ;;  %1693 = vmatpush2.bf16.msra.mxu0 %v3866_v40  ;;  %v3991_v39 = vld [vmem:[#allocation11 + $0x364] ss:$24 sps:$4 sm:$0xff]  }
 0x223   :  { %1653 = vmatprep.subr.bf16.mxu1 %v3871_v42  ;;  %1694 = vmatprep.subr.bf16.mxu0 %v3874_v44  ;;  %v3940_v40 = vld [vmem:[#allocation11 + $0x2a4] ss:$24 sps:$4 sm:$0xff]   ;;  %v3938_v42 = vld [vmem:[#allocation11 + $0x2a0] ss:$24 sps:$4 sm:$0xff]   ;;  %v3995_v44 = vld [vmem:[#allocation11 + $0x330] ss:$24 sps:$4 sm:$0xff]  }
 0x226   :  { %1654 = vmatpush2.bf16.msra.mxu1 %v3869_v45  ;;  %1695 = vmatpush2.bf16.msra.mxu0 %v3872_v46  ;;  %v3997_v45 = vld [vmem:[#allocation11 + $0x334] ss:$24 sps:$4 sm:$0xff]  }
 0x227   :  { %1655 = vmatprep.subr.bf16.mxu1 %v3877_v47  ;;  %1696 = vmatprep.subr.bf16.mxu0 %v3880_v48  ;;  %v3943_v46 = vld [vmem:[#allocation11 + $0x274] ss:$24 sps:$4 sm:$0xff]   ;;  %v3941_v47 = vld [vmem:[#allocation11 + $0x270] ss:$24 sps:$4 sm:$0xff]   ;;  %v4001_v48 = vld [vmem:[#allocation11 + $0x300] ss:$24 sps:$4 sm:$0xff]  }
 0x22a   :  { %1656 = vmatpush2.bf16.msra.mxu1 %v3875_v49  ;;  %1697 = vmatpush2.bf16.msra.mxu0 %v3878_v50  ;;  %v4003_v49 = vld [vmem:[#allocation11 + $0x304] ss:$24 sps:$4 sm:$0xff]  }
 0x22b   :  { %1657 = vmatprep.subr.bf16.mxu1 %v3883_v51  ;;  %1698 = vmatprep.subr.bf16.mxu0 %v3886_v52  ;;  %v3946_v50 = vld [vmem:[#allocation11 + $0x244] ss:$24 sps:$4 sm:$0xff]   ;;  %v3944_v51 = vld [vmem:[#allocation11 + $0x240] ss:$24 sps:$4 sm:$0xff]   ;;  %v4007_v52 = vld [vmem:[#allocation11 + $0x5d0] ss:$24 sps:$4 sm:$0xff]  }
 0x22e   :  { %1658 = vmatpush2.bf16.msra.mxu1 %v3881_v53  ;;  %1699 = vmatpush2.bf16.msra.mxu0 %v3884_v54  ;;  %v4009_v53 = vld [vmem:[#allocation11 + $0x5d4] ss:$24 sps:$4 sm:$0xff]  }
 0x22f   :  { %1659 = vmatprep.subr.bf16.mxu1 %v3889_v55  ;;  %1700 = vmatprep.subr.bf16.mxu0 %v3892_v56  ;;  %v3949_v54 = vld [vmem:[#allocation11 + $0x214] ss:$24 sps:$4 sm:$0xff]   ;;  %v3947_v55 = vld [vmem:[#allocation11 + $0x210] ss:$24 sps:$4 sm:$0xff]   ;;  %v4013_v56 = vld [vmem:[#allocation11 + $0x5a0] ss:$24 sps:$4 sm:$0xff]  }
 0x232   :  { %1660 = vmatpush2.bf16.msra.mxu1 %v3887_v57  ;;  %1701 = vmatpush2.bf16.msra.mxu0 %v3890_v58  ;;  %v4015_v57 = vld [vmem:[#allocation11 + $0x5a4] ss:$24 sps:$4 sm:$0xff]  }
 0x233   :  { %1661 = vmatprep.subr.bf16.mxu1 %v3895_v59  ;;  %1702 = vmatprep.subr.bf16.mxu0 %v3898_v60  ;;  %v3952_v58 = vld [vmem:[#allocation11 + $0x1e4] ss:$24 sps:$4 sm:$0xff]   ;;  %v3950_v59 = vld [vmem:[#allocation11 + $0x1e0] ss:$24 sps:$4 sm:$0xff]   ;;  %v4019_v60 = vld [vmem:[#allocation11 + $0x570] ss:$24 sps:$4 sm:$0xff]  }
 0x236   :  { %1662 = vmatpush2.bf16.msra.mxu1 %v3893_v61  ;;  %1703 = vmatpush2.bf16.msra.mxu0 %v3896_v62  ;;  %v4021_v61 = vld [vmem:[#allocation11 + $0x574] ss:$24 sps:$4 sm:$0xff]  }
 0x237   :  { %1663 = vmatprep.subr.bf16.mxu1 %v3901_v63  ;;  %1704 = vmatprep.subr.bf16.mxu0 %v3904_v0  ;;  %v3955_v62 = vld [vmem:[#allocation11 + $0x1b4] ss:$24 sps:$4 sm:$0xff]   ;;  %v3953_v63 = vld [vmem:[#allocation11 + $0x1b0] ss:$24 sps:$4 sm:$0xff]   ;;  %v4025_v0 = vld [vmem:[#allocation11 + $0x540] ss:$24 sps:$4 sm:$0xff]  }
 0x23a   :  { %1664 = vmatpush2.bf16.msra.mxu1 %v3899_v1  ;;  %1705 = vmatpush2.bf16.msra.mxu0 %v3902_v2  ;;  %v4027_v1 = vld [vmem:[#allocation11 + $0x544] ss:$24 sps:$4 sm:$0xff]  }
 0x23b   :  { %1665 = vmatprep.subr.bf16.mxu1 %v3907_v3  ;;  %1706 = vmatprep.subr.bf16.mxu0 %v3910_v6  ;;  %v3958_v2 = vld [vmem:[#allocation11 + $0x184] ss:$24 sps:$4 sm:$0xff]   ;;  %v3956_v3 = vld [vmem:[#allocation11 + $0x180] ss:$24 sps:$4 sm:$0xff]   ;;  %v4031_v6 = vld [vmem:[#allocation11 + $0x510] ss:$24 sps:$4 sm:$0xff]  }
 0x23e   :  { %1666 = vmatpush2.bf16.msra.mxu1 %v3905_v7  ;;  %1707 = vmatpush2.bf16.msra.mxu0 %v3908_v8  ;;  %v4033_v7 = vld [vmem:[#allocation11 + $0x514] ss:$24 sps:$4 sm:$0xff]  }
 0x23f   :  { %2909 = vmatprep.subr.bf16.mxu1 %v3913_v9  ;;  %2950 = vmatprep.subr.bf16.mxu0 %v3961_v18  ;;  %v3964_v8 = vld [vmem:[#allocation11 + $0x15c] ss:$24 sps:$4 sm:$0xff]   ;;  %v4037_v9 = vld [vmem:[#allocation11 + $0x4e0] ss:$24 sps:$4 sm:$0xff]  }
 0x241   :  { %1668 = vmatmul.mubr.bf16.vlgmr.msra.gmra.mxu1 %v4469_v4  ;;  %1709 = vmatmul.mubr.bf16.vlgmr.msra.gmra.mxu0 %v4471_v5  ;;  %v3923_v4 = vld [vmem:[#allocation11 + $0x90] ss:$24 sps:$4 sm:$0xff]   ;;  %v3967_v5 = vld [vmem:[#allocation11 + $0x424] ss:$24 sps:$4 sm:$0xff]  }
 0x242   :  { %2910 = vmatpush1.bf16.msra.mxu1 %v3911_v10  ;;  %2951 = vmatpush1.bf16.msra.mxu0 %v3959_v17  ;;  %v4039_v10 = vld [vmem:[#allocation11 + $0x4e4] ss:$24 sps:$4 sm:$0xff]  }
 0x243   :  { %2911 = vmatprep.subr.bf16.mxu1 %v3916_v11  ;;  %2952 = vmatprep.subr.bf16.mxu0 %v3967_v5  ;;  %v4045_v11 = vld [vmem:[#allocation11 + $0x4b4] ss:$24 sps:$4 sm:$0xff]  }
 0x246   :  { %2912 = vmatpush1.bf16.msra.mxu1 %v3914_v12  ;;  %2953 = vmatpush1.bf16.msra.mxu0 %v3965_v20  ;;  %v4043_v12 = vld [vmem:[#allocation11 + $0x4b0] ss:$24 sps:$4 sm:$0xff]  }
 0x247   :  { %2913 = vmatprep.subr.bf16.mxu1 %v3919_v13  ;;  %2954 = vmatprep.subr.bf16.mxu0 %v3973_v27  ;;  %v4051_v13 = vld [vmem:[#allocation11 + $0x484] ss:$24 sps:$4 sm:$0xff]  }
 0x24a   :  { %2914 = vmatpush1.bf16.msra.mxu1 %v3917_v14  ;;  %2955 = vmatpush1.bf16.msra.mxu0 %v3971_v26  ;;  %v4049_v14 = vld [vmem:[#allocation11 + $0x480] ss:$24 sps:$4 sm:$0xff]  }
 0x24b   :  { %2915 = vmatprep.subr.bf16.mxu1 %v3922_v15  ;;  %2956 = vmatprep.subr.bf16.mxu0 %v3979_v31  ;;  %v4057_v15 = vld [vmem:[#allocation11 + $0x45c] ss:$24 sps:$4 sm:$0xff]  }
 0x24e   :  { %2916 = vmatpush1.bf16.msra.mxu1 %v3920_v16  ;;  %2957 = vmatpush1.bf16.msra.mxu0 %v3977_v30  ;;  %v4477_v16 = vld [vmem:[#allocation10] sm:$0xf] }
 0x24f   :  { %2917 = vmatprep.subr.bf16.mxu1 %v3925_v19  ;;  %2958 = vmatprep.subr.bf16.mxu0 %v3985_v35  ;;  %v896_v17 = vrot.slane %v4477_v16, %v4446_v23  ;;  %v900_v18 = vrot.slane %v4477_v16, %v4452_v25  ;;  %v3962_v35 = vld [vmem:[#allocation11 + $0x158] ss:$24 sps:$4 sm:$0xff]  }
 0x252   :  { %2918 = vmatpush1.bf16.msra.mxu1 %v3923_v4  ;;  %2959 = vmatpush1.bf16.msra.mxu0 %v3983_v34 }
 0x253   :  { %2919 = vmatprep.subr.bf16.mxu1 %v3928_v21  ;;  %2960 = vmatprep.subr.bf16.mxu0 %v3991_v39  ;;  %v3976_v39 = vld [vmem:[#allocation11 + $0xfc] ss:$24 sps:$4 sm:$0xff]  }
 0x256   :  { %2920 = vmatpush1.bf16.msra.mxu1 %v3926_v24  ;;  %2961 = vmatpush1.bf16.msra.mxu0 %v3989_v38  ;;  %v3968_v38 = vld [vmem:[#allocation11 + $0x128] ss:$24 sps:$4 sm:$0xff]  }
 0x257   :  { %2921 = vmatprep.subr.bf16.mxu1 %v3931_v28  ;;  %2962 = vmatprep.subr.bf16.mxu0 %v3997_v45  ;;  %v3988_v45 = vld [vmem:[#allocation11 + $0x9c] ss:$24 sps:$4 sm:$0xff]  }
 0x25a   :  { %2922 = vmatpush1.bf16.msra.mxu1 %v3929_v29  ;;  %2963 = vmatpush1.bf16.msra.mxu0 %v3995_v44  ;;  %v3980_v44 = vld [vmem:[#allocation11 + $0xc8] ss:$24 sps:$4 sm:$0xff]  }
 0x25b   :  { %2923 = vmatprep.subr.bf16.mxu1 %v3934_v32  ;;  %2964 = vmatprep.subr.bf16.mxu0 %v4003_v49  ;;  %v4000_v49 = vld [vmem:[#allocation11 + $0x3c] ss:$24 sps:$4 sm:$0xff]  }
 0x25e   :  { %2924 = vmatpush1.bf16.msra.mxu1 %v3932_v33  ;;  %2965 = vmatpush1.bf16.msra.mxu0 %v4001_v48  ;;  %v3992_v48 = vld [vmem:[#allocation11 + $0x68] ss:$24 sps:$4 sm:$0xff]  }
 0x25f   :  { %2925 = vmatprep.subr.bf16.mxu1 %v3937_v36  ;;  %2966 = vmatprep.subr.bf16.mxu0 %v4009_v53  ;;  %v4012_v53 = vld [vmem:[#allocation11 + $0x2dc] ss:$24 sps:$4 sm:$0xff]  }
 0x262   :  { %2926 = vmatpush2.bf16.msra.mxu1 %v3935_v37  ;;  %2967 = vmatpush2.bf16.msra.mxu0 %v4007_v52  ;;  %v3970_v37 = vld [vmem:[#allocation11 + $0x12c] ss:$24 sps:$4 sm:$0xff]   ;;  %v4004_v52 = vld [vmem:[#allocation11 + $0x8] ss:$24 sps:$4 sm:$0xff]  }
 0x263   :  { %2927 = vmatprep.subr.bf16.mxu1 %v3940_v40  ;;  %2968 = vmatprep.subr.bf16.mxu0 %v4015_v57  ;;  %v3974_v40 = vld [vmem:[#allocation11 + $0xf8] ss:$24 sps:$4 sm:$0xff]   ;;  %v4024_v57 = vld [vmem:[#allocation11 + $0x27c] ss:$24 sps:$4 sm:$0xff]  }
 0x266   :  { %2928 = vmatpush2.bf16.msra.mxu1 %v3938_v42  ;;  %2969 = vmatpush2.bf16.msra.mxu0 %v4013_v56  ;;  %v3982_v42 = vld [vmem:[#allocation11 + $0xcc] ss:$24 sps:$4 sm:$0xff]   ;;  %v4016_v56 = vld [vmem:[#allocation11 + $0x2a8] ss:$24 sps:$4 sm:$0xff]  }
 0x267   :  { %2929 = vmatprep.subr.bf16.mxu1 %v3943_v46  ;;  %2970 = vmatprep.subr.bf16.mxu0 %v4021_v61  ;;  %v3986_v46 = vld [vmem:[#allocation11 + $0x98] ss:$24 sps:$4 sm:$0xff]   ;;  %v4036_v61 = vld [vmem:[#allocation11 + $0x21c] ss:$24 sps:$4 sm:$0xff]  }
 0x26a   :  { %2930 = vmatpush2.bf16.msra.mxu1 %v3941_v47  ;;  %2971 = vmatpush2.bf16.msra.mxu0 %v4019_v60  ;;  %v3994_v47 = vld [vmem:[#allocation11 + $0x6c] ss:$24 sps:$4 sm:$0xff]   ;;  %v4028_v60 = vld [vmem:[#allocation11 + $0x248] ss:$24 sps:$4 sm:$0xff]  }
 0x26b   :  { %2931 = vmatprep.subr.bf16.mxu1 %v3946_v50  ;;  %2972 = vmatprep.subr.bf16.mxu0 %v4027_v1  ;;  %v3998_v50 = vld [vmem:[#allocation11 + $0x38] ss:$24 sps:$4 sm:$0xff]   ;;  %v4040_v1 = vld [vmem:[#allocation11 + $0x1e8] ss:$24 sps:$4 sm:$0xff]  }
 0x26e   :  { %2932 = vmatpush2.bf16.msra.mxu1 %v3944_v51  ;;  %2973 = vmatpush2.bf16.msra.mxu0 %v4025_v0  ;;  %v4006_v51 = vld [vmem:[#allocation11 + $0xc] ss:$24 sps:$4 sm:$0xff]   ;;  %v904_v0 = vrot.slane %v4477_v16, %v4457_v41 }
 0x26f   :  { %2933 = vmatprep.subr.bf16.mxu1 %v3949_v54  ;;  %2974 = vmatprep.subr.bf16.mxu0 %v4033_v7  ;;  %v4010_v54 = vld [vmem:[#allocation11 + $0x2d8] ss:$24 sps:$4 sm:$0xff]  }
 0x272   :  { %2934 = vmatpush2.bf16.msra.mxu1 %v3947_v55  ;;  %2975 = vmatpush2.bf16.msra.mxu0 %v4031_v6  ;;  %v4018_v55 = vld [vmem:[#allocation11 + $0x2ac] ss:$24 sps:$4 sm:$0xff]  }
 0x273   :  { %2935 = vmatprep.subr.bf16.mxu1 %v3952_v58  ;;  %2976 = vmatprep.subr.bf16.mxu0 %v4039_v10  ;;  %v4022_v58 = vld [vmem:[#allocation11 + $0x278] ss:$24 sps:$4 sm:$0xff]  }
 0x276   :  { %2936 = vmatpush2.bf16.msra.mxu1 %v3950_v59  ;;  %2977 = vmatpush2.bf16.msra.mxu0 %v4037_v9  ;;  %v4030_v59 = vld [vmem:[#allocation11 + $0x24c] ss:$24 sps:$4 sm:$0xff]   ;;  %v4046_v9 = vld [vmem:[#allocation11 + $0x1b8] ss:$24 sps:$4 sm:$0xff]  }
 0x277   :  { %2937 = vmatprep.subr.bf16.mxu1 %v3955_v62  ;;  %2978 = vmatprep.subr.bf16.mxu0 %v4045_v11  ;;  %v4034_v62 = vld [vmem:[#allocation11 + $0x218] ss:$24 sps:$4 sm:$0xff]  }
 0x27a   :  { %2938 = vmatpush2.bf16.msra.mxu1 %v3953_v63  ;;  %2979 = vmatpush2.bf16.msra.mxu0 %v4043_v12  ;;  %v4042_v63 = vld [vmem:[#allocation11 + $0x1ec] ss:$24 sps:$4 sm:$0xff]  }
 0x27b   :  { %2939 = vmatprep.subr.bf16.mxu1 %v3958_v2  ;;  %2980 = vmatprep.subr.bf16.mxu0 %v4051_v13  ;;  %v4048_v2 = vld [vmem:[#allocation11 + $0x1bc] ss:$24 sps:$4 sm:$0xff]   ;;  %v4054_v12 = vld [vmem:[#allocation11 + $0x18c] ss:$24 sps:$4 sm:$0xff]  }
 0x27e   :  { %2940 = vmatpush2.bf16.msra.mxu1 %v3956_v3  ;;  %2981 = vmatpush2.bf16.msra.mxu0 %v4049_v14  ;;  %v908_v3 = vrot.slane %v4477_v16, %v4463_v43  ;;  %v4060_v16 = vld [vmem:[#allocation11 + $0x164] ss:$24 sps:$4 sm:$0xff]  }
 0x27f   :  { %2991 = vmatprep.subr.bf16.mxu1 %v3964_v8  ;;  %3032 = vmatprep.subr.bf16.mxu0 %v4057_v15 }
 0x2c1   :  { %v1587_v19 = vpop.f32.mrf.mxu1  ;;  %v1628_v4 = vpop.f32.mrf.mxu0 }
 0x2c2   :  { %v1588_v20 = vadd.f32 %v1587_v19, %v896_v17  ;;  %v4052_v19 = vld [vmem:[#allocation11 + $0x188] ss:$24 sps:$4 sm:$0xff]  }
 0x2c3   :  { %v1589_v5 = vpop.f32.mrf.mxu1  ;;  %v1630_v21 = vpop.f32.mrf.mxu0 }
 0x2c4   :  { %v1629_v24 = vadd.f32 %v1628_v4, %v1588_v20  ;;  %v1590_v26 = vadd.f32 %v1589_v5, %v900_v18 }
 0x2c5   :  { %v1591_v27 = vpop.f32.mrf.mxu1  ;;  %v1632_v28 = vpop.f32.mrf.mxu0 }
 0x2c6   :  { %v1631_v29 = vadd.f32 %v1630_v21, %v1590_v26  ;;  %v1717_v30 = vmax.f32 %v1629_v24, 0.0  ;;  %v4055_v26 = vld [vmem:[#allocation11 + $0x458] ss:$24 sps:$4 sm:$0xff]  }
 0x2c7   :  { %v1592_v31 = vpop.f32.mrf.mxu1  ;;  %v1633_v32 = vpop.f32.mrf.mxu0  ;;  %v4058_v28 = vld [vmem:[#allocation11 + $0x160] ss:$24 sps:$4 sm:$0xff]  }
 0x2c8   :  { %v1718_v33 = vmax.f32 %v1631_v29, 0.0  ;;  %v4485_v36 = vpack.c.bf16 %v1717_v30, %v1717_v30  ;;  %v4063_v29 = vld [vmem:[#allocation11 + $0x42c] ss:$24 sps:$4 sm:$0xff]   ;;  %v4061_v31 = vld [vmem:[#allocation11 + $0x428] ss:$24 sps:$4 sm:$0xff]  }
 0x2c9   :  { %v4066_v30 = vld [vmem:[#allocation11 + $0x134] ss:$24 sps:$4 sm:$0xff]   ;;  %v4064_v32 = vld [vmem:[#allocation11 + $0x130] ss:$24 sps:$4 sm:$0xff]  }
 0x2ca   :  { %v4483_v34 = vpack.c.bf16 %v1718_v33, %v1718_v33  ;;  %v4069_v33 = vld [vmem:[#allocation11 + $0x3fc] ss:$24 sps:$4 sm:$0xff]  }
 0x2cc   :  { %2941 = vmatprep.mubr.bf16.mxu1 %v4483_v34 }
 0x2cd   :  { %2942 = vmatmul.mubr.bf16.vlgmr.msra.gmra.mxu1 %v4485_v36 }
 0x2ce   :  { %2992 = vmatpush1.bf16.msra.mxu1 %v3962_v35  ;;  %3023 = vmatprep.mubr.bf16.mxu1 %v4483_v34  ;;  %v4072_v35 = vld [vmem:[#allocation11 + $0x104] ss:$24 sps:$4 sm:$0xff]  }
 0x2cf   :  { %2993 = vmatprep.subr.bf16.mxu1 %v3970_v37  ;;  %v4067_v37 = vld [vmem:[#allocation11 + $0x3f8] ss:$24 sps:$4 sm:$0xff]  }
 0x2d2   :  { %2994 = vmatpush1.bf16.msra.mxu1 %v3968_v38  ;;  %v4070_v38 = vld [vmem:[#allocation11 + $0x100] ss:$24 sps:$4 sm:$0xff]  }
 0x2d3   :  { %2995 = vmatprep.subr.bf16.mxu1 %v3976_v39  ;;  %v4075_v39 = vld [vmem:[#allocation11 + $0x3cc] ss:$24 sps:$4 sm:$0xff]  }
 0x2d6   :  { %2996 = vmatpush1.bf16.msra.mxu1 %v3974_v40  ;;  %v4078_v40 = vld [vmem:[#allocation11 + $0xd4] ss:$24 sps:$4 sm:$0xff]  }
 0x2d7   :  { %2997 = vmatprep.subr.bf16.mxu1 %v3982_v42  ;;  %v4073_v42 = vld [vmem:[#allocation11 + $0x3c8] ss:$24 sps:$4 sm:$0xff]  }
 0x2da   :  { %2998 = vmatpush1.bf16.msra.mxu1 %v3980_v44  ;;  %v4076_v44 = vld [vmem:[#allocation11 + $0xd0] ss:$24 sps:$4 sm:$0xff]  }
 0x2db   :  { %2999 = vmatprep.subr.bf16.mxu1 %v3988_v45  ;;  %v4081_v45 = vld [vmem:[#allocation11 + $0x39c] ss:$24 sps:$4 sm:$0xff]  }
 0x2de   :  { %3000 = vmatpush1.bf16.msra.mxu1 %v3986_v46  ;;  %v4079_v46 = vld [vmem:[#allocation11 + $0x398] ss:$24 sps:$4 sm:$0xff]  }
 0x2df   :  { %3001 = vmatprep.subr.bf16.mxu1 %v3994_v47  ;;  %v4082_v47 = vld [vmem:[#allocation11 + $0xa0] ss:$24 sps:$4 sm:$0xff]  }
 0x2e2   :  { %3002 = vmatpush1.bf16.msra.mxu1 %v3992_v48  ;;  %v4087_v48 = vld [vmem:[#allocation11 + $0x36c] ss:$24 sps:$4 sm:$0xff]  }
 0x2e3   :  { %3003 = vmatprep.subr.bf16.mxu1 %v4000_v49  ;;  %v4090_v49 = vld [vmem:[#allocation11 + $0x74] ss:$24 sps:$4 sm:$0xff]  }
 0x2e6   :  { %3004 = vmatpush1.bf16.msra.mxu1 %v3998_v50  ;;  %v4085_v50 = vld [vmem:[#allocation11 + $0x368] ss:$24 sps:$4 sm:$0xff]  }
 0x2e7   :  { %3005 = vmatprep.subr.bf16.mxu1 %v4006_v51  ;;  %v4088_v51 = vld [vmem:[#allocation11 + $0x70] ss:$24 sps:$4 sm:$0xff]  }
 0x2ea   :  { %3006 = vmatpush1.bf16.msra.mxu1 %v4004_v52  ;;  %v4093_v52 = vld [vmem:[#allocation11 + $0x33c] ss:$24 sps:$4 sm:$0xff]  }
 0x2eb   :  { %3007 = vmatprep.subr.bf16.mxu1 %v4012_v53  ;;  %v4096_v53 = vld [vmem:[#allocation11 + $0x44] ss:$24 sps:$4 sm:$0xff]  }
 0x2ee   :  { %3008 = vmatpush2.bf16.msra.mxu1 %v4010_v54  ;;  %v4091_v54 = vld [vmem:[#allocation11 + $0x338] ss:$24 sps:$4 sm:$0xff]  }
 0x2ef   :  { %3009 = vmatprep.subr.bf16.mxu1 %v4018_v55  ;;  %v4094_v55 = vld [vmem:[#allocation11 + $0x40] ss:$24 sps:$4 sm:$0xff]  }
 0x2f2   :  { %3010 = vmatpush2.bf16.msra.mxu1 %v4016_v56  ;;  %v4099_v56 = vld [vmem:[#allocation11 + $0x30c] ss:$24 sps:$4 sm:$0xff]  }
 0x2f3   :  { %3011 = vmatprep.subr.bf16.mxu1 %v4024_v57  ;;  %v4102_v57 = vld [vmem:[#allocation11 + $0x14] ss:$24 sps:$4 sm:$0xff]  }
 0x2f6   :  { %3012 = vmatpush2.bf16.msra.mxu1 %v4022_v58  ;;  %v4097_v58 = vld [vmem:[#allocation11 + $0x308] ss:$24 sps:$4 sm:$0xff]  }
 0x2f7   :  { %3013 = vmatprep.subr.bf16.mxu1 %v4030_v59  ;;  %v4100_v59 = vld [vmem:[#allocation11 + $0x10] ss:$24 sps:$4 sm:$0xff]  }
 0x2fa   :  { %3014 = vmatpush2.bf16.msra.mxu1 %v4028_v60  ;;  %v4105_v60 = vld [vmem:[#allocation11 + $0x5dc] ss:$24 sps:$4 sm:$0xff]  }
 0x2fb   :  { %3015 = vmatprep.subr.bf16.mxu1 %v4036_v61  ;;  %v4108_v61 = vld [vmem:[#allocation11 + $0x2e4] ss:$24 sps:$4 sm:$0xff]  }
 0x2fe   :  { %3016 = vmatpush2.bf16.msra.mxu1 %v4034_v62  ;;  %v4103_v62 = vld [vmem:[#allocation11 + $0x5d8] ss:$24 sps:$4 sm:$0xff]  }
 0x2ff   :  { %3017 = vmatprep.subr.bf16.mxu1 %v4042_v63  ;;  %v4106_v63 = vld [vmem:[#allocation11 + $0x2e0] ss:$24 sps:$4 sm:$0xff]  }
 0x301   :  { %v1669_v6 = vpop.f32.mrf.mxu1  ;;  %v1710_v7 = vpop.f32.mrf.mxu0 }
 0x302   :  { %v1670_v8 = vadd.f32 %v1669_v6, %v904_v0  ;;  %3018 = vmatpush2.bf16.msra.mxu1 %v4040_v1  ;;  %v4111_v0 = vld [vmem:[#allocation11 + $0x5ac] ss:$24 sps:$4 sm:$0xff]   ;;  %v4117_v6 = vld [vmem:[#allocation11 + $0x57c] ss:$24 sps:$4 sm:$0xff]  }
 0x303   :  { %v1671_v10 = vpop.f32.mrf.mxu1  ;;  %v1712_v11 = vpop.f32.mrf.mxu0  ;;  %3019 = vmatprep.subr.bf16.mxu1 %v4048_v2  ;;  %v4114_v1 = vld [vmem:[#allocation11 + $0x2b4] ss:$24 sps:$4 sm:$0xff]   ;;  %v4109_v2 = vld [vmem:[#allocation11 + $0x5a8] ss:$24 sps:$4 sm:$0xff]  }
 0x304   :  { %v1711_v13 = vadd.f32 %v1710_v7, %v1670_v8  ;;  %v1672_v14 = vadd.f32 %v1671_v10, %v908_v3  ;;  %v4112_v3 = vld [vmem:[#allocation11 + $0x2b0] ss:$24 sps:$4 sm:$0xff]   ;;  %v4120_v7 = vld [vmem:[#allocation11 + $0x284] ss:$24 sps:$4 sm:$0xff]  }
 0x305   :  { %v1673_v15 = vpop.f32.mrf.mxu1  ;;  %v1714_v17 = vpop.f32.mrf.mxu0  ;;  %v4115_v8 = vld [vmem:[#allocation11 + $0x578] ss:$24 sps:$4 sm:$0xff]   ;;  %v4123_v10 = vld [vmem:[#allocation11 + $0x54c] ss:$24 sps:$4 sm:$0xff]  }
 0x306   :  { %v1713_v18 = vadd.f32 %v1712_v11, %v1672_v14  ;;  %3020 = vmatpush2.bf16.msra.mxu1 %v4046_v9  ;;  %v1719_v4 = vmax.f32 %v1711_v13, 0.0  ;;  %v4118_v9 = vld [vmem:[#allocation11 + $0x280] ss:$24 sps:$4 sm:$0xff]   ;;  %v4126_v11 = vld [vmem:[#allocation11 + $0x254] ss:$24 sps:$4 sm:$0xff]  }
 0x307   :  { %v1674_v20 = vpop.f32.mrf.mxu1  ;;  %v1715_v5 = vpop.f32.mrf.mxu0  ;;  %3021 = vmatprep.subr.bf16.mxu1 %v4054_v12  ;;  %v4121_v12 = vld [vmem:[#allocation11 + $0x548] ss:$24 sps:$4 sm:$0xff]   ;;  %v4129_v14 = vld [vmem:[#allocation11 + $0x51c] ss:$24 sps:$4 sm:$0xff]   ;;  %v4127_v17 = vld [vmem:[#allocation11 + $0x518] ss:$24 sps:$4 sm:$0xff]  }
 0x308   :  { %v1720_v21 = vmax.f32 %v1713_v18, 0.0  ;;  %v4496_v27 = vpack.c.bf16 %v1719_v4, %v1719_v4  ;;  %v4124_v13 = vld [vmem:[#allocation11 + $0x250] ss:$24 sps:$4 sm:$0xff]   ;;  %v4132_v15 = vld [vmem:[#allocation11 + $0x224] ss:$24 sps:$4 sm:$0xff]  }
 0x309   :  { %v4130_v18 = vld [vmem:[#allocation11 + $0x220] ss:$24 sps:$4 sm:$0xff]   ;;  %v4138_v4 = vld [vmem:[#allocation11 + $0x1f4] ss:$24 sps:$4 sm:$0xff]   ;;  %v4136_v5 = vld [vmem:[#allocation11 + $0x1f0] ss:$24 sps:$4 sm:$0xff]  }
 0x30a   :  { %v4494_v24 = vpack.c.bf16 %v1720_v21, %v1720_v21  ;;  %3022 = vmatpush2.bf16.msra.mxu1 %v4052_v19  ;;  %v4135_v19 = vld [vmem:[#allocation11 + $0x4ec] ss:$24 sps:$4 sm:$0xff]   ;;  %v4133_v20 = vld [vmem:[#allocation11 + $0x4e8] ss:$24 sps:$4 sm:$0xff]  }
 0x30b   :  { %3073 = vmatprep.subr.bf16.mxu1 %v4060_v16  ;;  %v4141_v16 = vld [vmem:[#allocation11 + $0x4bc] ss:$24 sps:$4 sm:$0xff]  }
 0x30c   :  { %2982 = vmatprep.mubr.bf16.mxu0 %v4494_v24  ;;  %v4144_v21 = vld [vmem:[#allocation11 + $0x1c4] ss:$24 sps:$4 sm:$0xff]  }
 0x30d   :  { %2983 = vmatmul.mubr.bf16.vlgmr.msra.gmra.mxu0 %v4496_v27  ;;  %3024 = vmatmul.mubr.bf16.vlgmr.msra.gmra.mxu1 %v4485_v36 }
 0x30e   :  { %3033 = vmatpush1.bf16.msra.mxu0 %v4055_v26  ;;  %3064 = vmatprep.mubr.bf16.mxu0 %v4494_v24  ;;  %v4139_v26 = vld [vmem:[#allocation11 + $0x4b8] ss:$24 sps:$4 sm:$0xff]  }
 0x30f   :  { %3074 = vmatpush1.bf16.msra.mxu1 %v4058_v28  ;;  %3105 = vmatprep.mubr.bf16.mxu1 %v4483_v34  ;;  %v4084_v34 = vld [vmem:[#allocation11 + $0xa4] ss:$24 sps:$4 sm:$0xff]   ;;  %v4142_v28 = vld [vmem:[#allocation11 + $0x1c0] ss:$24 sps:$4 sm:$0xff]  }
 0x310   :  { %3034 = vmatprep.subr.bf16.mxu0 %v4063_v29  ;;  %3075 = vmatprep.subr.bf16.mxu1 %v4066_v30  ;;  %v4147_v29 = vld [vmem:[#allocation11 + $0x48c] ss:$24 sps:$4 sm:$0xff]  }
 0x311   :  { %v4150_v30 = vld [vmem:[#allocation11 + $0x194] ss:$24 sps:$4 sm:$0xff]  }
 0x312   :  { %3035 = vmatpush1.bf16.msra.mxu0 %v4061_v31  ;;  %v4145_v31 = vld [vmem:[#allocation11 + $0x488] ss:$24 sps:$4 sm:$0xff]  }
 0x313   :  { %3076 = vmatpush1.bf16.msra.mxu1 %v4064_v32  ;;  %3036 = vmatprep.subr.bf16.mxu0 %v4069_v33  ;;  %v4148_v32 = vld [vmem:[#allocation11 + $0x190] ss:$24 sps:$4 sm:$0xff]   ;;  %v4153_v33 = vld [vmem:[#allocation11 + $0x464] ss:$24 sps:$4 sm:$0xff]  }
 0x314   :  { %3077 = vmatprep.subr.bf16.mxu1 %v4072_v35  ;;  %v4151_v35 = vld [vmem:[#allocation11 + $0x460] ss:$24 sps:$4 sm:$0xff]  }
 0x316   :  { %3037 = vmatpush1.bf16.msra.mxu0 %v4067_v37  ;;  %v4156_v37 = vld [vmem:[#allocation11 + $0x434] ss:$24 sps:$4 sm:$0xff]  }
 0x317   :  { %3078 = vmatpush1.bf16.msra.mxu1 %v4070_v38  ;;  %3038 = vmatprep.subr.bf16.mxu0 %v4075_v39  ;;  %v4154_v38 = vld [vmem:[#allocation11 + $0x430] ss:$24 sps:$4 sm:$0xff]   ;;  %v4159_v39 = vld [vmem:[#allocation11 + $0x404] ss:$24 sps:$4 sm:$0xff]  }
 0x318   :  { %3079 = vmatprep.subr.bf16.mxu1 %v4078_v40  ;;  %v4157_v40 = vld [vmem:[#allocation11 + $0x400] ss:$24 sps:$4 sm:$0xff]  }
 0x31a   :  { %3039 = vmatpush1.bf16.msra.mxu0 %v4073_v42  ;;  %v4162_v42 = vld [vmem:[#allocation11 + $0x3d4] ss:$24 sps:$4 sm:$0xff]  }
 0x31b   :  { %3080 = vmatpush1.bf16.msra.mxu1 %v4076_v44  ;;  %3040 = vmatprep.subr.bf16.mxu0 %v4081_v45  ;;  %v4160_v44 = vld [vmem:[#allocation11 + $0x3d0] ss:$24 sps:$4 sm:$0xff]   ;;  %v4165_v45 = vld [vmem:[#allocation11 + $0x3a4] ss:$24 sps:$4 sm:$0xff]  }
 0x31c   :  { %3081 = vmatprep.subr.bf16.mxu1 %v4084_v34  ;;  %v4163_v34 = vld [vmem:[#allocation11 + $0x3a0] ss:$24 sps:$4 sm:$0xff]  }
 0x31e   :  { %3041 = vmatpush1.bf16.msra.mxu0 %v4079_v46  ;;  %v4168_v46 = vld [vmem:[#allocation11 + $0x374] ss:$24 sps:$4 sm:$0xff]  }
 0x31f   :  { %3082 = vmatpush1.bf16.msra.mxu1 %v4082_v47  ;;  %3042 = vmatprep.subr.bf16.mxu0 %v4087_v48  ;;  %v4171_v47 = vld [vmem:[#allocation11 + $0x344] ss:$24 sps:$4 sm:$0xff]   ;;  %v4174_v48 = vld [vmem:[#allocation11 + $0x314] ss:$24 sps:$4 sm:$0xff]  }
 0x320   :  { %3083 = vmatprep.subr.bf16.mxu1 %v4090_v49  ;;  %v4172_v49 = vld [vmem:[#allocation11 + $0x310] ss:$24 sps:$4 sm:$0xff]  }
 0x322   :  { %3043 = vmatpush1.bf16.msra.mxu0 %v4085_v50  ;;  %v4177_v50 = vld [vmem:[#allocation11 + $0x5e4] ss:$24 sps:$4 sm:$0xff]  }
 0x323   :  { %3084 = vmatpush1.bf16.msra.mxu1 %v4088_v51  ;;  %3044 = vmatprep.subr.bf16.mxu0 %v4093_v52  ;;  %v4175_v51 = vld [vmem:[#allocation11 + $0x5e0] ss:$24 sps:$4 sm:$0xff]   ;;  %v4180_v52 = vld [vmem:[#allocation11 + $0x5b4] ss:$24 sps:$4 sm:$0xff]  }
 0x324   :  { %3085 = vmatprep.subr.bf16.mxu1 %v4096_v53  ;;  %v4178_v53 = vld [vmem:[#allocation11 + $0x5b0] ss:$24 sps:$4 sm:$0xff]  }
 0x326   :  { %3045 = vmatpush1.bf16.msra.mxu0 %v4091_v54  ;;  %v4183_v54 = vld [vmem:[#allocation11 + $0x584] ss:$24 sps:$4 sm:$0xff]  }
 0x327   :  { %3086 = vmatpush1.bf16.msra.mxu1 %v4094_v55  ;;  %3046 = vmatprep.subr.bf16.mxu0 %v4099_v56  ;;  %v4181_v55 = vld [vmem:[#allocation11 + $0x580] ss:$24 sps:$4 sm:$0xff]   ;;  %v4186_v56 = vld [vmem:[#allocation11 + $0x554] ss:$24 sps:$4 sm:$0xff]  }
 0x328   :  { %3087 = vmatprep.subr.bf16.mxu1 %v4102_v57  ;;  %v4184_v57 = vld [vmem:[#allocation11 + $0x550] ss:$24 sps:$4 sm:$0xff]  }
 0x32a   :  { %3047 = vmatpush1.bf16.msra.mxu0 %v4097_v58  ;;  %v4189_v58 = vld [vmem:[#allocation11 + $0x524] ss:$24 sps:$4 sm:$0xff]  }
 0x32b   :  { %3088 = vmatpush1.bf16.msra.mxu1 %v4100_v59  ;;  %3048 = vmatprep.subr.bf16.mxu0 %v4105_v60  ;;  %v4187_v59 = vld [vmem:[#allocation11 + $0x520] ss:$24 sps:$4 sm:$0xff]   ;;  %v4192_v60 = vld [vmem:[#allocation11 + $0x4f4] ss:$24 sps:$4 sm:$0xff]  }
 0x32c   :  { %3089 = vmatprep.subr.bf16.mxu1 %v4108_v61  ;;  %v4190_v61 = vld [vmem:[#allocation11 + $0x4f0] ss:$24 sps:$4 sm:$0xff]  }
 0x32e   :  { %3049 = vmatpush2.bf16.msra.mxu0 %v4103_v62  ;;  %v4195_v62 = vld [vmem:[#allocation11 + $0x4c4] ss:$24 sps:$4 sm:$0xff]  }
 0x32f   :  { %3090 = vmatpush2.bf16.msra.mxu1 %v4106_v63  ;;  %3050 = vmatprep.subr.bf16.mxu0 %v4111_v0  ;;  %v4193_v63 = vld [vmem:[#allocation11 + $0x4c0] ss:$24 sps:$4 sm:$0xff]   ;;  %v4198_v0 = vld [vmem:[#allocation11 + $0x494] ss:$24 sps:$4 sm:$0xff]  }
 0x330   :  { %3091 = vmatprep.subr.bf16.mxu1 %v4114_v1  ;;  %v4196_v1 = vld [vmem:[#allocation11 + $0x490] ss:$24 sps:$4 sm:$0xff]  }
 0x332   :  { %3051 = vmatpush2.bf16.msra.mxu0 %v4109_v2 }
 0x333   :  { %3092 = vmatpush2.bf16.msra.mxu1 %v4112_v3  ;;  %3052 = vmatprep.subr.bf16.mxu0 %v4117_v6 }
 0x334   :  { %3093 = vmatprep.subr.bf16.mxu1 %v4120_v7 }
 0x336   :  { %3053 = vmatpush2.bf16.msra.mxu0 %v4115_v8  ;;  %v1917_v8 = vld [vmem:[%s4527_s8] sm:$0x3f]  ;;  %s4374_s8 = smov [#allocation13]  }
 0x337   :  { %3094 = vmatpush2.bf16.msra.mxu1 %v4118_v9  ;;  %3054 = vmatprep.subr.bf16.mxu0 %v4123_v10  ;;  %v1922_v9 = vrot.slane %v1917_v8, %v4446_v23  ;;  %v1926_v10 = vrot.slane %v1917_v8, %v4452_v25  ;;  %v1930_v23 = vrot.slane %v1917_v8, %v4457_v41  ;;  %v1937_v41 = vsub.s32 4, %v4443_v22  ;;  %s3173_s22 = sshll.u32 %s4374_s8, 4  ;;  %s3174_s22 = int_to_ptr.vmem [resolvable:$true] %s3173_s22 }
 0x338   :  { %3095 = vmatprep.subr.bf16.mxu1 %v4126_v11  ;;  %v1934_v25 = vrot.slane %v1917_v8, %v4463_v43  ;;  %v1941_v43 = vsub.s32 5, %v4443_v22  ;;  %s4331_s23 = scalar_lea.vmem %s3174_s22, 768  ;;  %p4336_p3 = scmp.lt.s32.totalorder %s3174_s22, %s3174_s22 }
 0x339   :  { %p4332_p2 = scmp.ne.s32.totalorder %s3174_s22, %s4331_s23  ;;  %p4337_p4 = scmp.lt.s32.totalorder %s4331_s23, %s4331_s23 }
 0x33a   :  { %3055 = vmatpush2.bf16.msra.mxu0 %v4121_v12 }
 0x33b   :  { %3096 = vmatpush2.bf16.msra.mxu1 %v4124_v13  ;;  %3056 = vmatprep.subr.bf16.mxu0 %v4129_v14  ;;  %p4338_p5 = por %p4337_p4, %p4336_p3 }
 0x33c   :  { %3097 = vmatprep.subr.bf16.mxu1 %v4132_v15 }
 0x33d   :  { %p4339_p6 = pnand %p4338_p5, %p4332_p2 }
 0x33e   :  { %3057 = vmatpush2.bf16.msra.mxu0 %v4127_v17 }
 0x33f   :  { %3098 = vmatpush2.bf16.msra.mxu1 %v4130_v18  ;;  %3058 = vmatprep.subr.bf16.mxu0 %v4135_v19 }
 0x340   :  { %3099 = vmatprep.subr.bf16.mxu1 %v4138_v4 }
 0x342   :  { %3059 = vmatpush2.bf16.msra.mxu0 %v4133_v20 }
 0x343   :  { %3100 = vmatpush2.bf16.msra.mxu1 %v4136_v5  ;;  %3060 = vmatprep.subr.bf16.mxu0 %v4141_v16 }
 0x344   :  { %3101 = vmatprep.subr.bf16.mxu1 %v4144_v21 }
 0x346   :  { %3061 = vmatpush2.bf16.msra.mxu0 %v4139_v26 }
 0x347   :  { %3102 = vmatpush2.bf16.msra.mxu1 %v4142_v28  ;;  %3062 = vmatprep.subr.bf16.mxu0 %v4147_v29 }
 0x348   :  { %3103 = vmatprep.subr.bf16.mxu1 %v4150_v30 }
 0x34a   :  { %3063 = vmatpush2.bf16.msra.mxu0 %v4145_v31 }
 0x34b   :  { %3104 = vmatpush2.bf16.msra.mxu1 %v4148_v32  ;;  %3114 = vmatprep.subr.bf16.mxu0 %v4153_v33 }
 0x34d   :  { %3065 = vmatmul.mubr.bf16.vlgmr.msra.gmra.mxu0 %v4496_v27 }
 0x34e   :  { %3106 = vmatmul.mubr.bf16.vlgmr.msra.gmra.mxu1 %v4485_v36  ;;  %3115 = vmatpush1.bf16.msra.mxu0 %v4151_v35  ;;  %v4166_v36 = vld [vmem:[#allocation11 + $0x370] ss:$24 sps:$4 sm:$0xff]  }
 0x34f   :  { %3146 = vmatprep.mubr.bf16.mxu0 %v4494_v24  ;;  %3116 = vmatprep.subr.bf16.mxu0 %v4156_v37  ;;  %v4169_v24 = vld [vmem:[#allocation11 + $0x340] ss:$24 sps:$4 sm:$0xff]  }
 0x352   :  { %3117 = vmatpush1.bf16.msra.mxu0 %v4154_v38 }
 0x353   :  { %3118 = vmatprep.subr.bf16.mxu0 %v4159_v39 }
 0x356   :  { %3119 = vmatpush1.bf16.msra.mxu0 %v4157_v40 }
 0x357   :  { %3120 = vmatprep.subr.bf16.mxu0 %v4162_v42 }
 0x35a   :  { %3121 = vmatpush1.bf16.msra.mxu0 %v4160_v44 }
 0x35b   :  { %3122 = vmatprep.subr.bf16.mxu0 %v4165_v45  ;;  %v1938_v45 = vrot.slane %v1917_v8, %v1937_v41 }
 0x35e   :  { %3123 = vmatpush1.bf16.msra.mxu0 %v4163_v34  ;;  %v1942_v34 = vrot.slane %v1917_v8, %v1941_v43 }
 0x35f   :  { %3124 = vmatprep.subr.bf16.mxu0 %v4168_v46 }
 0x362   :  { %3125 = vmatpush1.bf16.msra.mxu0 %v4166_v36 }
 0x363   :  { %3126 = vmatprep.subr.bf16.mxu0 %v4171_v47 }
 0x366   :  { %3127 = vmatpush1.bf16.msra.mxu0 %v4169_v24 }
 0x367   :  { %3128 = vmatprep.subr.bf16.mxu0 %v4174_v48 }
 0x36a   :  { %3129 = vmatpush1.bf16.msra.mxu0 %v4172_v49 }
 0x36b   :  { %3130 = vmatprep.subr.bf16.mxu0 %v4177_v50 }
 0x36e   :  { %3131 = vmatpush2.bf16.msra.mxu0 %v4175_v51 }
 0x36f   :  { %3132 = vmatprep.subr.bf16.mxu0 %v4180_v52 }
 0x372   :  { %3133 = vmatpush2.bf16.msra.mxu0 %v4178_v53 }
 0x373   :  { %3134 = vmatprep.subr.bf16.mxu0 %v4183_v54 }
 0x376   :  { %3135 = vmatpush2.bf16.msra.mxu0 %v4181_v55 }
 0x377   :  { %3136 = vmatprep.subr.bf16.mxu0 %v4186_v56 }
 0x37a   :  { %3137 = vmatpush2.bf16.msra.mxu0 %v4184_v57 }
 0x37b   :  { %3138 = vmatprep.subr.bf16.mxu0 %v4189_v58 }
 0x37e   :  { %3139 = vmatpush2.bf16.msra.mxu0 %v4187_v59 }
 0x37f   :  { %3140 = vmatprep.subr.bf16.mxu0 %v4192_v60 }
 0x382   :  { %3141 = vmatpush2.bf16.msra.mxu0 %v4190_v61 }
 0x383   :  { %3142 = vmatprep.subr.bf16.mxu0 %v4195_v62 }
 0x386   :  { %3143 = vmatpush2.bf16.msra.mxu0 %v4193_v63 }
 0x387   :  { %3144 = vmatprep.subr.bf16.mxu0 %v4198_v0 }
 0x38a   :  { %3145 = vmatpush2.bf16.msra.mxu0 %v4196_v1 }
 0x38d   :  { %3147 = vmatmul.mubr.bf16.vlgmr.msra.gmra.mxu0 %v4496_v27  ;;  %v2943_v2 = vpop.f32.mrf.mxu1 }
 0x38e   :  { %v2944_v11 = vadd.f32 %v2943_v2, %v1922_v9 }
 0x38f   :  { %v2945_v3 = vpop.f32.mrf.mxu1 }
 0x390   :  { %v2946_v14 = vadd.f32 %v2945_v3, %v1926_v10 }
 0x391   :  { %v2947_v6 = vpop.f32.mrf.mxu1 }
 0x393   :  { %v2948_v7 = vpop.f32.mrf.mxu1 }
 0x3cd   :  { %v2984_v12 = vpop.f32.mrf.mxu0  ;;  %v3025_v13 = vpop.f32.mrf.mxu1 }
 0x3ce   :  { %v2985_v15 = vadd.f32 %v2984_v12, %v2944_v11  ;;  %v3026_v26 = vadd.f32 %v3025_v13, %v1930_v23 }
 0x3cf   :  { %v2986_v17 = vpop.f32.mrf.mxu0  ;;  %v3027_v18 = vpop.f32.mrf.mxu1 }
 0x3d0   :  { %4199 = vtanh.f32 %v2985_v15  ;;  %v2987_v27 = vadd.f32 %v2986_v17, %v2946_v14  ;;  %v3028_v29 = vadd.f32 %v3027_v18, %v1934_v25 }
 0x3d1   :  { %v2988_v19 = vpop.f32.mrf.mxu0  ;;  %v3029_v4 = vpop.f32.mrf.mxu1 }
 0x3d2   :  { %4201 = vtanh.f32 %v2987_v27 }
 0x3d3   :  { %v2989_v20 = vpop.f32.mrf.mxu0  ;;  %v3030_v5 = vpop.f32.mrf.mxu1 }
 0x3dd   :  { %v4200_v16 = vpop.eup %4199 }
 0x3de   :  { %3161 = vst [vmem:[#allocation13] sm:$0xff] %v4200_v16 }
 0x3df   :  { %v4202_v21 = vpop.eup %4201 }
 0x3e0   :  { %3162 = vst [vmem:[#allocation13 + $0x8] sm:$0xff] %v4202_v21 }
 0x40d   :  { %v3066_v28 = vpop.f32.mrf.mxu0 }
 0x40e   :  { %v3067_v30 = vadd.f32 %v3066_v28, %v3026_v26  ;;  %v3107_v31 = vpop.f32.mrf.mxu1 }
 0x40f   :  { %v3068_v32 = vpop.f32.mrf.mxu0  ;;  %v3108_v46 = vadd.f32 %v3107_v31, %v1938_v45 }
 0x410   :  { %4203 = vtanh.f32 %v3067_v30  ;;  %v3069_v33 = vadd.f32 %v3068_v32, %v3028_v29  ;;  %v3109_v35 = vpop.f32.mrf.mxu1 }
 0x411   :  { %v3070_v37 = vpop.f32.mrf.mxu0  ;;  %v3110_v47 = vadd.f32 %v3109_v35, %v1942_v34 }
 0x412   :  { %4205 = vtanh.f32 %v3069_v33  ;;  %v3111_v38 = vpop.f32.mrf.mxu1 }
 0x413   :  { %v3071_v39 = vpop.f32.mrf.mxu0 }
 0x414   :  { %v3112_v40 = vpop.f32.mrf.mxu1 }
 0x41d   :  { %v4204_v42 = vpop.eup %4203 }
 0x41e   :  { %3163 = vst [vmem:[#allocation13 + $0x10] sm:$0xff] %v4204_v42 }
 0x41f   :  { %v4206_v44 = vpop.eup %4205 }
 0x420   :  { %3164 = vst [vmem:[#allocation13 + $0x18] sm:$0xff] %v4206_v44 }
 0x44d   :  { %v3148_v36 = vpop.f32.mrf.mxu0 }
 0x44e   :  { %v3149_v24 = vadd.f32 %v3148_v36, %v3108_v46 }
 0x44f   :  { %v3150_v48 = vpop.f32.mrf.mxu0 }
 0x450   :  { %4207 = vtanh.f32 %v3149_v24  ;;  %v3151_v49 = vadd.f32 %v3150_v48, %v3110_v47 }
 0x451   :  { %v3152_v50 = vpop.f32.mrf.mxu0 }
 0x452   :  { %4209 = vtanh.f32 %v3151_v49 }
 0x453   :  { %v3153_v51 = vpop.f32.mrf.mxu0 }
 0x45d   :  { %v4208_v52 = vpop.eup %4207 }
 0x45e   :  { %3165 = vst [vmem:[#allocation13 + $0x20] sm:$0xff] %v4208_v52 }
 0x45f   :  { %v4210_v53 = vpop.eup %4209 }
 0x460   :  { %3166 = vst [vmem:[#allocation13 + $0x28] sm:$0xff] %v4210_v53 }
 0x461   :  { %4342 = shalt.err (!%p4339_p6)
}
 0x462   :  { %3176 = dma.vmem_to_hbm [thread:$0]  %s3174_s22, 768, %s4528_s9, [#allocation4]  }
 0x463   :  { %4359 = dma.done.wait [#allocation4], 768  }
 0x464   :  { %4360 = vsyncadd [#allocation4], 4294966528 }
 0x465   :  { %3180 = vsyncpa [#allocation3], 1 }
 0x466   :  { %3181 = vsyncpa [#allocation6], 1 }
 0x467   :  { %3182 = vsyncpa [#allocation9], 1 }
 0x468   :  { %3183 = vsyncpa [#allocation12], 1 }
 0x469   :  { %3184 = vsyncpa [#allocation4], 1 }

</bundles_post_ra>
